<compile_context>
chip_gen: v7x
topology: tpu7x:2x2x1
jax: 0.10.0
libtpu: 0.0.40
codegen_flags: <defaults>
</compile_context>

<pallas_src>
import math
from functools import partial

import jax
import jax.numpy as jnp
from jax import lax
from jax.experimental import pallas as pl
from jax.experimental.pallas import tpu as pltpu


# ------------------------------ kernel body -------------------------------- #

def _layernorm(y, g, b, eps=1e-5):
    """y: (M, D); g, b: (1, D). Biased variance + eps=1e-5, like torch LayerNorm."""
    mu = jnp.mean(y, axis=-1, keepdims=True)
    var = jnp.mean(jnp.square(y - mu), axis=-1, keepdims=True)
    return (y - mu) * lax.rsqrt(var + eps) * g + b


def encoder_stack_kernel(x_ref, wqkv_ref, bqkv_ref, wo_ref, bo_ref,
                         w1_ref, b1_ref, w2_ref, b2_ref,
                         g1_ref, be1_ref, g2_ref, be2_ref,
                         o_ref, *, num_heads):
    f32, bf16 = jnp.float32, jnp.bfloat16
    tn, L, D = o_ref.shape
    H = num_heads
    hd = D // H
    M = tn * L
    scale = 1.0 / math.sqrt(hd)

    layer = pl.program_id(1)

    # Layer 0: pull the input block into the resident OUTPUT block; it then
    # carries the f32 residual stream across the whole layer stack (the output
    # BlockSpec is constant over the layer axis, so this block stays in VMEM
    # and is written back to HBM only once per batch tile).
    @pl.when(layer == 0)
    def _():
        o_ref[...] = x_ref[...]

    x2 = o_ref[...].reshape(M, D)                 # f32 residual stream (M, D)

    def mm(a, w_ref, b_ref):
        # bf16 MXU operands, f32 accumulation, f32 bias add.
        y = lax.dot_general(a.astype(bf16), w_ref[...],
                            (((1,), (0,)), ((), ())),
                            preferred_element_type=f32)
        return y + b_ref[...]

    # ---- fused QKV projection: one MXU pass over M = tn*L rows ----
    # Cast to bf16 BEFORE head slicing so the head-gather copies half the bytes.
    qkv = mm(x2, wqkv_ref, bqkv_ref).astype(bf16).reshape(tn, L, 3 * D)

    def heads(base):
        # Gather all heads onto the leading (batch) dim -> (H*tn, L, hd).
        # NOTE: lane-offset slices; heads live on a major dim afterwards so the
        # score / PV matmuls are single batched dot_generals.
        return jnp.concatenate(
            [qkv[:, :, base + h * hd: base + (h + 1) * hd] for h in range(H)],
            axis=0)

    q, k, v = heads(0), heads(D), heads(2 * D)     # bf16 (H*tn, L, hd)

    # ---- single batched score / PV matmuls over all (head, batch) pairs ----
    # NOTE: lane dim of s/p is L (= original PyTorch batch, batch_first=False);
    # when L << 128 these are lane-sparse by construction.
    s = lax.dot_general(q, k, (((2,), (2,)), ((0,), (0,))),
                        preferred_element_type=f32) * scale       # (H*tn, L, L)
    s = s - jnp.max(s, axis=-1, keepdims=True)
    p = jnp.exp(s)
    # Normalize with the EUP reciprocal (frees VALU divide slots).
    p = p * pl.reciprocal(jnp.sum(p, axis=-1, keepdims=True), approx=True)
    o = lax.dot_general(p.astype(bf16), v, (((2,), (1,)), ((0,), (0,))),
                        preferred_element_type=f32)               # (H*tn, L, hd)

    # ---- head-merge + output projection folded into per-head MXU passes ----
    # wo is pre-laid-out on the host as (H, hd, D); accumulate H small matmuls
    # instead of a channel-dim concat + (M,D)x(D,D) matmul (no lane relayout,
    # no H x (M,D) intermediate).
    o_h = o.astype(bf16).reshape(H, M, hd)
    attn_out = jnp.zeros((M, D), f32)
    for h in range(H):
        attn_out = attn_out + lax.dot_general(
            o_h[h], wo_ref[h], (((1,), (0,)), ((), ())),
            preferred_element_type=f32)
    attn_out = attn_out + bo_ref[...]

    # dropout1 / dropout2 -> identity (eval mode).
    out1 = _layernorm(x2 + attn_out, g1_ref[...], be1_ref[...])
    hidden = jnp.maximum(mm(out1, w1_ref, b1_ref), 0.0)
    ffn = mm(hidden, w2_ref, b2_ref)
    out2 = _layernorm(out1 + ffn, g2_ref[...], be2_ref[...])

    o_ref[...] = out2.reshape(tn, L, D)


# ------------------------------ host wrapper ------------------------------- #

def _default_vmem_budget():
    """Generation-aware VMEM budget (same number is given to the compiler):
    ~96 MiB on v5e/v6e (128 MiB physical), ~48 MiB on v7x (64 MiB per TC)."""
    cap = 64 * 1024 * 1024                      # conservative fallback (v7x TC)
    try:
        cap = int(pltpu.get_tpu_info().vmem_capacity_bytes)
    except Exception:
        pass
    return int(min((cap * 3) // 4, 112 * 1024 * 1024))


def _min_batch_tiles():
    """On v7x (2 TensorCores/chip) keep >= 2 steps on the parallel batch-tile
    axis so both cores get work; 1 elsewhere (avoids re-streaming weights)."""
    try:
        kind = jax.devices()[0].device_kind.lower()
        if "v7" in kind:
            return 2
    except Exception:
        pass
    return 1


def _pick_batch_tile(N, L, D, H, d_ff, vmem_budget, min_batch_tiles=1):
    """Largest divisor of N whose per-layer working set fits `vmem_budget`
    (the same value passed as the compiler vmem limit), accounting for the
    H x (L, L) score tensors and double-buffered weights, preferring
    MXU-aligned M = tn*L."""
    # Double-buffered per-layer weights: bf16 matmul weights + f32 biases/LN.
    w_bf16 = 2 * (4 * D * D + 2 * D * d_ff)
    w_f32 = 4 * (9 * D + d_ff)
    weight_bytes = 2 * (w_bf16 + w_f32)
    budget = max(vmem_budget - weight_bytes, 1 << 20)
    # Per batch-row (one row of N, full L) f32/bf16 working set, including the
    # H x (L, L) scores + softmax and the in/out activation blocks.
    per_row = 4 * L * (16 * D + 2 * d_ff + 3 * H * L)
    cap = max(1, budget // max(per_row, 1))
    mbt = max(1, min(min_batch_tiles, N))
    cap = min(cap, max(1, N // mbt))
    divs = [t for t in range(1, N + 1) if N % t == 0 and t <= cap]
    best = max(divs)
    # Prefer M = tn*L aligned to the 256-wide (v6e/v7x) / 128-wide (v5e) MXU,
    # as long as it doesn't shrink the tile by more than 2x.
    for align in (256, 128):
        good = [t for t in divs if (t * L) % align == 0]
        if good and max(good) * 2 >= best:
            return int(max(good))
    return int(best)


def encoder_stack_pallas(x_nld, params, num_heads, *, tn=None, vmem_budget=None):
    N, L, D = x_nld.shape
    num_layers = params["wqkv_t"].shape[0]
    d_ff = params["w1_t"].shape[2]
    H = num_heads
    hd = D // H
    if vmem_budget is None:
        vmem_budget = _default_vmem_budget()
    if tn is None:
        tn = _pick_batch_tile(N, L, D, H, d_ff, vmem_budget,
                              min_batch_tiles=_min_batch_tiles())
    grid = (N // tn, num_layers)
    # TODO(synk): if (N//tn - 1) * weight_bytes dominates activation traffic
    # (tiny VMEM, huge weights), reorder to stream weights once instead.

    act_spec = pl.BlockSpec((tn, L, D), lambda i, l: (i, 0, 0))

    def wspec(shape):   # per-layer weight slice, layer dim squeezed
        zeros = (0,) * len(shape)
        return pl.BlockSpec((None,) + shape, lambda i, l: (l,) + zeros)

    in_specs = [
        act_spec,
        wspec((D, 3 * D)), wspec((1, 3 * D)),      # wqkv_t, bqkv
        wspec((H, hd, D)), wspec((1, D)),          # wo_h,   bo
        wspec((D, d_ff)),  wspec((1, d_ff)),       # w1_t,   b1
        wspec((d_ff, D)),  wspec((1, D)),          # w2_t,   b2
        wspec((1, D)), wspec((1, D)),              # g1, be1
        wspec((1, D)), wspec((1, D)),              # g2, be2
    ]

    flops = num_layers * (2 * N * L * D * (4 * D + 2 * d_ff) + 4 * N * L * L * D)
    transcendentals = num_layers * N * num_heads * L * L
    w_bytes = sum(int(v.size) * v.dtype.itemsize for v in params.values())
    bytes_accessed = 2 * 4 * N * L * D + (N // tn) * w_bytes

    return pl.pallas_call(
        partial(encoder_stack_kernel, num_heads=num_heads),
        grid=grid,
        in_specs=in_specs,
        out_specs=act_spec,
        out_shape=jax.ShapeDtypeStruct((N, L, D), jnp.float32),
        compiler_params=pltpu.CompilerParams(
            dimension_semantics=("parallel", "arbitrary"),
            vmem_limit_bytes=int(vmem_budget)),
        cost_estimate=pl.CostEstimate(flops=int(flops),
                                      transcendentals=int(transcendentals),
                                      bytes_accessed=int(bytes_accessed)),
    )(x_nld,
      params["wqkv_t"], params["bqkv"], params["wo_h"], params["bo"],
      params["w1_t"], params["b1"], params["w2_t"], params["b2"],
      params["g1"], params["be1"], params["g2"], params["be2"])


def encoder_forward(token_ids, emb, pe, packed_params, num_heads):
    B, S = token_ids.shape
    # Embedding + PE are cheap glue; XLA fuses them with the single layout
    # transpose into the kernel-native (N, L, D) = (S, B, D) layout.
    x = jnp.take(emb, token_ids, axis=0) + pe[None, :S, :]      # (B, S, D)
    x_nld = jnp.transpose(x, (1, 0, 2))                          # (S, B, D)
    out_nld = encoder_stack_pallas(x_nld, packed_params, num_heads)
    return jnp.transpose(out_nld, (1, 0, 2))                     # (B, S, D)


# ---------------------- params / positional encoding ----------------------- #

def make_positional_encoding(max_len, d_model):
    position = jnp.arange(max_len, dtype=jnp.float32)[:, None]
    div_term = jnp.exp(jnp.arange(0, d_model, 2, dtype=jnp.float32)
                       * (-math.log(10000.0) / d_model))
    ang = position * div_term
    pe = jnp.zeros((max_len, d_model), jnp.float32)
    pe = pe.at[:, 0::2].set(jnp.sin(ang))
    pe = pe.at[:, 1::2].set(jnp.cos(ang))
    return pe


def init_params(key, vocab_size, num_layers, d_model, d_ff):
    keys = jax.random.split(key, 1 + num_layers)
    emb = jax.random.normal(keys[0], (vocab_size, d_model), jnp.float32)
    s = 0.1
    layers = []
    for li in range(num_layers):
        ks = jax.random.split(keys[1 + li], 8)
        layers.append(dict(
            wqkv=(jax.random.normal(ks[0], (3 * d_model, d_model)) * s).astype(jnp.float32),
            bqkv=(jax.random.normal(ks[1], (1, 3 * d_model)) * s).astype(jnp.float32),
            wo=(jax.random.normal(ks[2], (d_model, d_model)) * s).astype(jnp.float32),
            bo=(jax.random.normal(ks[3], (1, d_model)) * s).astype(jnp.float32),
            w1=(jax.random.normal(ks[4], (d_ff, d_model)) * s).astype(jnp.float32),
            b1=(jax.random.normal(ks[5], (1, d_ff)) * s).astype(jnp.float32),
            w2=(jax.random.normal(ks[6], (d_model, d_ff)) * s).astype(jnp.float32),
            b2=(jax.random.normal(ks[7], (1, d_model)) * s).astype(jnp.float32),
            g1=jnp.ones((1, d_model), jnp.float32),
            be1=jnp.zeros((1, d_model), jnp.float32),
            g2=jnp.ones((1, d_model), jnp.float32),
            be2=jnp.zeros((1, d_model), jnp.float32),
        ))
    return emb, layers


def pack_params(layer_params, num_heads):
    """Stack per-layer params with a leading layer axis; pre-transpose weights
    to (in, out), pre-split Wo into per-head (H, hd, D) blocks, and pre-cast
    matmul weights to bf16 (once, on the host)."""
    def stack(name):
        return jnp.stack([p[name] for p in layer_params])
    wo_t = jnp.transpose(stack("wo"), (0, 2, 1))                 # (nl, D, D) (in, out)
    nl, D, _ = wo_t.shape
    hd = D // num_heads
    return dict(
        wqkv_t=jnp.transpose(stack("wqkv"), (0, 2, 1)).astype(jnp.bfloat16),
        bqkv=stack("bqkv"),
        wo_h=wo_t.reshape(nl, num_heads, hd, D).astype(jnp.bfloat16),
        bo=stack("bo"),
        w1_t=jnp.transpose(stack("w1"), (0, 2, 1)).astype(jnp.bfloat16),
        b1=stack("b1"),
        w2_t=jnp.transpose(stack("w2"), (0, 2, 1)).astype(jnp.bfloat16),
        b2=stack("b2"),
        g1=stack("g1"), be1=stack("be1"), g2=stack("g2"), be2=stack("be2"),
    )


# -------------------- pure-JAX reference (same precision) ------------------ #

def _bf16_dot(a, b):
    return jnp.dot(a.astype(jnp.bfloat16), b.astype(jnp.bfloat16),
                   preferred_element_type=jnp.float32)


def encoder_layer_ref(x, p, num_heads):
    L, N, D = x.shape
    H, hd = num_heads, D // num_heads
    x2 = x.reshape(L * N, D)
    qkv = _bf16_dot(x2, p["wqkv"].T) + p["bqkv"][0]
    qkv = qkv.reshape(L, N, 3, H, hd)
    q, k, v = qkv[:, :, 0], qkv[:, :, 1], qkv[:, :, 2]            # (L,N,H,hd)
    s = jnp.einsum("lnhe,mnhe->nhlm", q.astype(jnp.bfloat16),
                   k.astype(jnp.bfloat16),
                   preferred_element_type=jnp.float32) / math.sqrt(hd)
    pw = jax.nn.softmax(s, axis=-1)
    o = jnp.einsum("nhlm,mnhe->lnhe", pw.astype(jnp.bfloat16),
                   v.astype(jnp.bfloat16),
                   preferred_element_type=jnp.float32).reshape(L, N, D)
    attn_out = _bf16_dot(o.reshape(L * N, D), p["wo"].T) + p["bo"][0]

    def ln(y, g, b):
        mu = jnp.mean(y, -1, keepdims=True)
        var = jnp.mean((y - mu) ** 2, -1, keepdims=True)
        return (y - mu) / jnp.sqrt(var + 1e-5) * g + b

    out1 = ln(x2 + attn_out, p["g1"][0], p["be1"][0])
    h = jnp.maximum(_bf16_dot(out1, p["w1"].T) + p["b1"][0], 0.0)
    ffn = _bf16_dot(h, p["w2"].T) + p["b2"][0]
    out2 = ln(out1 + ffn, p["g2"][0], p["be2"][0])
    return out2.reshape(L, N, D)


def encoder_forward_ref(token_ids, emb, pe, layer_params, num_heads):
    x = jnp.take(emb, token_ids, axis=0)
    x = x + pe[None, :token_ids.shape[1], :]
    for p in layer_params:
        x = encoder_layer_ref(x, p, num_heads)
    return x


# ----------------------------------- main ---------------------------------- #

if __name__ == "__main__":
    vocab_size = 50
    num_layers = 2
    d_model = 32
    num_heads = 4
    d_ff = 64
    B, S = 2, 8                       # token-id input shape (batch, seq)

    key = jax.random.PRNGKey(0)
    k_tok, k_par = jax.random.split(key)
    token_ids = jax.random.randint(k_tok, (B, S), 0, vocab_size, dtype=jnp.int32)

    emb, layer_params = init_params(k_par, vocab_size, num_layers, d_model, d_ff)
    pe = make_positional_encoding(64, d_model)
    packed = pack_params(layer_params, num_heads)

    fwd = jax.jit(partial(encoder_forward, num_heads=num_heads))
    out = jax.block_until_ready(fwd(token_ids, emb, pe, packed))

    ref = encoder_forward_ref(token_ids, emb, pe, layer_params, num_heads)
    assert out.shape == (B, S, d_model)
    assert bool(jnp.all(jnp.isfinite(out)))
    max_err = float(jnp.max(jnp.abs(out - ref)))
    assert jnp.allclose(out, ref, rtol=2e-2, atol=2e-2), \
        f"mismatch vs reference (max abs err {max_err})"

    print("KERNEL_OK")
</pallas_src>

<mosaic_0001>
module attributes {stable_mosaic.version = 11 : i64} {
  func.func @encoder_stack_kernel(%arg0: i32, %arg1: i32, %arg2: memref<8x2x32xf32, #tpu.memory_space<vmem>>, %arg3: memref<1x32x96xbf16, #tpu.memory_space<vmem>>, %arg4: memref<1x1x96xf32, #tpu.memory_space<vmem>>, %arg5: memref<1x4x8x32xbf16, #tpu.memory_space<vmem>>, %arg6: memref<1x1x32xf32, #tpu.memory_space<vmem>>, %arg7: memref<1x32x64xbf16, #tpu.memory_space<vmem>>, %arg8: memref<1x1x64xf32, #tpu.memory_space<vmem>>, %arg9: memref<1x64x32xbf16, #tpu.memory_space<vmem>>, %arg10: memref<1x1x32xf32, #tpu.memory_space<vmem>>, %arg11: memref<1x1x32xf32, #tpu.memory_space<vmem>>, %arg12: memref<1x1x32xf32, #tpu.memory_space<vmem>>, %arg13: memref<1x1x32xf32, #tpu.memory_space<vmem>>, %arg14: memref<1x1x32xf32, #tpu.memory_space<vmem>>, %arg15: memref<8x2x32xf32, #tpu.memory_space<vmem>>) attributes {dimension_semantics = [#tpu.dimension_semantics<parallel>, #tpu.dimension_semantics<arbitrary>], iteration_bounds = array<i64: 1, 2>, scalar_prefetch = 0 : i64, scratch_operands = 0 : i64, tpu.core_type = #tpu.core_type<tc>, window_params = [{transform_indices = @transform_0, window_bounds = array<i64: 8, 2, 32>}, {transform_indices = @transform_1, window_bounds = array<i64: 1, 32, 96>}, {transform_indices = @transform_2, window_bounds = array<i64: 1, 1, 96>}, {transform_indices = @transform_3, window_bounds = array<i64: 1, 4, 8, 32>}, {transform_indices = @transform_4, window_bounds = array<i64: 1, 1, 32>}, {transform_indices = @transform_5, window_bounds = array<i64: 1, 32, 64>}, {transform_indices = @transform_6, window_bounds = array<i64: 1, 1, 64>}, {transform_indices = @transform_7, window_bounds = array<i64: 1, 64, 32>}, {transform_indices = @transform_8, window_bounds = array<i64: 1, 1, 32>}, {transform_indices = @transform_9, window_bounds = array<i64: 1, 1, 32>}, {transform_indices = @transform_10, window_bounds = array<i64: 1, 1, 32>}, {transform_indices = @transform_11, window_bounds = array<i64: 1, 1, 32>}, {transform_indices = @transform_12, window_bounds = array<i64: 1, 1, 32>}, {transform_indices = @transform_13, window_bounds = array<i64: 8, 2, 32>}]} {
    %c0_i32 = arith.constant 0 : i32
    %0 = arith.cmpi eq, %arg1, %c0_i32 : i32
    %1 = arith.extui %0 : i1 to i32
    %c0_i32_0 = arith.constant 0 : i32
    %2 = arith.cmpi ne, %1, %c0_i32_0 : i32
    scf.if %2 {
      %c0_75 = arith.constant 0 : index
      %c0_76 = arith.constant 0 : index
      %c0_77 = arith.constant 0 : index
      %150 = vector.load %arg2[%c0_75, %c0_76, %c0_77] : memref<8x2x32xf32, #tpu.memory_space<vmem>>, vector<8x2x32xf32>
      %c0_78 = arith.constant 0 : index
      %c0_79 = arith.constant 0 : index
      %c0_80 = arith.constant 0 : index
      %151 = vector.load %arg15[%c0_78, %c0_79, %c0_80] : memref<8x2x32xf32, #tpu.memory_space<vmem>>, vector<8x2x32xf32>
      tpu.vector_store %arg15[%c0_78, %c0_79, %c0_80], %150 {strides = array<i32>} : memref<8x2x32xf32, #tpu.memory_space<vmem>>, vector<8x2x32xf32>,
    } else {
    }
    %c0 = arith.constant 0 : index
    %c0_1 = arith.constant 0 : index
    %c0_2 = arith.constant 0 : index
    %3 = vector.load %arg15[%c0, %c0_1, %c0_2] : memref<8x2x32xf32, #tpu.memory_space<vmem>>, vector<8x2x32xf32>
    %4 = vector.shape_cast %3 : vector<8x2x32xf32> to vector<16x32xf32>
    %5 = arith.truncf %4 : vector<16x32xf32> to vector<16x32xbf16>
    %c0_3 = arith.constant 0 : index
    %c0_4 = arith.constant 0 : index
    %c0_5 = arith.constant 0 : index
    %6 = vector.load %arg3[%c0_3, %c0_4, %c0_5] : memref<1x32x96xbf16, #tpu.memory_space<vmem>>, vector<1x32x96xbf16>
    %7 = vector.shape_cast %6 : vector<1x32x96xbf16> to vector<32x96xbf16>
    %cst = arith.constant dense<0.000000e+00> : vector<16x96xf32>
    %8 = tpu.matmul %5, %7, %cst {dimension_numbers = #tpu.dot_dimension_numbers<[1], [0], [0], [1], [0, 0, 1, 1], [], []>} : vector<16x32xbf16>, vector<32x96xbf16>, vector<16x96xf32> -> vector<16x96xf32>
    %c0_6 = arith.constant 0 : index
    %c0_7 = arith.constant 0 : index
    %c0_8 = arith.constant 0 : index
    %9 = vector.load %arg4[%c0_6, %c0_7, %c0_8] : memref<1x1x96xf32, #tpu.memory_space<vmem>>, vector<1x1x96xf32>
    %10 = vector.shape_cast %9 : vector<1x1x96xf32> to vector<1x96xf32>
    %11 = vector.broadcast %10 : vector<1x96xf32> to vector<16x96xf32>
    %12 = arith.addf %8, %11 : vector<16x96xf32>
    %13 = arith.truncf %12 : vector<16x96xf32> to vector<16x96xbf16>
    %14 = vector.shape_cast %13 : vector<16x96xbf16> to vector<8x2x96xbf16>
    %15 = vector.extract_strided_slice %14 {offsets = [0, 0, 0], sizes = [8, 2, 8], strides = [1, 1, 1]} : vector<8x2x96xbf16> to vector<8x2x8xbf16>
    %16 = vector.extract_strided_slice %14 {offsets = [0, 0, 8], sizes = [8, 2, 8], strides = [1, 1, 1]} : vector<8x2x96xbf16> to vector<8x2x8xbf16>
    %17 = vector.extract_strided_slice %14 {offsets = [0, 0, 16], sizes = [8, 2, 8], strides = [1, 1, 1]} : vector<8x2x96xbf16> to vector<8x2x8xbf16>
    %18 = vector.extract_strided_slice %14 {offsets = [0, 0, 24], sizes = [8, 2, 8], strides = [1, 1, 1]} : vector<8x2x96xbf16> to vector<8x2x8xbf16>
    %19 = tpu.concatenate %15, %16, %17, %18 in 0 : vector<8x2x8xbf16>, vector<8x2x8xbf16>, vector<8x2x8xbf16>, vector<8x2x8xbf16> -> vector<32x2x8xbf16>
    %20 = vector.extract_strided_slice %14 {offsets = [0, 0, 32], sizes = [8, 2, 8], strides = [1, 1, 1]} : vector<8x2x96xbf16> to vector<8x2x8xbf16>
    %21 = vector.extract_strided_slice %14 {offsets = [0, 0, 40], sizes = [8, 2, 8], strides = [1, 1, 1]} : vector<8x2x96xbf16> to vector<8x2x8xbf16>
    %22 = vector.extract_strided_slice %14 {offsets = [0, 0, 48], sizes = [8, 2, 8], strides = [1, 1, 1]} : vector<8x2x96xbf16> to vector<8x2x8xbf16>
    %23 = vector.extract_strided_slice %14 {offsets = [0, 0, 56], sizes = [8, 2, 8], strides = [1, 1, 1]} : vector<8x2x96xbf16> to vector<8x2x8xbf16>
    %24 = tpu.concatenate %20, %21, %22, %23 in 0 : vector<8x2x8xbf16>, vector<8x2x8xbf16>, vector<8x2x8xbf16>, vector<8x2x8xbf16> -> vector<32x2x8xbf16>
    %25 = vector.extract_strided_slice %14 {offsets = [0, 0, 64], sizes = [8, 2, 8], strides = [1, 1, 1]} : vector<8x2x96xbf16> to vector<8x2x8xbf16>
    %26 = vector.extract_strided_slice %14 {offsets = [0, 0, 72], sizes = [8, 2, 8], strides = [1, 1, 1]} : vector<8x2x96xbf16> to vector<8x2x8xbf16>
    %27 = vector.extract_strided_slice %14 {offsets = [0, 0, 80], sizes = [8, 2, 8], strides = [1, 1, 1]} : vector<8x2x96xbf16> to vector<8x2x8xbf16>
    %28 = vector.extract_strided_slice %14 {offsets = [0, 0, 88], sizes = [8, 2, 8], strides = [1, 1, 1]} : vector<8x2x96xbf16> to vector<8x2x8xbf16>
    %29 = tpu.concatenate %25, %26, %27, %28 in 0 : vector<8x2x8xbf16>, vector<8x2x8xbf16>, vector<8x2x8xbf16>, vector<8x2x8xbf16> -> vector<32x2x8xbf16>
    %cst_9 = arith.constant dense<0.000000e+00> : vector<32x2x2xf32>
    %30 = tpu.matmul %19, %24, %cst_9 {dimension_numbers = #tpu.dot_dimension_numbers<[2], [2], [1], [1], [0, 0, 0, 1, 1, 1], [0], [0]>} : vector<32x2x8xbf16>, vector<32x2x8xbf16>, vector<32x2x2xf32> -> vector<32x2x2xf32>
    %cst_10 = arith.constant 0.353553385 : f32
    %31 = vector.broadcast %cst_10 : f32 to vector<32x2x2xf32>
    %32 = arith.mulf %30, %31 : vector<32x2x2xf32>
    %cst_11 = arith.constant dense<0xFF800000> : vector<32x2xf32>
    %33 = vector.multi_reduction <maximumf>, %32, %cst_11 [2] : vector<32x2x2xf32> to vector<32x2xf32>
    %34 = vector.shape_cast %33 : vector<32x2xf32> to vector<32x2x1xf32>
    %35 = vector.broadcast %34 : vector<32x2x1xf32> to vector<32x2x2xf32>
    %36 = arith.subf %32, %35 : vector<32x2x2xf32>
    %37 = math.exp %36 : vector<32x2x2xf32>
    %cst_12 = arith.constant dense<0.000000e+00> : vector<32x2xf32>
    %38 = vector.multi_reduction <add>, %37, %cst_12 [2] : vector<32x2x2xf32> to vector<32x2xf32>
    %39 = vector.shape_cast %38 : vector<32x2xf32> to vector<32x2x1xf32>
    %40 = tpu.reciprocal %39 {approx = true} : vector<32x2x1xf32> -> vector<32x2x1xf32>
    %41 = vector.broadcast %40 : vector<32x2x1xf32> to vector<32x2x2xf32>
    %42 = arith.mulf %37, %41 : vector<32x2x2xf32>
    %43 = arith.truncf %42 : vector<32x2x2xf32> to vector<32x2x2xbf16>
    %cst_13 = arith.constant dense<0.000000e+00> : vector<32x2x8xf32>
    %44 = tpu.matmul %43, %29, %cst_13 {dimension_numbers = #tpu.dot_dimension_numbers<[2], [1], [1], [2], [0, 0, 0, 1, 1, 2], [0], [0]>} : vector<32x2x2xbf16>, vector<32x2x8xbf16>, vector<32x2x8xf32> -> vector<32x2x8xf32>
    %45 = arith.truncf %44 : vector<32x2x8xf32> to vector<32x2x8xbf16>
    %46 = vector.shape_cast %45 : vector<32x2x8xbf16> to vector<4x16x8xbf16>
    %cst_14 = arith.constant 0.000000e+00 : f32
    %47 = vector.broadcast %cst_14 : f32 to vector<16x32xf32>
    %48 = vector.extract_strided_slice %46 {offsets = [0, 0, 0], sizes = [1, 16, 8], strides = [1, 1, 1]} : vector<4x16x8xbf16> to vector<1x16x8xbf16>
    %49 = vector.shape_cast %48 : vector<1x16x8xbf16> to vector<16x8xbf16>
    %c0_15 = arith.constant 0 : index
    %c0_16 = arith.constant 0 : index
    %c0_17 = arith.constant 0 : index
    %c0_18 = arith.constant 0 : index
    %50 = vector.load %arg5[%c0_15, %c0_16, %c0_17, %c0_18] : memref<1x4x8x32xbf16, #tpu.memory_space<vmem>>, vector<1x1x8x32xbf16>
    %51 = vector.shape_cast %50 : vector<1x1x8x32xbf16> to vector<8x32xbf16>
    %cst_19 = arith.constant dense<0.000000e+00> : vector<16x32xf32>
    %52 = tpu.matmul %49, %51, %cst_19 {dimension_numbers = #tpu.dot_dimension_numbers<[1], [0], [0], [1], [0, 0, 1, 1], [], []>} : vector<16x8xbf16>, vector<8x32xbf16>, vector<16x32xf32> -> vector<16x32xf32>
    %53 = arith.addf %47, %52 : vector<16x32xf32>
    %54 = vector.extract_strided_slice %46 {offsets = [1, 0, 0], sizes = [1, 16, 8], strides = [1, 1, 1]} : vector<4x16x8xbf16> to vector<1x16x8xbf16>
    %55 = vector.shape_cast %54 : vector<1x16x8xbf16> to vector<16x8xbf16>
    %c0_20 = arith.constant 0 : index
    %c1 = arith.constant 1 : index
    %c0_21 = arith.constant 0 : index
    %c0_22 = arith.constant 0 : index
    %56 = vector.load %arg5[%c0_20, %c1, %c0_21, %c0_22] : memref<1x4x8x32xbf16, #tpu.memory_space<vmem>>, vector<1x1x8x32xbf16>
    %57 = vector.shape_cast %56 : vector<1x1x8x32xbf16> to vector<8x32xbf16>
    %cst_23 = arith.constant dense<0.000000e+00> : vector<16x32xf32>
    %58 = tpu.matmul %55, %57, %cst_23 {dimension_numbers = #tpu.dot_dimension_numbers<[1], [0], [0], [1], [0, 0, 1, 1], [], []>} : vector<16x8xbf16>, vector<8x32xbf16>, vector<16x32xf32> -> vector<16x32xf32>
    %59 = arith.addf %53, %58 : vector<16x32xf32>
    %60 = vector.extract_strided_slice %46 {offsets = [2, 0, 0], sizes = [1, 16, 8], strides = [1, 1, 1]} : vector<4x16x8xbf16> to vector<1x16x8xbf16>
    %61 = vector.shape_cast %60 : vector<1x16x8xbf16> to vector<16x8xbf16>
    %c0_24 = arith.constant 0 : index
    %c2 = arith.constant 2 : index
    %c0_25 = arith.constant 0 : index
    %c0_26 = arith.constant 0 : index
    %62 = vector.load %arg5[%c0_24, %c2, %c0_25, %c0_26] : memref<1x4x8x32xbf16, #tpu.memory_space<vmem>>, vector<1x1x8x32xbf16>
    %63 = vector.shape_cast %62 : vector<1x1x8x32xbf16> to vector<8x32xbf16>
    %cst_27 = arith.constant dense<0.000000e+00> : vector<16x32xf32>
    %64 = tpu.matmul %61, %63, %cst_27 {dimension_numbers = #tpu.dot_dimension_numbers<[1], [0], [0], [1], [0, 0, 1, 1], [], []>} : vector<16x8xbf16>, vector<8x32xbf16>, vector<16x32xf32> -> vector<16x32xf32>
    %65 = arith.addf %59, %64 : vector<16x32xf32>
    %66 = vector.extract_strided_slice %46 {offsets = [3, 0, 0], sizes = [1, 16, 8], strides = [1, 1, 1]} : vector<4x16x8xbf16> to vector<1x16x8xbf16>
    %67 = vector.shape_cast %66 : vector<1x16x8xbf16> to vector<16x8xbf16>
    %c0_28 = arith.constant 0 : index
    %c3 = arith.constant 3 : index
    %c0_29 = arith.constant 0 : index
    %c0_30 = arith.constant 0 : index
    %68 = vector.load %arg5[%c0_28, %c3, %c0_29, %c0_30] : memref<1x4x8x32xbf16, #tpu.memory_space<vmem>>, vector<1x1x8x32xbf16>
    %69 = vector.shape_cast %68 : vector<1x1x8x32xbf16> to vector<8x32xbf16>
    %cst_31 = arith.constant dense<0.000000e+00> : vector<16x32xf32>
    %70 = tpu.matmul %67, %69, %cst_31 {dimension_numbers = #tpu.dot_dimension_numbers<[1], [0], [0], [1], [0, 0, 1, 1], [], []>} : vector<16x8xbf16>, vector<8x32xbf16>, vector<16x32xf32> -> vector<16x32xf32>
    %71 = arith.addf %65, %70 : vector<16x32xf32>
    %c0_32 = arith.constant 0 : index
    %c0_33 = arith.constant 0 : index
    %c0_34 = arith.constant 0 : index
    %72 = vector.load %arg6[%c0_32, %c0_33, %c0_34] : memref<1x1x32xf32, #tpu.memory_space<vmem>>, vector<1x1x32xf32>
    %73 = vector.shape_cast %72 : vector<1x1x32xf32> to vector<1x32xf32>
    %74 = vector.broadcast %73 : vector<1x32xf32> to vector<16x32xf32>
    %75 = arith.addf %71, %74 : vector<16x32xf32>
    %76 = arith.addf %4, %75 : vector<16x32xf32>
    %c0_35 = arith.constant 0 : index
    %c0_36 = arith.constant 0 : index
    %c0_37 = arith.constant 0 : index
    %77 = vector.load %arg11[%c0_35, %c0_36, %c0_37] : memref<1x1x32xf32, #tpu.memory_space<vmem>>, vector<1x1x32xf32>
    %78 = vector.shape_cast %77 : vector<1x1x32xf32> to vector<1x32xf32>
    %c0_38 = arith.constant 0 : index
    %c0_39 = arith.constant 0 : index
    %c0_40 = arith.constant 0 : index
    %79 = vector.load %arg12[%c0_38, %c0_39, %c0_40] : memref<1x1x32xf32, #tpu.memory_space<vmem>>, vector<1x1x32xf32>
    %80 = vector.shape_cast %79 : vector<1x1x32xf32> to vector<1x32xf32>
    %cst_41 = arith.constant dense<0.000000e+00> : vector<16xf32>
    %81 = vector.multi_reduction <add>, %76, %cst_41 [1] : vector<16x32xf32> to vector<16xf32>
    %82 = vector.shape_cast %81 : vector<16xf32> to vector<16x1xf32>
    %cst_42 = arith.constant 3.200000e+01 : f32
    %83 = vector.broadcast %cst_42 : f32 to vector<16x1xf32>
    %84 = arith.divf %82, %83 : vector<16x1xf32>
    %85 = vector.broadcast %84 : vector<16x1xf32> to vector<16x32xf32>
    %86 = arith.subf %76, %85 : vector<16x32xf32>
    %87 = arith.mulf %86, %86 : vector<16x32xf32>
    %cst_43 = arith.constant dense<0.000000e+00> : vector<16xf32>
    %88 = vector.multi_reduction <add>, %87, %cst_43 [1] : vector<16x32xf32> to vector<16xf32>
    %89 = vector.shape_cast %88 : vector<16xf32> to vector<16x1xf32>
    %cst_44 = arith.constant 3.200000e+01 : f32
    %90 = vector.broadcast %cst_44 : f32 to vector<16x1xf32>
    %91 = arith.divf %89, %90 : vector<16x1xf32>
    %92 = vector.broadcast %84 : vector<16x1xf32> to vector<16x32xf32>
    %93 = arith.subf %76, %92 : vector<16x32xf32>
    %cst_45 = arith.constant 9.99999974E-6 : f32
    %94 = vector.broadcast %cst_45 : f32 to vector<16x1xf32>
    %95 = arith.addf %91, %94 : vector<16x1xf32>
    %96 = math.rsqrt %95 : vector<16x1xf32>
    %97 = vector.broadcast %96 : vector<16x1xf32> to vector<16x32xf32>
    %98 = arith.mulf %93, %97 : vector<16x32xf32>
    %99 = vector.broadcast %78 : vector<1x32xf32> to vector<16x32xf32>
    %100 = arith.mulf %98, %99 : vector<16x32xf32>
    %101 = vector.broadcast %80 : vector<1x32xf32> to vector<16x32xf32>
    %102 = arith.addf %100, %101 : vector<16x32xf32>
    %103 = arith.truncf %102 : vector<16x32xf32> to vector<16x32xbf16>
    %c0_46 = arith.constant 0 : index
    %c0_47 = arith.constant 0 : index
    %c0_48 = arith.constant 0 : index
    %104 = vector.load %arg7[%c0_46, %c0_47, %c0_48] : memref<1x32x64xbf16, #tpu.memory_space<vmem>>, vector<1x32x64xbf16>
    %105 = vector.shape_cast %104 : vector<1x32x64xbf16> to vector<32x64xbf16>
    %cst_49 = arith.constant dense<0.000000e+00> : vector<16x64xf32>
    %106 = tpu.matmul %103, %105, %cst_49 {dimension_numbers = #tpu.dot_dimension_numbers<[1], [0], [0], [1], [0, 0, 1, 1], [], []>} : vector<16x32xbf16>, vector<32x64xbf16>, vector<16x64xf32> -> vector<16x64xf32>
    %c0_50 = arith.constant 0 : index
    %c0_51 = arith.constant 0 : index
    %c0_52 = arith.constant 0 : index
    %107 = vector.load %arg8[%c0_50, %c0_51, %c0_52] : memref<1x1x64xf32, #tpu.memory_space<vmem>>, vector<1x1x64xf32>
    %108 = vector.shape_cast %107 : vector<1x1x64xf32> to vector<1x64xf32>
    %109 = vector.broadcast %108 : vector<1x64xf32> to vector<16x64xf32>
    %110 = arith.addf %106, %109 : vector<16x64xf32>
    %cst_53 = arith.constant 0.000000e+00 : f32
    %111 = vector.broadcast %cst_53 : f32 to vector<16x64xf32>
    %112 = arith.maximumf %110, %111 : vector<16x64xf32>
    %113 = arith.truncf %112 : vector<16x64xf32> to vector<16x64xbf16>
    %c0_54 = arith.constant 0 : index
    %c0_55 = arith.constant 0 : index
    %c0_56 = arith.constant 0 : index
    %114 = vector.load %arg9[%c0_54, %c0_55, %c0_56] : memref<1x64x32xbf16, #tpu.memory_space<vmem>>, vector<1x64x32xbf16>
    %115 = vector.shape_cast %114 : vector<1x64x32xbf16> to vector<64x32xbf16>
    %cst_57 = arith.constant dense<0.000000e+00> : vector<16x32xf32>
    %116 = tpu.matmul %113, %115, %cst_57 {dimension_numbers = #tpu.dot_dimension_numbers<[1], [0], [0], [1], [0, 0, 1, 1], [], []>} : vector<16x64xbf16>, vector<64x32xbf16>, vector<16x32xf32> -> vector<16x32xf32>
    %c0_58 = arith.constant 0 : index
    %c0_59 = arith.constant 0 : index
    %c0_60 = arith.constant 0 : index
    %117 = vector.load %arg10[%c0_58, %c0_59, %c0_60] : memref<1x1x32xf32, #tpu.memory_space<vmem>>, vector<1x1x32xf32>
    %118 = vector.shape_cast %117 : vector<1x1x32xf32> to vector<1x32xf32>
    %119 = vector.broadcast %118 : vector<1x32xf32> to vector<16x32xf32>
    %120 = arith.addf %116, %119 : vector<16x32xf32>
    %121 = arith.addf %102, %120 : vector<16x32xf32>
    %c0_61 = arith.constant 0 : index
    %c0_62 = arith.constant 0 : index
    %c0_63 = arith.constant 0 : index
    %122 = vector.load %arg13[%c0_61, %c0_62, %c0_63] : memref<1x1x32xf32, #tpu.memory_space<vmem>>, vector<1x1x32xf32>
    %123 = vector.shape_cast %122 : vector<1x1x32xf32> to vector<1x32xf32>
    %c0_64 = arith.constant 0 : index
    %c0_65 = arith.constant 0 : index
    %c0_66 = arith.constant 0 : index
    %124 = vector.load %arg14[%c0_64, %c0_65, %c0_66] : memref<1x1x32xf32, #tpu.memory_space<vmem>>, vector<1x1x32xf32>
    %125 = vector.shape_cast %124 : vector<1x1x32xf32> to vector<1x32xf32>
    %cst_67 = arith.constant dense<0.000000e+00> : vector<16xf32>
    %126 = vector.multi_reduction <add>, %121, %cst_67 [1] : vector<16x32xf32> to vector<16xf32>
    %127 = vector.shape_cast %126 : vector<16xf32> to vector<16x1xf32>
    %cst_68 = arith.constant 3.200000e+01 : f32
    %128 = vector.broadcast %cst_68 : f32 to vector<16x1xf32>
    %129 = arith.divf %127, %128 : vector<16x1xf32>
    %130 = vector.broadcast %129 : vector<16x1xf32> to vector<16x32xf32>
    %131 = arith.subf %121, %130 : vector<16x32xf32>
    %132 = arith.mulf %131, %131 : vector<16x32xf32>
    %cst_69 = arith.constant dense<0.000000e+00> : vector<16xf32>
    %133 = vector.multi_reduction <add>, %132, %cst_69 [1] : vector<16x32xf32> to vector<16xf32>
    %134 = vector.shape_cast %133 : vector<16xf32> to vector<16x1xf32>
    %cst_70 = arith.constant 3.200000e+01 : f32
    %135 = vector.broadcast %cst_70 : f32 to vector<16x1xf32>
    %136 = arith.divf %134, %135 : vector<16x1xf32>
    %137 = vector.broadcast %129 : vector<16x1xf32> to vector<16x32xf32>
    %138 = arith.subf %121, %137 : vector<16x32xf32>
    %cst_71 = arith.constant 9.99999974E-6 : f32
    %139 = vector.broadcast %cst_71 : f32 to vector<16x1xf32>
    %140 = arith.addf %136, %139 : vector<16x1xf32>
    %141 = math.rsqrt %140 : vector<16x1xf32>
    %142 = vector.broadcast %141 : vector<16x1xf32> to vector<16x32xf32>
    %143 = arith.mulf %138, %142 : vector<16x32xf32>
    %144 = vector.broadcast %123 : vector<1x32xf32> to vector<16x32xf32>
    %145 = arith.mulf %143, %144 : vector<16x32xf32>
    %146 = vector.broadcast %125 : vector<1x32xf32> to vector<16x32xf32>
    %147 = arith.addf %145, %146 : vector<16x32xf32>
    %148 = vector.shape_cast %147 : vector<16x32xf32> to vector<8x2x32xf32>
    %c0_72 = arith.constant 0 : index
    %c0_73 = arith.constant 0 : index
    %c0_74 = arith.constant 0 : index
    %149 = vector.load %arg15[%c0_72, %c0_73, %c0_74] : memref<8x2x32xf32, #tpu.memory_space<vmem>>, vector<8x2x32xf32>
    tpu.vector_store %arg15[%c0_72, %c0_73, %c0_74], %148 {strides = array<i32>} : memref<8x2x32xf32, #tpu.memory_space<vmem>>, vector<8x2x32xf32>,
    return
  }
  func.func @transform_0(%arg0: i32, %arg1: i32) -> (i32, i32, i32) {
    %c0_i32 = arith.constant 0 : i32
    %c0_i32_0 = arith.constant 0 : i32
    %c0_i32_1 = arith.constant 0 : i32
    return %arg0, %c0_i32, %c0_i32_0 : i32, i32, i32
  }
  func.func @transform_1(%arg0: i32, %arg1: i32) -> (i32, i32, i32) {
    %c0_i32 = arith.constant 0 : i32
    %c0_i32_0 = arith.constant 0 : i32
    %c0_i32_1 = arith.constant 0 : i32
    return %arg1, %c0_i32, %c0_i32_0 : i32, i32, i32
  }
  func.func @transform_2(%arg0: i32, %arg1: i32) -> (i32, i32, i32) {
    %c0_i32 = arith.constant 0 : i32
    %c0_i32_0 = arith.constant 0 : i32
    %c0_i32_1 = arith.constant 0 : i32
    return %arg1, %c0_i32, %c0_i32_0 : i32, i32, i32
  }
  func.func @transform_3(%arg0: i32, %arg1: i32) -> (i32, i32, i32, i32) {
    %c0_i32 = arith.constant 0 : i32
    %c0_i32_0 = arith.constant 0 : i32
    %c0_i32_1 = arith.constant 0 : i32
    %c0_i32_2 = arith.constant 0 : i32
    return %arg1, %c0_i32, %c0_i32_0, %c0_i32_1 : i32, i32, i32, i32
  }
  func.func @transform_4(%arg0: i32, %arg1: i32) -> (i32, i32, i32) {
    %c0_i32 = arith.constant 0 : i32
    %c0_i32_0 = arith.constant 0 : i32
    %c0_i32_1 = arith.constant 0 : i32
    return %arg1, %c0_i32, %c0_i32_0 : i32, i32, i32
  }
  func.func @transform_5(%arg0: i32, %arg1: i32) -> (i32, i32, i32) {
    %c0_i32 = arith.constant 0 : i32
    %c0_i32_0 = arith.constant 0 : i32
    %c0_i32_1 = arith.constant 0 : i32
    return %arg1, %c0_i32, %c0_i32_0 : i32, i32, i32
  }
  func.func @transform_6(%arg0: i32, %arg1: i32) -> (i32, i32, i32) {
    %c0_i32 = arith.constant 0 : i32
    %c0_i32_0 = arith.constant 0 : i32
    %c0_i32_1 = arith.constant 0 : i32
    return %arg1, %c0_i32, %c0_i32_0 : i32, i32, i32
  }
  func.func @transform_7(%arg0: i32, %arg1: i32) -> (i32, i32, i32) {
    %c0_i32 = arith.constant 0 : i32
    %c0_i32_0 = arith.constant 0 : i32
    %c0_i32_1 = arith.constant 0 : i32
    return %arg1, %c0_i32, %c0_i32_0 : i32, i32, i32
  }
  func.func @transform_8(%arg0: i32, %arg1: i32) -> (i32, i32, i32) {
    %c0_i32 = arith.constant 0 : i32
    %c0_i32_0 = arith.constant 0 : i32
    %c0_i32_1 = arith.constant 0 : i32
    return %arg1, %c0_i32, %c0_i32_0 : i32, i32, i32
  }
  func.func @transform_9(%arg0: i32, %arg1: i32) -> (i32, i32, i32) {
    %c0_i32 = arith.constant 0 : i32
    %c0_i32_0 = arith.constant 0 : i32
    %c0_i32_1 = arith.constant 0 : i32
    return %arg1, %c0_i32, %c0_i32_0 : i32, i32, i32
  }
  func.func @transform_10(%arg0: i32, %arg1: i32) -> (i32, i32, i32) {
    %c0_i32 = arith.constant 0 : i32
    %c0_i32_0 = arith.constant 0 : i32
    %c0_i32_1 = arith.constant 0 : i32
    return %arg1, %c0_i32, %c0_i32_0 : i32, i32, i32
  }
  func.func @transform_11(%arg0: i32, %arg1: i32) -> (i32, i32, i32) {
    %c0_i32 = arith.constant 0 : i32
    %c0_i32_0 = arith.constant 0 : i32
    %c0_i32_1 = arith.constant 0 : i32
    return %arg1, %c0_i32, %c0_i32_0 : i32, i32, i32
  }
  func.func @transform_12(%arg0: i32, %arg1: i32) -> (i32, i32, i32) {
    %c0_i32 = arith.constant 0 : i32
    %c0_i32_0 = arith.constant 0 : i32
    %c0_i32_1 = arith.constant 0 : i32
    return %arg1, %c0_i32, %c0_i32_0 : i32, i32, i32
  }
  func.func @transform_13(%arg0: i32, %arg1: i32) -> (i32, i32, i32) {
    %c0_i32 = arith.constant 0 : i32
    %c0_i32_0 = arith.constant 0 : i32
    %c0_i32_1 = arith.constant 0 : i32
    return %arg0, %c0_i32, %c0_i32_0 : i32, i32, i32
  }
}

</mosaic_0001>

<bundles_post_ra>
// kernel: encoder_forward.1
= control target key start
LH: loop header
LB: loop body
LE: loop exit
PB: predicated region body
PF: predicated region fallthrough
CT: control target
= control target key end

     0   :  { %s7473_s25 = smov 0   ;;  %s7475_s26 = smov 0   ;;  %s9087_s0 = inlined_call_operand.vmem [shape: f32[8,2,32], index: 0, kind: input, shape index: {}]   ;;  %s9088_s1 = inlined_call_operand.vmem [shape: bf16[2,32,96], index: 1, kind: input, shape index: {}]   ;;  %s9089_s2 = inlined_call_operand.vmem [shape: f32[2,1,96], index: 2, kind: input, shape index: {}]   ;;  %s9090_s3 = inlined_call_operand.vmem [shape: bf16[2,4,8,32], index: 3, kind: input, shape index: {}]   ;;  %s9091_s4 = inlined_call_operand.vmem [shape: f32[2,1,32], index: 4, kind: input, shape index: {}]   ;;  %s9092_s5 = inlined_call_operand.vmem [shape: bf16[2,32,64], index: 5, kind: input, shape index: {}]   ;;  %s9093_s6 = inlined_call_operand.vmem [shape: f32[2,1,64], index: 6, kind: input, shape index: {}]   ;;  %s9094_s7 = inlined_call_operand.vmem [shape: bf16[2,64,32], index: 7, kind: input, shape index: {}]   ;;  %s9095_s8 = inlined_call_operand.vmem [shape: f32[2,1,32], index: 8, kind: input, shape index: {}]   ;;  %s9096_s9 = inlined_call_operand.vmem [shape: f32[2,1,32], index: 9, kind: input, shape index: {}]   ;;  %s9097_s10 = inlined_call_operand.vmem [shape: f32[2,1,32], index: 10, kind: input, shape index: {}]   ;;  %s9098_s11 = inlined_call_operand.vmem [shape: f32[2,1,32], index: 11, kind: input, shape index: {}]   ;;  %s9099_s12 = inlined_call_operand.vmem [shape: f32[2,1,32], index: 12, kind: input, shape index: {}]   ;;  %s9100_s13 = inlined_call_operand.vmem [shape: f32[8,2,32], index: 13, kind: output, shape index: {}]  }
   0x1   :  { %9115 = sst [smem:[#allocation20_spill]] %s9088_s1  ;;  %s7477_s27 = smov 0  }
   0x2   :  { %9116 = sst [smem:[#allocation21_spill]] %s9090_s3 }
   0x3   :  { %9117 = sst [smem:[#allocation22_spill]] %s9092_s5 }
   0x4   :  { %9118 = sst [smem:[#allocation23_spill]] %s9093_s6 }
   0x5   :  { %9119 = sst [smem:[#allocation24_spill]] %s9100_s13 }
   0x6 LB: > { %9120 = sst [smem:[#allocation2_spill]] %s7384_s26  ;;  %s32_s28 = sadd.s32 1, %s7384_s26  ;;  %s7388_s27 = sphi %s7477_s27, %s23_s27   ;;  %s7384_s26 = sphi %s7475_s26, %s9167_s26   ;;  %s7380_s25 = sphi %s7473_s25, %s9166_s25  }
   0x7   : > { %9121 = sst [smem:[#allocation3_spill]] %s7388_s27  ;;  %p6469_p0 = scmp.ge.s32.totalorder %s7388_s27, 1 }
   0x8   : > { %p33_p1 = scmp.ge.s32.totalorder %s32_s28, 2  ;;  %p504_p2 = scmp.lt.s32.totalorder %s7388_s27, 3 }
   0xa   : > { %s9169_s28 = smov (%p33_p1, %s32_s28), 0  ;;  %p505_p3 = pnand %p6469_p0, %p504_p2 }
   0xb   : > { %9122 = sst [smem:[#allocation4_spill]] %s9169_s28 }
   0xc   : > { %508 = sbr.rel (%p505_p3) target bundleno = 2808 (0xaf8), region = 72 }
  0x13   : > { %p598_p4 = scmp.lt.s32.totalorder %s7380_s25, 1  ;;  %s9123_s1 = sld [smem:[#allocation20_spill]] }
  0x14   : > { %s9124_s3 = sld [smem:[#allocation21_spill]]  ;;  %s9125_s5 = sld [smem:[#allocation22_spill]] }
  0x15   : > { %s7491_s29 = scalar_select %p598_p4, %s7380_s25, 1 }
  0x16   : > { %p6478_p5 = scmp.ne.s32.totalorder %s7380_s25, 0 }
  0x17   : > { %s6590_s30 = sshll.u32 %s7491_s29, 4  ;;  %s6593_s18 = sshll.u32 %s7491_s29, 5  ;;  %v653_v0 = vld [vmem:[%s9087_s0] sm:$0x3] (!%p6478_p5)  ;;  %vm661_vm0 = vcmask (!%p6478_p5), 254976  }
  0x18   : > { %s7525_s20 = scalar_lea.vmem %s9094_s7, %s6593_s18  ;;  %s629_s23 = scalar_lea.vmem %s9095_s8, %s7491_s29  ;;  %v654_v1 = vld [vmem:[%s9087_s0 + $0x2] sm:$0x3] (!%p6478_p5)  ;;  %v655_v2 = vld [vmem:[%s9087_s0 + $0x4] sm:$0x3] (!%p6478_p5)  ;;  %v656_v3 = vld [vmem:[%s9087_s0 + $0x6] sm:$0x3] (!%p6478_p5) }
  0x19   : > { %s7501_s19 = scalar_lea.vmem %s9123_s1, %s6590_s30  ;;  %s632_s26 = scalar_lea.vmem %s9096_s9, %s7491_s29  ;;  %v657_v4 = vld [vmem:[%s9087_s0 + $0x8] sm:$0x3] (!%p6478_p5)  ;;  %v658_v5 = vld [vmem:[%s9087_s0 + $0xa] sm:$0x3] (!%p6478_p5)  ;;  %v659_v6 = vld [vmem:[%s9087_s0 + $0xc] sm:$0x3] (!%p6478_p5) }
  0x1a   : > { %s7506_s22 = scalar_lea.vmem %s9124_s3, %s6590_s30  ;;  %s7515_s13 = scalar_lea.vmem %s9125_s5, %s6590_s30  ;;  %v660_v7 = vld [vmem:[%s9087_s0 + $0xe] sm:$0x3] (!%p6478_p5) }
  0x1b   : > { %s635_s5 = scalar_lea.vmem %s9097_s10, %s7491_s29  ;;  %s638_s17 = scalar_lea.vmem %s9098_s11, %s7491_s29 }
  0x1c   : > { %652 = sbr.rel (%p6478_p5) target bundleno = 38 (0x26), region = 76  ;;  %s9127_s30 = sld [smem:[#allocation24_spill]] (!%p6478_p5) }
  0x22   : > { %662 = vst.msk [vmem:[%s9127_s30] sm:$0x3] (!%p6478_p5), %vm661_vm0, %v653_v0  ;;  %663 = vst.msk [vmem:[%s9127_s30 + $0x2] sm:$0x3] (!%p6478_p5), %vm661_vm0, %v654_v1 }
  0x23   : > { %664 = vst.msk [vmem:[%s9127_s30 + $0x4] sm:$0x3] %vm661_vm0, %v655_v2  ;;  %665 = vst.msk [vmem:[%s9127_s30 + $0x6] sm:$0x3] %vm661_vm0, %v656_v3 }
  0x24   : > { %666 = vst.msk [vmem:[%s9127_s30 + $0x8] sm:$0x3] %vm661_vm0, %v657_v4  ;;  %667 = vst.msk [vmem:[%s9127_s30 + $0xa] sm:$0x3] %vm661_vm0, %v658_v5 }
  0x25   : > { %668 = vst.msk [vmem:[%s9127_s30 + $0xc] sm:$0x3] %vm661_vm0, %v659_v6  ;;  %669 = vst.msk [vmem:[%s9127_s30 + $0xe] sm:$0x3] %vm661_vm0, %v660_v7 }
  0x26 PF: > { %v7214_v8 = vld [vmem:[%s7501_s19] sm:$0xff]   ;;  %v9105_v9 = vmov 0.0   ;;  %v7215_v10 = vld [vmem:[%s7501_s19 + $0x8] sm:$0xff]   ;;  %v691_v11 = vlaneseq  ;;  %vm7391_vm1 = vmmov 0   ;;  %s9128_s1 = sld [smem:[#allocation24_spill]]  ;;  %vm746_vm2 = vcmask 261120   ;;  %s9131_s18 = scalar_lea.vmem %s9089_s2, %s7491_s29 }
  0x27   : > { %6741 = vmatprep.subr.bf16.mxu1 %v9105_v9  ;;  %6755 = vmatprep.subr.bf16.mxu0 %v9105_v9  ;;  %v7392_v20 = vmov 1983009808   ;;  %v7393_v36 = vmov 1966171168   ;;  %v6479_v39 = vld [vmem:[%s9131_s18] ss:$0 sm:$0xff]  ;;  %s9159_s15 = scalar_lea.vmem %s9091_s4, %s7491_s29 }
  0x28   : > { %6742 = vmatpush3.bf16.msra.mxu1 %v7214_v8  ;;  %6745 = vmatprep.mubr.msk.bf16.mxu1 %vm7391_vm1, %v9105_v9  ;;  %v689_v21 = vunpack.c.l.s4 %v7392_v20  ;;  %v7628_v22 = vshrl.u32 %v691_v11, 7  ;;  %v795_v37 = vunpack.c.l.s4 %v7393_v36  ;;  %s7394_s19 = smov 120   ;;  %s7395_s28 = smov 96   ;;  %vm906_vm3 = vcmask 64512  }
  0x29   : > { %6743 = vmatprep.subr.bf16.mxu1 %v9105_v9  ;;  %6757 = vmatprep.mubr.msk.bf16.mxu0 %vm7391_vm1, %v9105_v9  ;;  %s7396_s21 = smov 112   ;;  %s7397_s24 = smov 104   ;;  %vm2907_vm4 = vcmask 9216   ;;  %vm3298_vm5 = vcmask 1040384   ;;  %vm3294_vm6 = vcmask 15360   ;;  %vm4925_vm7 = vcmask 1043456  }
  0x2a   : > { %9129 = vst [vmem:[#allocation5_spill] sm:$0xff] %v7628_v22  ;;  %v690_v25 = vunpack.c.0.s8 %v689_v21  ;;  %v796_v38 = vunpack.c.0.s8 %v795_v37  ;;  %s7398_s27 = smov 64   ;;  %s9162_s18 = sld [smem:[#allocation23_spill]]  ;;  %vm5840_vm8 = vcmask 523264   ;;  %vm6271_vm9 = vcmask 254976  }
  0x2c   : > { %v670_v12 = vld [vmem:[%s9128_s1] sm:$0x3]  ;;  %v671_v13 = vld [vmem:[%s9128_s1 + $0x2] sm:$0x3]  ;;  %v672_v14 = vld [vmem:[%s9128_s1 + $0x4] sm:$0x3]  ;;  %6744 = vmatpush3.bf16.msra.mxu1 %v7215_v10  ;;  %v7632_v28 = vsub.s32 %v690_v25, %v7628_v22  ;;  %v7647_v43 = vsub.s32 %v796_v38, %v7628_v22 }
  0x2d   : > { %v673_v15 = vld [vmem:[%s9128_s1 + $0x6] sm:$0x3]  ;;  %v674_v16 = vld [vmem:[%s9128_s1 + $0x8] sm:$0x3]  ;;  %v675_v17 = vld [vmem:[%s9128_s1 + $0xa] sm:$0x3]  ;;  %v686_v23 = vcombine.low %v670_v12, %v671_v13  ;;  %6749 = vmatprep.subr.bf16.mxu1 %v9105_v9 }
  0x2e   : > { %v676_v18 = vld [vmem:[%s9128_s1 + $0xc] sm:$0x3]  ;;  %v677_v19 = vld [vmem:[%s9128_s1 + $0xe] sm:$0x3]  ;;  %v687_v24 = vcombine.low %v672_v14, %v673_v15  ;;  %v703_v26 = vcombine.low %v674_v16, %v675_v17  ;;  %9130 = vst [vmem:[#allocation6_spill] sm:$0xff] %v7632_v28  ;;  %9132 = vst [vmem:[#allocation7_spill] sm:$0xff] %v7647_v43 }
  0x2f   : > { %v704_v27 = vcombine.low %v676_v18, %v677_v19  ;;  %v694_v29 = vrot.slane %v686_v23, %v7632_v28 }
  0x30   : > { %v701_v30 = vrot.slane %v687_v24, %v7632_v28  ;;  %v711_v31 = vrot.slane %v703_v26, %v7632_v28 }
  0x31   : > { %v718_v32 = vrot.slane %v704_v27, %v7632_v28 }
  0x32   : > { %v702_v33 = vcombine.low %v694_v29, %v701_v30 }
  0x33   : > { %v719_v34 = vcombine.low %v711_v31, %v718_v32 }
  0x35   : > { %v722_v35 = vpack.c.bf16 %v719_v34, %v702_v33 }
  0x37   : > { %6746 = vmatmul.mubr.msk.bf16.vlgmr.msra.gmra.mrb[0].mxu1 %vm746_vm2, %v722_v35 }
  0x38   : > { %6751 = vmatprep.mubr.msk.bf16.mxu1 %vm7391_vm1, %v9105_v9 }
 0x10a   : > { %v784_v40 = vpop.f32.mrb[0].mxu1 }
 0x10b   : > { %v6747_v41 = vpop.f32.mrb[1].mxu1  ;;  %v785_v44 = vadd.f32 %v6479_v39, %v784_v40 }
 0x10c   : > { %v787_v42 = vpop.f32.mrb[2].mxu1 }
 0x10d   : > { %v788_v45 = vadd.f32 %v6479_v39, %v787_v42  ;;  %v6748_v46 = vpop.f32.mrb[3].mxu1 }
 0x10f   : > { %v791_v47 = vpack.c.bf16 %v788_v45, %v785_v44  ;;  %v6483_v48 = vpack.c.bf16 %v788_v45, %v788_v45 }
 0x111   : > { %v800_v49 = vrot.slane %v791_v47, %v7647_v43  ;;  %v807_v52 = vrot.slane %v6483_v48, %v7647_v43 }
 0x113   : > { %v808_v50 = vcombine.high %v800_v49, %v800_v49  ;;  %v7651_v51 = vrot.slane %v800_v49, %v7647_v43  ;;  %v809_v55 = vcombine.high %v807_v52, %v807_v52  ;;  %v7669_v57 = vrot.slane %v807_v52, %v7647_v43 }
 0x115   : > { %v7655_v53 = vrot.slane %v808_v50, %v7647_v43  ;;  %842 = vrot.lane.b32.xlu0 %v7651_v51, %s7394_s19  ;;  %v7660_v54 = vcombine.high %v7651_v51, %v7651_v51  ;;  %v7673_v58 = vrot.slane %v809_v55, %v7647_v43  ;;  %v7679_v59 = vcombine.high %v7669_v57, %v7669_v57 }
 0x116   : > { %v896_v60 = vrot.slane %v7651_v51, %v7647_v43  ;;  %v1145_v5 = vrot.slane %v7669_v57, %v7647_v43 }
 0x117   : > { %846 = vrot.lane.b32.xlu1 %v7660_v54, %s7394_s19  ;;  %v7666_v56 = vcombine.high %v7655_v53, %v7655_v53  ;;  %v7686_v61 = vcombine.high %v7673_v58, %v7673_v58  ;;  %v959_v62 = vrot.slane %v7655_v53, %v7647_v43  ;;  %v1021_v1 = vrot.slane %v7660_v54, %v7647_v43 }
 0x118   : > { %v7692_v63 = vrot.slane %v896_v60, %v7647_v43  ;;  %v1207_v6 = vrot.slane %v7673_v58, %v7647_v43  ;;  %v7724_v7 = vrot.slane %v1145_v5, %v7647_v43  ;;  %v1269_v10 = vrot.slane %v7679_v59, %v7647_v43 }
 0x119   : > { %844 = vrot.lane.b32.xlu0 %v7655_v53, %s7394_s19  ;;  %v7697_v0 = vrot.slane %v959_v62, %v7647_v43  ;;  %v1083_v2 = vrot.slane %v7666_v56, %v7647_v43  ;;  %v7708_v3 = vrot.slane %v1021_v1, %v7647_v43  ;;  %v1331_v11 = vrot.slane %v7686_v61, %v7647_v43 }
 0x11a   : > { %v7729_v8 = vrot.slane %v1207_v6, %v7647_v43  ;;  %v7740_v12 = vrot.slane %v1269_v10, %v7647_v43 }
 0x11b   : > { %848 = vrot.lane.b32.xlu1 %v7666_v56, %s7394_s19  ;;  %v7713_v4 = vrot.slane %v1083_v2, %v7647_v43  ;;  %v7745_v13 = vrot.slane %v1331_v11, %v7647_v43 }
 0x11d   : > { %850 = vrot.lane.b32.xlu0 %v7669_v57, %s7394_s19 }
 0x11f   : > { %852 = vrot.lane.b32.xlu1 %v7673_v58, %s7394_s19 }
 0x121   : > { %854 = vrot.lane.b32.xlu0 %v7679_v59, %s7394_s19 }
 0x123   : > { %856 = vrot.lane.b32.xlu1 %v7686_v61, %s7394_s19  ;;  %s9163_s19 = scalar_lea.vmem %s9162_s18, %s7491_s29 }
 0x125   : > { %904 = vrot.lane.b32.xlu0 %v7692_v63, %s7395_s28 }
 0x127   : > { %967 = vrot.lane.b32.xlu1 %v7697_v0, %s7395_s28 }
 0x129   : > { %858 = vrot.lane.b32.xlu0 %v7651_v51, %s7396_s21 }
 0x12b   : > { %860 = vrot.lane.b32.xlu1 %v7655_v53, %s7396_s21 }
 0x12d   : > { %1029 = vrot.lane.b32.xlu0 %v7708_v3, %s7395_s28 }
 0x12f   : > { %1091 = vrot.lane.b32.xlu1 %v7713_v4, %s7395_s28 }
 0x131   : > { %862 = vrot.lane.b32.xlu0 %v7660_v54, %s7396_s21 }
 0x133   : > { %864 = vrot.lane.b32.xlu1 %v7666_v56, %s7396_s21 }
 0x135   : > { %1153 = vrot.lane.b32.xlu0 %v7724_v7, %s7395_s28 }
 0x137   : > { %1215 = vrot.lane.b32.xlu1 %v7729_v8, %s7395_s28 }
 0x139   : > { %866 = vrot.lane.b32.xlu0 %v7669_v57, %s7396_s21 }
 0x13b   : > { %868 = vrot.lane.b32.xlu1 %v7673_v58, %s7396_s21 }
 0x13d   : > { %1277 = vrot.lane.b32.xlu0 %v7740_v12, %s7395_s28 }
 0x13f   : > { %1339 = vrot.lane.b32.xlu1 %v7745_v13, %s7395_s28 }
 0x141   : > { %870 = vrot.lane.b32.xlu0 %v7679_v59, %s7396_s21 }
 0x143   : > { %872 = vrot.lane.b32.xlu1 %v7686_v61, %s7396_s21 }
 0x187   : > { %v7751_v14 = vpop.permute.xlu0 %842 }
 0x188   : > { %v1393_v15 = vrot.slane %v7751_v14, %v7647_v43 }
 0x189   : > { %v7755_v16 = vpop.permute.xlu1 %846 }
 0x18a   : > { %v7758_v17 = vrot.slane %v1393_v15, %v7647_v43  ;;  %v1517_v21 = vrot.slane %v7755_v16, %v7647_v43 }
 0x18b   : > { %v7760_v18 = vpop.permute.xlu0 %844 }
 0x18c   : > { %v1455_v19 = vrot.slane %v7760_v18, %v7647_v43  ;;  %1401 = vrot.lane.b32.xlu0 %v7758_v17, %s7395_s28  ;;  %v7784_v27 = vrot.slane %v1517_v21, %v7647_v43 }
 0x18d   : > { %v7766_v20 = vpop.permute.xlu1 %848 }
 0x18e   : > { %v7771_v23 = vrot.slane %v1455_v19, %v7647_v43  ;;  %v1579_v26 = vrot.slane %v7766_v20, %v7647_v43 }
 0x18f   : > { %v7773_v24 = vpop.permute.xlu0 %850 }
 0x190   : > { %874 = vrot.lane.b32.xlu0 %v7651_v51, %s7397_s24  ;;  %1463 = vrot.lane.b32.xlu1 %v7771_v23, %s7395_s28  ;;  %v1641_v31 = vrot.slane %v7773_v24, %v7647_v43  ;;  %v7797_v32 = vrot.slane %v1579_v26, %v7647_v43 }
 0x191   : > { %v7779_v25 = vpop.permute.xlu1 %852 }
 0x192   : > { %v7806_v37 = vrot.slane %v1641_v31, %v7647_v43  ;;  %v1703_v38 = vrot.slane %v7779_v25, %v7647_v43 }
 0x193   : > { %v7786_v29 = vpop.permute.xlu0 %854 }
 0x194   : > { %1525 = vrot.lane.b32.xlu0 %v7784_v27, %s7395_s28  ;;  %876 = vrot.lane.b32.xlu1 %v7655_v53, %s7397_s24  ;;  %v1765_v41 = vrot.slane %v7786_v29, %v7647_v43  ;;  %v7823_v44 = vrot.slane %v1703_v38, %v7647_v43 }
 0x195   : > { %v7792_v30 = vpop.permute.xlu1 %856 }
 0x196   : > { %v7836_v48 = vrot.slane %v1765_v41, %v7647_v43  ;;  %v1827_v49 = vrot.slane %v7792_v30, %v7647_v43 }
 0x197   : > { %v905_v33 = vpop.permute.xlu0 %904 }
 0x198   : > { %v911_v34 = vsel %vm906_vm3, %v905_v33, 0  ;;  %878 = vrot.lane.b32.xlu0 %v7660_v54, %s7397_s24  ;;  %1587 = vrot.lane.b32.xlu1 %v7797_v32, %s7395_s28  ;;  %v7857_v55 = vrot.slane %v1827_v49, %v7647_v43 }
 0x199   : > { %6750 = vmatpush3.bf16.xpose.msra.mxu1 %v911_v34  ;;  %v968_v35 = vpop.permute.xlu1 %967 }
 0x19a   : > { %v973_v36 = vsel %vm906_vm3, %v968_v35, 0  ;;  %6761 = vmatprep.subr.bf16.mxu1 %v9105_v9 }
 0x19b   : > { %v7811_v39 = vpop.permute.xlu0 %858  ;;  %6756 = vmatpush3.bf16.xpose.msra.mxu0 %v973_v36 }
 0x19c   : > { %1649 = vrot.lane.b32.xlu0 %v7806_v37, %s7395_s28  ;;  %880 = vrot.lane.b32.xlu1 %v7666_v56, %s7397_s24  ;;  %v1889_v52 = vrot.slane %v7811_v39, %v7647_v43 }
 0x19d   : > { %v7817_v40 = vpop.permute.xlu1 %860  ;;  %6767 = vmatprep.subr.bf16.mxu0 %v9105_v9 }
 0x19e   : > { %v7872_v5 = vrot.slane %v1889_v52, %v7647_v43 }
 0x19f   : > { %v1030_v42 = vpop.permute.xlu0 %1029 }
 0x1a0   : > { %v1035_v45 = vsel %vm906_vm3, %v1030_v42, 0  ;;  %882 = vrot.lane.b32.xlu0 %v7669_v57, %s7397_s24  ;;  %6752 = vmatmul.mubr.msk.bf16.vlgmr.msra.gmra.mrb[4].mxu1 %vm906_vm3, %v7651_v51 }
 0x1a1   : > { %1711 = vrot.lane.b32.xlu1 %v7823_v44, %s7395_s28  ;;  %6762 = vmatpush3.bf16.xpose.msra.mxu1 %v1035_v45  ;;  %v1092_v46 = vpop.permute.xlu1 %1091 }
 0x1a2   : > { %v1097_v47 = vsel %vm906_vm3, %v1092_v46, 0  ;;  %6758 = vmatmul.mubr.msk.bf16.vlgmr.msra.gmra.mrb[0].mxu0 %vm906_vm3, %v7655_v53  ;;  %6763 = vmatprep.mubr.msk.bf16.mxu1 %vm7391_vm1, %v9105_v9 }
 0x1a3   : > { %v7842_v50 = vpop.permute.xlu0 %862  ;;  %6768 = vmatpush3.bf16.xpose.msra.mxu0 %v1097_v47  ;;  %6773 = vmatprep.subr.bf16.mxu1 %v9105_v9 }
 0x1a4   : > { %1773 = vrot.lane.b32.xlu0 %v7836_v48, %s7395_s28  ;;  %6769 = vmatprep.mubr.msk.bf16.mxu0 %vm7391_vm1, %v9105_v9  ;;  %v2013_v1 = vrot.slane %v7842_v50, %v7647_v43 }
 0x1a5   : > { %884 = vrot.lane.b32.xlu1 %v7673_v58, %s7397_s24  ;;  %v7851_v51 = vpop.permute.xlu1 %864  ;;  %6779 = vmatprep.subr.bf16.mxu0 %v9105_v9 }
 0x1a6   : > { %v7893_v11 = vrot.slane %v2013_v1, %v7647_v43  ;;  %v2075_v15 = vrot.slane %v7851_v51, %v7647_v43 }
 0x1a7   : > { %v1154_v53 = vpop.permute.xlu0 %1153 }
 0x1a8   : > { %v1159_v60 = vsel %vm906_vm3, %v1154_v53, 0  ;;  %886 = vrot.lane.b32.xlu0 %v7679_v59, %s7397_s24  ;;  %6764 = vmatmul.mubr.msk.bf16.vlgmr.msra.gmra.mrb[8].mxu1 %vm906_vm3, %v7660_v54  ;;  %v1951_v54 = vrot.slane %v7817_v40, %v7647_v43  ;;  %v7920_v36 = vrot.slane %v2075_v15, %v7647_v43 }
 0x1a9   : > { %1835 = vrot.lane.b32.xlu1 %v7857_v55, %s7395_s28  ;;  %6774 = vmatpush3.bf16.xpose.msra.mxu1 %v1159_v60  ;;  %v1216_v62 = vpop.permute.xlu1 %1215 }
 0x1aa   : > { %v1221_v2 = vsel %vm906_vm3, %v1216_v62, 0  ;;  %6770 = vmatmul.mubr.msk.bf16.vlgmr.msra.gmra.mrb[4].mxu0 %vm906_vm3, %v7666_v56  ;;  %6775 = vmatprep.mubr.msk.bf16.mxu1 %vm7391_vm1, %v9105_v9  ;;  %v7898_v21 = vrot.slane %v1951_v54, %v7647_v43 }
 0x1ab   : > { %v7878_v6 = vpop.permute.xlu0 %866  ;;  %6780 = vmatpush3.bf16.xpose.msra.mxu0 %v1221_v2  ;;  %6785 = vmatprep.subr.bf16.mxu1 %v9105_v9 }
 0x1ac   : > { %1897 = vrot.lane.b32.xlu0 %v7872_v5, %s7395_s28  ;;  %6781 = vmatprep.mubr.msk.bf16.mxu0 %vm7391_vm1, %v9105_v9  ;;  %v2137_v10 = vrot.slane %v7878_v6, %v7647_v43 }
 0x1ad   : > { %888 = vrot.lane.b32.xlu1 %v7686_v61, %s7397_s24  ;;  %v7887_v56 = vpop.permute.xlu1 %868  ;;  %6791 = vmatprep.subr.bf16.mxu0 %v9105_v9 }
 0x1ae   : > { %v7911_v34 = vrot.slane %v2137_v10, %v7647_v43  ;;  %v2199_v35 = vrot.slane %v7887_v56, %v7647_v43 }
 0x1af   : > { %v1278_v19 = vpop.permute.xlu0 %1277 }
 0x1b0   : > { %v1283_v26 = vsel %vm906_vm3, %v1278_v19, 0  ;;  %2021 = vrot.lane.b32.xlu0 %v7893_v11, %s7395_s28  ;;  %6776 = vmatmul.mubr.msk.bf16.vlgmr.msra.gmra.mrb[12].mxu1 %vm906_vm3, %v7669_v57  ;;  %v7940_v45 = vrot.slane %v2199_v35, %v7647_v43 }
 0x1b1   : > { %1959 = vrot.lane.b32.xlu1 %v7898_v21, %s7395_s28  ;;  %6786 = vmatpush3.bf16.xpose.msra.mxu1 %v1283_v26  ;;  %v1340_v31 = vpop.permute.xlu1 %1339 }
 0x1b2   : > { %v1345_v33 = vsel %vm906_vm3, %v1340_v31, 0  ;;  %6782 = vmatmul.mubr.msk.bf16.vlgmr.msra.gmra.mrb[8].mxu0 %vm906_vm3, %v7673_v58  ;;  %6787 = vmatprep.mubr.msk.bf16.mxu1 %vm7391_vm1, %v9105_v9 }
 0x1b3   : > { %v7917_v57 = vpop.permute.xlu0 %870  ;;  %6792 = vmatpush3.bf16.xpose.msra.mxu0 %v1345_v33  ;;  %6793 = vmatprep.mubr.msk.bf16.mxu0 %vm7391_vm1, %v9105_v9 }
 0x1b4   : > { %v2261_v58 = vrot.slane %v7917_v57, %v7647_v43  ;;  %2145 = vrot.lane.b32.xlu0 %v7911_v34, %s7395_s28  ;;  %6797 = vmatprep.subr.bf16.mxu1 %v9105_v9 }
 0x1b5   : > { %2083 = vrot.lane.b32.xlu1 %v7920_v36, %s7395_s28  ;;  %v7931_v38 = vpop.permute.xlu1 %872  ;;  %6803 = vmatprep.subr.bf16.mxu0 %v9105_v9 }
 0x1b6   : > { %v7935_v41 = vrot.slane %v2261_v58, %v7647_v43  ;;  %v2323_v42 = vrot.slane %v7931_v38, %v7647_v43 }
 0x1b8   : > { %6788 = vmatmul.mubr.msk.bf16.vlgmr.msra.gmra.mrb[16].mxu1 %vm906_vm3, %v7679_v59  ;;  %2269 = vrot.lane.b32.xlu0 %v7935_v41, %s7395_s28  ;;  %v7953_v46 = vrot.slane %v2323_v42, %v7647_v43 }
 0x1b9   : > { %2207 = vrot.lane.b32.xlu1 %v7940_v45, %s7395_s28  ;;  %6799 = vmatprep.mubr.msk.bf16.mxu1 %vm7391_vm1, %v9105_v9 }
 0x1ba   : > { %6794 = vmatmul.mubr.msk.bf16.vlgmr.msra.gmra.mrb[12].mxu0 %vm906_vm3, %v7686_v61 }
 0x1bb   : > { %6805 = vmatprep.mubr.msk.bf16.mxu0 %vm7391_vm1, %v9105_v9 }
 0x1bd   : > { %2331 = vrot.lane.b32.xlu1 %v7953_v46, %s7395_s28 }
 0x1fe   : > { %v1402_v59 = vpop.permute.xlu0 %1401 }
 0x1ff   : > { %v1407_v47 = vsel %vm906_vm3, %v1402_v59, 0 }
 0x200   : > { %6798 = vmatpush3.bf16.xpose.msra.mxu1 %v1407_v47 }
 0x201   : > { %6809 = vmatprep.subr.bf16.mxu1 %v9105_v9 }
 0x202   : > { %v7961_v49 = vpop.permute.xlu0 %874  ;;  %v1464_v52 = vpop.permute.xlu1 %1463 }
 0x203   : > { %v2385_v61 = vrot.slane %v7961_v49, %v7647_v43  ;;  %v1469_v53 = vsel %vm906_vm3, %v1464_v52, 0 }
 0x204   : > { %6804 = vmatpush3.bf16.xpose.msra.mxu0 %v1469_v53 }
 0x205   : > { %v7967_v60 = vrot.slane %v2385_v61, %v7647_v43  ;;  %6815 = vmatprep.subr.bf16.mxu0 %v9105_v9 }
 0x206   : > { %v1526_v62 = vpop.permute.xlu0 %1525  ;;  %v7970_v1 = vpop.permute.xlu1 %876 }
 0x207   : > { %v1531_v2 = vsel %vm906_vm3, %v1526_v62, 0  ;;  %v2447_v54 = vrot.slane %v7970_v1, %v7647_v43  ;;  %6800 = vmatmul.mubr.msk.bf16.vlgmr.msra.gmra.mrb[20].mxu1 %vm906_vm3, %v7751_v14  ;;  %2393 = vrot.lane.b32.xlu0 %v7967_v60, %s7395_s28 }
 0x208   : > { %6810 = vmatpush3.bf16.xpose.msra.mxu1 %v1531_v2  ;;  %6811 = vmatprep.mubr.msk.bf16.mxu1 %vm7391_vm1, %v9105_v9 }
 0x209   : > { %v7982_v10 = vrot.slane %v2447_v54, %v7647_v43  ;;  %6821 = vmatprep.subr.bf16.mxu1 %v9105_v9 }
 0x20a   : > { %v7985_v15 = vpop.permute.xlu0 %878  ;;  %v1588_v19 = vpop.permute.xlu1 %1587 }
 0x20b   : > { %v2509_v26 = vrot.slane %v7985_v15, %v7647_v43  ;;  %v1593_v14 = vsel %vm906_vm3, %v1588_v19, 0  ;;  %6806 = vmatmul.mubr.msk.bf16.vlgmr.msra.gmra.mrb[16].mxu0 %vm906_vm3, %v7760_v18  ;;  %2455 = vrot.lane.b32.xlu1 %v7982_v10, %s7395_s28 }
 0x20c   : > { %6816 = vmatpush3.bf16.xpose.msra.mxu0 %v1593_v14  ;;  %6817 = vmatprep.mubr.msk.bf16.mxu0 %vm7391_vm1, %v9105_v9 }
 0x20d   : > { %v7997_v31 = vrot.slane %v2509_v26, %v7647_v43  ;;  %6827 = vmatprep.subr.bf16.mxu0 %v9105_v9 }
 0x20e   : > { %v1650_v33 = vpop.permute.xlu0 %1649  ;;  %v8000_v35 = vpop.permute.xlu1 %880 }
 0x20f   : > { %v1655_v58 = vsel %vm906_vm3, %v1650_v33, 0  ;;  %v2571_v18 = vrot.slane %v8000_v35, %v7647_v43  ;;  %6812 = vmatmul.mubr.msk.bf16.vlgmr.msra.gmra.mrb[24].mxu1 %vm906_vm3, %v7755_v16  ;;  %2517 = vrot.lane.b32.xlu0 %v7997_v31, %s7395_s28 }
 0x210   : > { %6822 = vmatpush3.bf16.xpose.msra.mxu1 %v1655_v58  ;;  %6823 = vmatprep.mubr.msk.bf16.mxu1 %vm7391_vm1, %v9105_v9 }
 0x211   : > { %v8012_v42 = vrot.slane %v2571_v18, %v7647_v43  ;;  %6833 = vmatprep.subr.bf16.mxu1 %v9105_v9 }
 0x212   : > { %v8015_v59 = vpop.permute.xlu0 %882 }
 0x213   : > { %v2633_v47 = vrot.slane %v8015_v59, %v7647_v43  ;;  %v1712_v52 = vpop.permute.xlu1 %1711  ;;  %6818 = vmatmul.mubr.msk.bf16.vlgmr.msra.gmra.mrb[20].mxu0 %vm906_vm3, %v7766_v20  ;;  %2579 = vrot.lane.b32.xlu1 %v8012_v42, %s7395_s28 }
 0x214   : > { %v1717_v16 = vsel %vm906_vm3, %v1712_v52, 0  ;;  %6829 = vmatprep.mubr.msk.bf16.mxu0 %vm7391_vm1, %v9105_v9 }
 0x215   : > { %6828 = vmatpush3.bf16.xpose.msra.mxu0 %v1717_v16  ;;  %v8027_v61 = vrot.slane %v2633_v47, %v7647_v43 }
 0x216   : > { %v1774_v53 = vpop.permute.xlu0 %1773  ;;  %6839 = vmatprep.subr.bf16.mxu0 %v9105_v9 }
 0x217   : > { %v1779_v62 = vsel %vm906_vm3, %v1774_v53, 0  ;;  %v8031_v2 = vpop.permute.xlu1 %884  ;;  %6824 = vmatmul.mubr.msk.bf16.vlgmr.msra.gmra.mrb[28].mxu1 %vm906_vm3, %v7773_v24  ;;  %2641 = vrot.lane.b32.xlu0 %v8027_v61, %s7395_s28 }
 0x218   : > { %v2695_v20 = vrot.slane %v8031_v2, %v7647_v43  ;;  %6834 = vmatpush3.bf16.xpose.msra.mxu1 %v1779_v62  ;;  %6835 = vmatprep.mubr.msk.bf16.mxu1 %vm7391_vm1, %v9105_v9 }
 0x219   : > { %6845 = vmatprep.subr.bf16.mxu1 %v9105_v9 }
 0x21a   : > { %v8042_v54 = vpop.permute.xlu0 %886  ;;  %v8045_v19 = vrot.slane %v2695_v20, %v7647_v43 }
 0x21b   : > { %v2757_v24 = vrot.slane %v8042_v54, %v7647_v43  ;;  %v1836_v26 = vpop.permute.xlu1 %1835 }
 0x21c   : > { %v1841_v14 = vsel %vm906_vm3, %v1836_v26, 0  ;;  %6830 = vmatmul.mubr.msk.bf16.vlgmr.msra.gmra.mrb[24].mxu0 %vm906_vm3, %v7779_v25  ;;  %2703 = vrot.lane.b32.xlu1 %v8045_v19, %s7395_s28 }
 0x21d   : > { %6840 = vmatpush3.bf16.xpose.msra.mxu0 %v1841_v14  ;;  %v8055_v33 = vrot.slane %v2757_v24, %v7647_v43  ;;  %6841 = vmatprep.mubr.msk.bf16.mxu0 %vm7391_vm1, %v9105_v9 }
 0x21e   : > { %v1898_v58 = vpop.permute.xlu0 %1897  ;;  %6851 = vmatprep.subr.bf16.mxu0 %v9105_v9 }
 0x21f   : > { %9133 = vst [vmem:[#allocation8_spill] sm:$0xff] %v8055_v33  ;;  %v1903_v18 = vsel %vm906_vm3, %v1898_v58, 0  ;;  %v8061_v47 = vpop.permute.xlu1 %888  ;;  %6836 = vmatmul.mubr.msk.bf16.vlgmr.msra.gmra.mrb[32].mxu1 %vm906_vm3, %v7786_v29  ;;  %2765 = vrot.lane.b32.xlu0 %v8055_v33, %s7395_s28 }
 0x220   : > { %v2819_v25 = vrot.slane %v8061_v47, %v7647_v43  ;;  %6846 = vmatpush3.bf16.xpose.msra.mxu1 %v1903_v18  ;;  %6847 = vmatprep.mubr.msk.bf16.mxu1 %vm7391_vm1, %v9105_v9 }
 0x221   : > { %6857 = vmatprep.subr.bf16.mxu1 %v9105_v9 }
 0x222   : > { %v8073_v52 = vrot.slane %v2819_v25, %v7647_v43  ;;  %v2022_v29 = vpop.permute.xlu0 %2021 }
 0x223   : > { %v1960_v16 = vpop.permute.xlu1 %1959  ;;  %3342 = vrot.lane.b32.xlu0 %v7697_v0, %s7398_s27  ;;  %v2027_v62 = vsel %vm906_vm3, %v2022_v29, 0 }
 0x224   : > { %9134 = vst [vmem:[#allocation9_spill] sm:$0xff] %v8073_v52  ;;  %v1965_v53 = vsel %vm906_vm3, %v1960_v16, 0  ;;  %6842 = vmatmul.mubr.msk.bf16.vlgmr.msra.gmra.mrb[28].mxu0 %vm906_vm3, %v7792_v30  ;;  %2827 = vrot.lane.b32.xlu1 %v8073_v52, %s7395_s28 }
 0x225   : > { %6852 = vmatpush3.bf16.xpose.msra.mxu0 %v1965_v53  ;;  %6853 = vmatprep.mubr.msk.bf16.mxu0 %vm7391_vm1, %v9105_v9 }
 0x226   : > { %6863 = vmatprep.subr.bf16.mxu0 %v9105_v9  ;;  %v2146_v30 = vpop.permute.xlu0 %2145 }
 0x227   : > { %6848 = vmatmul.mubr.msk.bf16.vlgmr.msra.gmra.mrb[36].mxu1 %vm906_vm3, %v7811_v39  ;;  %3438 = vrot.lane.b32.xlu0 %v7713_v4, %s7398_s27  ;;  %v2084_v0 = vpop.permute.xlu1 %2083 }
 0x228   : > { %3292 = vrot.lane.b32.xlu1 %v7692_v63, %s7398_s27  ;;  %6858 = vmatpush3.bf16.xpose.msra.mxu1 %v2027_v62  ;;  %v2089_v20 = vsel %vm906_vm3, %v2084_v0, 0  ;;  %v2151_v63 = vsel %vm906_vm3, %v2146_v30, 0 }
 0x229   : > { %6859 = vmatprep.mubr.msk.bf16.mxu1 %vm7391_vm1, %v9105_v9  ;;  %6869 = vmatprep.subr.bf16.mxu1 %v9105_v9 }
 0x22a   : > { %v2270_v4 = vpop.permute.xlu0 %2269 }
 0x22b   : > { %3534 = vrot.lane.b32.xlu0 %v7729_v8, %s7398_s27 }
 0x22c   : > { %3390 = vrot.lane.b32.xlu1 %v7708_v3, %s7398_s27  ;;  %6854 = vmatmul.mubr.msk.bf16.vlgmr.msra.gmra.mrb[32].mxu0 %vm906_vm3, %v7817_v40  ;;  %v2208_v3 = vpop.permute.xlu1 %2207 }
 0x22d   : > { %6864 = vmatpush3.bf16.xpose.msra.mxu0 %v2089_v20  ;;  %6865 = vmatprep.mubr.msk.bf16.mxu0 %vm7391_vm1, %v9105_v9  ;;  %v2213_v8 = vsel %vm906_vm3, %v2208_v3, 0 }
 0x22e   : > { %6875 = vmatprep.subr.bf16.mxu0 %v9105_v9 }
 0x22f   : > { %6860 = vmatmul.mubr.msk.bf16.vlgmr.msra.gmra.mrb[40].mxu1 %vm906_vm3, %v7842_v50  ;;  %3630 = vrot.lane.b32.xlu0 %v7745_v13, %s7398_s27 }
 0x230   : > { %3486 = vrot.lane.b32.xlu1 %v7724_v7, %s7398_s27  ;;  %6870 = vmatpush3.bf16.xpose.msra.mxu1 %v2151_v63  ;;  %v2275_v7 = vsel %vm906_vm3, %v2270_v4, 0 }
 0x231   : > { %6871 = vmatprep.mubr.msk.bf16.mxu1 %vm7391_vm1, %v9105_v9  ;;  %6881 = vmatprep.subr.bf16.mxu1 %v9105_v9 }
 0x233   : > { %3726 = vrot.lane.b32.xlu0 %v7771_v23, %s7398_s27 }
 0x234   : > { %3582 = vrot.lane.b32.xlu1 %v7740_v12, %s7398_s27  ;;  %6866 = vmatmul.mubr.msk.bf16.vlgmr.msra.gmra.mrb[36].mxu0 %vm906_vm3, %v7851_v51  ;;  %v2332_v12 = vpop.permute.xlu1 %2331 }
 0x235   : > { %6876 = vmatpush3.bf16.xpose.msra.mxu0 %v2213_v8  ;;  %6877 = vmatprep.mubr.msk.bf16.mxu0 %vm7391_vm1, %v9105_v9  ;;  %v2337_v13 = vsel %vm906_vm3, %v2332_v12, 0 }
 0x236   : > { %6887 = vmatprep.subr.bf16.mxu0 %v9105_v9 }
 0x237   : > { %6872 = vmatmul.mubr.msk.bf16.vlgmr.msra.gmra.mrb[44].mxu1 %vm906_vm3, %v7878_v6  ;;  %3918 = vrot.lane.b32.xlu0 %v7823_v44, %s7398_s27 }
 0x238   : > { %3678 = vrot.lane.b32.xlu1 %v7758_v17, %s7398_s27  ;;  %6882 = vmatpush3.bf16.xpose.msra.mxu1 %v2275_v7 }
 0x239   : > { %6883 = vmatprep.mubr.msk.bf16.mxu1 %vm7391_vm1, %v9105_v9  ;;  %6893 = vmatprep.subr.bf16.mxu1 %v9105_v9 }
 0x23b   : > { %4110 = vrot.lane.b32.xlu0 %v7898_v21, %s7398_s27 }
 0x23c   : > { %3774 = vrot.lane.b32.xlu1 %v7784_v27, %s7398_s27  ;;  %6878 = vmatmul.mubr.msk.bf16.vlgmr.msra.gmra.mrb[40].mxu0 %vm906_vm3, %v7887_v56 }
 0x23d   : > { %6888 = vmatpush3.bf16.xpose.msra.mxu0 %v2337_v13  ;;  %6889 = vmatprep.mubr.msk.bf16.mxu0 %vm7391_vm1, %v9105_v9 }
 0x23e   : > { %6899 = vmatprep.subr.bf16.mxu0 %v9105_v9 }
 0x23f   : > { %6884 = vmatmul.mubr.msk.bf16.vlgmr.msra.gmra.mrb[48].mxu1 %vm906_vm3, %v7917_v57  ;;  %4302 = vrot.lane.b32.xlu0 %v7940_v45, %s7398_s27 }
 0x240   : > { %3870 = vrot.lane.b32.xlu1 %v7806_v37, %s7398_s27  ;;  %6895 = vmatprep.mubr.msk.bf16.mxu1 %vm7391_vm1, %v9105_v9 }
 0x243   : > { %3822 = vrot.lane.b32.xlu0 %v7797_v32, %s7398_s27 }
 0x244   : > { %3966 = vrot.lane.b32.xlu1 %v7836_v48, %s7398_s27  ;;  %6890 = vmatmul.mubr.msk.bf16.vlgmr.msra.gmra.mrb[44].mxu0 %vm906_vm3, %v7931_v38 }
 0x245   : > { %6901 = vmatprep.mubr.msk.bf16.mxu0 %vm7391_vm1, %v9105_v9 }
 0x247   : > { %4014 = vrot.lane.b32.xlu0 %v7857_v55, %s7398_s27 }
 0x248   : > { %4062 = vrot.lane.b32.xlu1 %v7872_v5, %s7398_s27 }
 0x24b   : > { %4206 = vrot.lane.b32.xlu0 %v7920_v36, %s7398_s27 }
 0x24c   : > { %4158 = vrot.lane.b32.xlu1 %v7893_v11, %s7398_s27 }
 0x24f   : > { %4398 = vrot.lane.b32.xlu0 %v7953_v46, %s7398_s27 }
 0x250   : > { %4254 = vrot.lane.b32.xlu1 %v7911_v34, %s7398_s27 }
 0x254   : > { %4350 = vrot.lane.b32.xlu1 %v7935_v41, %s7398_s27 }
 0x258   : > { %4446 = vrot.lane.b32.xlu1 %v7967_v60, %s7398_s27 }
 0x273   : > { %v947_v17 = vpop.f32.mrb[4].mxu1 }
 0x274   : > { %v8177_v23 = vmul.f32 0.35355338, %v947_v17  ;;  %v6753_v27 = vpop.f32.mrb[5].mxu1 }
 0x275   : > { %v950_v32 = vpop.f32.mrb[6].mxu1  ;;  %v1009_v37 = vpop.f32.mrb[0].mxu0 }
 0x276   : > { %v6754_v39 = vpop.f32.mrb[7].mxu1  ;;  %v6759_v40 = vpop.f32.mrb[1].mxu0  ;;  %v2908_v44 = vsel %vm2907_vm4, %v8177_v23, -inf  ;;  %v8181_v48 = vmul.f32 0.35355338, %v1009_v37 }
 0x277   : > { %v1012_v50 = vpop.f32.mrb[2].mxu0  ;;  %2909 = vmax.xlane.f32.xlu0 %v2908_v44 }
 0x278   : > { %v6760_v51 = vpop.f32.mrb[3].mxu0  ;;  %v2911_v6 = vsel %vm2907_vm4, %v8181_v48, -inf }
 0x279   : > { %v2394_v55 = vpop.permute.xlu0 %2393 }
 0x27a   : > { %v2399_v5 = vsel %vm906_vm3, %v2394_v55, 0 }
 0x27b   : > { %6894 = vmatpush3.bf16.xpose.msra.mxu1 %v2399_v5  ;;  %v1071_v56 = vpop.f32.mrb[8].mxu1 }
 0x27c   : > { %2912 = vmax.xlane.f32.xlu1 %v2911_v6  ;;  %v8186_v11 = vmul.f32 0.35355338, %v1071_v56  ;;  %v6765_v21 = vpop.f32.mrb[9].mxu1  ;;  %6905 = vmatprep.subr.bf16.mxu1 %v9105_v9 }
 0x27d   : > { %v1133_v34 = vpop.f32.mrb[4].mxu0  ;;  %v2456_v57 = vpop.permute.xlu1 %2455 }
 0x27e   : > { %v8189_v36 = vmul.f32 0.35355338, %v1133_v34  ;;  %v2461_v38 = vsel %vm906_vm3, %v2456_v57, 0  ;;  %v1074_v41 = vpop.f32.mrb[10].mxu1  ;;  %v6771_v45 = vpop.f32.mrb[5].mxu0  ;;  %v2914_v46 = vsel %vm2907_vm4, %v8186_v11, -inf }
 0x27f   : > { %v6766_v60 = vpop.f32.mrb[11].mxu1  ;;  %v1136_v24 = vpop.f32.mrb[6].mxu0  ;;  %6900 = vmatpush3.bf16.xpose.msra.mxu0 %v2461_v38  ;;  %2915 = vmax.xlane.f32.xlu0 %v2914_v46 }
 0x280   : > { %v6772_v26 = vpop.f32.mrb[7].mxu0  ;;  %6911 = vmatprep.subr.bf16.mxu0 %v9105_v9  ;;  %v2917_v18 = vsel %vm2907_vm4, %v8189_v36, -inf }
 0x281   : > { %v2518_v14 = vpop.permute.xlu0 %2517 }
 0x282   : > { %v2523_v58 = vsel %vm906_vm3, %v2518_v14, 0  ;;  %6896 = vmatmul.mubr.msk.bf16.vlgmr.msra.gmra.mrb[52].mxu1 %vm906_vm3, %v7961_v49 }
 0x283   : > { %6906 = vmatpush3.bf16.xpose.msra.mxu1 %v2523_v58  ;;  %2918 = vmax.xlane.f32.xlu0 %v2917_v18  ;;  %v1195_v25 = vpop.f32.mrb[12].mxu1 }
 0x284   : > { %v8200_v16 = vmul.f32 0.35355338, %v1195_v25  ;;  %v6777_v29 = vpop.f32.mrb[13].mxu1  ;;  %6907 = vmatprep.mubr.msk.bf16.mxu1 %vm7391_vm1, %v9105_v9  ;;  %6917 = vmatprep.subr.bf16.mxu1 %v9105_v9 }
 0x285   : > { %v1257_v53 = vpop.f32.mrb[8].mxu0  ;;  %v2580_v62 = vpop.permute.xlu1 %2579 }
 0x286   : > { %v8205_v0 = vmul.f32 0.35355338, %v1257_v53  ;;  %v2585_v49 = vsel %vm906_vm3, %v2580_v62, 0  ;;  %v1198_v30 = vpop.f32.mrb[14].mxu1  ;;  %v6783_v20 = vpop.f32.mrb[9].mxu0  ;;  %6902 = vmatmul.mubr.msk.bf16.vlgmr.msra.gmra.mrb[48].mxu0 %vm906_vm3, %v7970_v1  ;;  %v2920_v63 = vsel %vm2907_vm4, %v8200_v16, -inf }
 0x287   : > { %v6778_v3 = vpop.f32.mrb[15].mxu1  ;;  %v1260_v4 = vpop.f32.mrb[10].mxu0  ;;  %6912 = vmatpush3.bf16.xpose.msra.mxu0 %v2585_v49  ;;  %2921 = vmax.xlane.f32.xlu1 %v2920_v63 }
 0x288   : > { %v6784_v8 = vpop.f32.mrb[11].mxu0  ;;  %v2923_v7 = vsel %vm2907_vm4, %v8205_v0, -inf  ;;  %6913 = vmatprep.mubr.msk.bf16.mxu0 %vm7391_vm1, %v9105_v9  ;;  %6923 = vmatprep.subr.bf16.mxu0 %v9105_v9 }
 0x289   : > { %v2642_v12 = vpop.permute.xlu0 %2641  ;;  %2924 = vmax.xlane.f32.xlu0 %v2923_v7 }
 0x28a   : > { %v2647_v1 = vsel %vm906_vm3, %v2642_v12, 0  ;;  %6908 = vmatmul.mubr.msk.bf16.vlgmr.msra.gmra.mrb[56].mxu1 %vm906_vm3, %v7985_v15 }
 0x28b   : > { %v1319_v13 = vpop.f32.mrb[16].mxu1  ;;  %6918 = vmatpush3.bf16.xpose.msra.mxu1 %v2647_v1  ;;  %6919 = vmatprep.mubr.msk.bf16.mxu1 %vm7391_vm1, %v9105_v9 }
 0x28c   : > { %v8222_v17 = vmul.f32 0.35355338, %v1319_v13  ;;  %v6789_v27 = vpop.f32.mrb[17].mxu1  ;;  %6929 = vmatprep.subr.bf16.mxu1 %v9105_v9 }
 0x28d   : > { %v1381_v32 = vpop.f32.mrb[12].mxu0  ;;  %v1322_v37 = vpop.f32.mrb[18].mxu1 }
 0x28e   : > { %v8225_v39 = vmul.f32 0.35355338, %v1381_v32  ;;  %v2704_v40 = vpop.permute.xlu1 %2703  ;;  %v6790_v44 = vpop.f32.mrb[19].mxu1  ;;  %6914 = vmatmul.mubr.msk.bf16.vlgmr.msra.gmra.mrb[52].mxu0 %vm906_vm3, %v8000_v35  ;;  %v2926_v15 = vsel %vm2907_vm4, %v8222_v17, -inf }
 0x28f   : > { %v2709_v50 = vsel %vm906_vm3, %v2704_v40, 0  ;;  %v6795_v51 = vpop.f32.mrb[13].mxu0  ;;  %2927 = vmax.xlane.f32.xlu1 %v2926_v15  ;;  %6925 = vmatprep.mubr.msk.bf16.mxu0 %vm7391_vm1, %v9105_v9 }
 0x290   : > { %v1384_v55 = vpop.f32.mrb[14].mxu0  ;;  %6924 = vmatpush3.bf16.xpose.msra.mxu0 %v2709_v50  ;;  %v2929_v5 = vsel %vm2907_vm4, %v8225_v39, -inf }
 0x291   : > { %v6796_v6 = vpop.f32.mrb[15].mxu0  ;;  %v2766_v56 = vpop.permute.xlu0 %2765  ;;  %2930 = vmax.xlane.f32.xlu0 %v2929_v5  ;;  %6935 = vmatprep.subr.bf16.mxu0 %v9105_v9 }
 0x292   : > { %v2771_v35 = vsel %vm906_vm3, %v2766_v56, 0  ;;  %6920 = vmatmul.mubr.msk.bf16.vlgmr.msra.gmra.mrb[60].mxu1 %vm906_vm3, %v8015_v59 }
 0x293   : > { %6930 = vmatpush3.bf16.xpose.msra.mxu1 %v2771_v35  ;;  %6931 = vmatprep.mubr.msk.bf16.mxu1 %vm7391_vm1, %v9105_v9 }
 0x294   : > { %6941 = vmatprep.subr.bf16.mxu1 %v9105_v9 }
 0x295   : > { %v3343_v38 = vpop.permute.xlu0 %3342 }
 0x296   : > { %v2828_v21 = vpop.permute.xlu1 %2827 }
 0x297   : > { %v2833_v34 = vsel %vm906_vm3, %v2828_v21, 0  ;;  %6926 = vmatmul.mubr.msk.bf16.vlgmr.msra.gmra.mrb[56].mxu0 %vm906_vm3, %v8031_v2  ;;  %v3348_v2 = vsel %vm3298_vm5, %v3343_v38, 0 }
 0x298   : > { %6936 = vmatpush3.bf16.xpose.msra.mxu0 %v2833_v34  ;;  %6937 = vmatprep.mubr.msk.bf16.mxu0 %vm7391_vm1, %v9105_v9 }
 0x299   : > { %6947 = vmatprep.subr.bf16.mxu0 %v9105_v9  ;;  %v8265_v24 = vpop.permute.xlu0 %3438 }
 0x29a   : > { %v3293_v59 = vpop.permute.xlu1 %3292  ;;  %6932 = vmatmul.mubr.msk.bf16.vlgmr.msra.gmra.mrb[64].mxu1 %vm906_vm3, %v8042_v54 }
 0x29b   : > { %v3300_v57 = vsel %vm3298_vm5, %v3293_v59, 0  ;;  %6943 = vmatprep.mubr.msk.bf16.mxu1 %vm7391_vm1, %v9105_v9 }
 0x29c   : > { %6942 = vmatpush3.bf16.msra.mxu1 %v3300_v57 }
 0x29d   : > { %6953 = vmatprep.subr.bf16.mxu1 %v9105_v9  ;;  %v8275_v30 = vpop.permute.xlu0 %3534 }
 0x29e   : > { %v8261_v54 = vpop.permute.xlu1 %3390 }
 0x29f   : > { %6938 = vmatmul.mubr.msk.bf16.vlgmr.msra.gmra.mrb[60].mxu0 %vm906_vm3, %v8061_v47 }
 0x2a0   : > { %6948 = vmatpush3.bf16.msra.mxu0 %v3348_v2  ;;  %6949 = vmatprep.mubr.msk.bf16.mxu0 %vm7391_vm1, %v9105_v9 }
 0x2a1   : > { %6959 = vmatprep.subr.bf16.mxu0 %v9105_v9  ;;  %v8285_v32 = vpop.permute.xlu0 %3630 }
 0x2a2   : > { %v8269_v58 = vpop.permute.xlu1 %3486 }
 0x2a5   : > { %v8295_v56 = vpop.permute.xlu0 %3726 }
 0x2a6   : > { %v8279_v4 = vpop.permute.xlu1 %3582 }
 0x2aa   : > { %v8289_v15 = vpop.permute.xlu1 %3678 }
 0x2ae   : > { %v8299_v59 = vpop.permute.xlu1 %3774 }
 0x2da   : > { %v1443_v41 = vpop.f32.mrb[20].mxu1 }
 0x2db   : > { %v8263_v45 = vmul.f32 0.35355338, %v1443_v41  ;;  %v6801_v46 = vpop.f32.mrb[21].mxu1 }
 0x2dc   : > { %v1446_v60 = vpop.f32.mrb[22].mxu1 }
 0x2dd   : > { %v6802_v26 = vpop.f32.mrb[23].mxu1  ;;  %v2932_v14 = vsel %vm2907_vm4, %v8263_v45, -inf }
 0x2de   : > { %v1505_v47 = vpop.f32.mrb[16].mxu0  ;;  %2933 = vmax.xlane.f32.xlu1 %v2932_v14  ;;  %v8305_v14 = vpop.permute.xlu0 %3918 }
 0x2df   : > { %v8271_v18 = vmul.f32 0.35355338, %v1505_v47  ;;  %v6807_v25 = vpop.f32.mrb[17].mxu0 }
 0x2e0   : > { %v1508_v29 = vpop.f32.mrb[18].mxu0 }
 0x2e1   : > { %v6808_v53 = vpop.f32.mrb[19].mxu0  ;;  %v2935_v62 = vsel %vm2907_vm4, %v8271_v18, -inf  ;;  %v8309_v29 = vpop.permute.xlu1 %3870 }
 0x2e2   : > { %2936 = vmax.xlane.f32.xlu0 %v2935_v62  ;;  %v1567_v49 = vpop.f32.mrb[24].mxu1 }
 0x2e3   : > { %v8277_v20 = vmul.f32 0.35355338, %v1567_v49  ;;  %v6813_v63 = vpop.f32.mrb[25].mxu1 }
 0x2e4   : > { %v1570_v3 = vpop.f32.mrb[26].mxu1 }
 0x2e5   : > { %v6814_v8 = vpop.f32.mrb[27].mxu1  ;;  %v2938_v7 = vsel %vm2907_vm4, %v8277_v20, -inf }
 0x2e6   : > { %v1629_v12 = vpop.f32.mrb[20].mxu0  ;;  %2939 = vmax.xlane.f32.xlu1 %v2938_v7 }
 0x2e7   : > { %v8283_v1 = vmul.f32 0.35355338, %v1629_v12  ;;  %v6819_v13 = vpop.f32.mrb[21].mxu0  ;;  %v8315_v12 = vpop.permute.xlu0 %4110 }
 0x2e8   : > { %v1632_v27 = vpop.f32.mrb[22].mxu0 }
 0x2e9   : > { %v6820_v37 = vpop.f32.mrb[23].mxu0  ;;  %v2941_v40 = vsel %vm2907_vm4, %v8283_v1, -inf }
 0x2ea   : > { %2942 = vmax.xlane.f32.xlu0 %v2941_v40  ;;  %v1691_v44 = vpop.f32.mrb[28].mxu1  ;;  %v8317_v37 = vpop.permute.xlu1 %3966 }
 0x2eb   : > { %v8291_v50 = vmul.f32 0.35355338, %v1691_v44  ;;  %v6825_v51 = vpop.f32.mrb[29].mxu1 }
 0x2ec   : > { %v1694_v55 = vpop.f32.mrb[30].mxu1 }
 0x2ed   : > { %v6826_v5 = vpop.f32.mrb[31].mxu1  ;;  %v2944_v6 = vsel %vm2907_vm4, %v8291_v50, -inf  ;;  %v8319_v55 = vpop.permute.xlu0 %4302 }
 0x2ee   : > { %2945 = vmax.xlane.f32.xlu1 %v2944_v6  ;;  %9135 = vst [vmem:[#allocation10_spill] sm:$0xff] %v8319_v55 }
 0x2ef   : > { %v1753_v35 = vpop.f32.mrb[24].mxu0 }
 0x2f0   : > { %v8297_v21 = vmul.f32 0.35355338, %v1753_v35  ;;  %v6831_v34 = vpop.f32.mrb[25].mxu0 }
 0x2f1   : > { %v1756_v57 = vpop.f32.mrb[26].mxu0  ;;  %v8321_v34 = vpop.permute.xlu1 %4062 }
 0x2f2   : > { %v6832_v38 = vpop.f32.mrb[27].mxu0  ;;  %v2947_v2 = vsel %vm2907_vm4, %v8297_v21, -inf  ;;  %v1815_v41 = vpop.f32.mrb[32].mxu1 }
 0x2f3   : > { %2948 = vmax.xlane.f32.xlu0 %v2947_v2  ;;  %v8303_v46 = vmul.f32 0.35355338, %v1815_v41  ;;  %v6837_v60 = vpop.f32.mrb[33].mxu1  ;;  %v8323_v41 = vpop.permute.xlu0 %3822 }
 0x2f4   : > { %v1818_v26 = vpop.f32.mrb[34].mxu1 }
 0x2f5   : > { %v6838_v47 = vpop.f32.mrb[35].mxu1  ;;  %v2950_v25 = vsel %vm2907_vm4, %v8303_v46, -inf }
 0x2f6   : > { %2951 = vmax.xlane.f32.xlu1 %v2950_v25  ;;  %v8327_v47 = vpop.permute.xlu1 %4158 }
 0x2f7   : > { %v1877_v53 = vpop.f32.mrb[28].mxu0  ;;  %9136 = vst [vmem:[#allocation11_spill] sm:$0xff] %v8327_v47 }
 0x2f8   : > { %v8311_v62 = vmul.f32 0.35355338, %v1877_v53  ;;  %v6843_v49 = vpop.f32.mrb[29].mxu0 }
 0x2f9   : > { %v1880_v63 = vpop.f32.mrb[30].mxu0 }
 0x2fa   : > { %v6844_v3 = vpop.f32.mrb[31].mxu0  ;;  %v2953_v8 = vsel %vm2907_vm4, %v8311_v62, -inf  ;;  %v1939_v7 = vpop.f32.mrb[36].mxu1 }
 0x2fb   : > { %2954 = vmax.xlane.f32.xlu0 %v2953_v8  ;;  %v6849_v13 = vpop.f32.mrb[37].mxu1  ;;  %v8331_v8 = vpop.permute.xlu0 %4014 }
 0x2fc   : > { %v1942_v27 = vpop.f32.mrb[38].mxu1 }
 0x2fd   : > { %v6850_v40 = vpop.f32.mrb[39].mxu1  ;;  %v8333_v27 = vpop.permute.xlu1 %4254 }
 0x2fe   : > { %9137 = vst [vmem:[#allocation12_spill] sm:$0xff] %v8333_v27 }
 0x2ff   : > { %v2001_v44 = vpop.f32.mrb[32].mxu0 }
 0x300   : > { %v6855_v51 = vpop.f32.mrb[33].mxu0 }
 0x301   : > { %v2004_v5 = vpop.f32.mrb[34].mxu0 }
 0x302   : > { %v6856_v6 = vpop.f32.mrb[35].mxu0  ;;  %v2063_v35 = vpop.f32.mrb[40].mxu1 }
 0x303   : > { %v6861_v57 = vpop.f32.mrb[41].mxu1 }
 0x304   : > { %v2066_v38 = vpop.f32.mrb[42].mxu1  ;;  %v8337_v57 = vpop.permute.xlu0 %4206 }
 0x305   : > { %v6862_v2 = vpop.f32.mrb[43].mxu1  ;;  %9138 = vst [vmem:[#allocation13_spill] sm:$0xff] %v8337_v57 }
 0x307   : > { %v2125_v60 = vpop.f32.mrb[36].mxu0  ;;  %4542 = vrot.lane.b32.xlu1 %v7997_v31, %s7398_s27 }
 0x308   : > { %v6867_v26 = vpop.f32.mrb[37].mxu0 }
 0x309   : > { %v2128_v25 = vpop.f32.mrb[38].mxu0 }
 0x30a   : > { %v6868_v53 = vpop.f32.mrb[39].mxu0  ;;  %v2187_v49 = vpop.f32.mrb[44].mxu1 }
 0x30b   : > { %4590 = vrot.lane.b32.xlu1 %v8012_v42, %s7398_s27  ;;  %v6873_v63 = vpop.f32.mrb[45].mxu1  ;;  %v8339_v42 = vpop.permute.xlu1 %4350 }
 0x30c   : > { %v2190_v3 = vpop.f32.mrb[46].mxu1  ;;  %9139 = vst [vmem:[#allocation14_spill] sm:$0xff] %v8339_v42  ;;  %v8341_v63 = vpop.permute.xlu0 %4398 }
 0x30d   : > { %v6874_v13 = vpop.f32.mrb[47].mxu1  ;;  %9140 = vst [vmem:[#allocation15_spill] sm:$0xff] %v8341_v63 }
 0x30f   : > { %v2249_v40 = vpop.f32.mrb[40].mxu0 }
 0x310   : > { %v6879_v51 = vpop.f32.mrb[41].mxu0 }
 0x311   : > { %v2252_v5 = vpop.f32.mrb[42].mxu0  ;;  %4494 = vrot.lane.b32.xlu0 %v7982_v10, %s7398_s27  ;;  %v8343_v51 = vpop.permute.xlu1 %4446 }
 0x312   : > { %v6880_v31 = vpop.f32.mrb[43].mxu0  ;;  %v2311_v6 = vpop.f32.mrb[48].mxu1  ;;  %9141 = vst [vmem:[#allocation16_spill] sm:$0xff] %v8343_v51  ;;  %v8353_v51 = vmul.f32 0.35355338, %v2063_v35 }
 0x313   : > { %v6885_v38 = vpop.f32.mrb[49].mxu1  ;;  %v2910_v5 = vpop.xlane.xlu0 %2909 }
 0x314   : > { %v2314_v2 = vpop.f32.mrb[50].mxu1  ;;  %v3004_v10 = vsub.f32 %v8177_v23, %v2910_v5 }
 0x315   : > { %v6886_v26 = vpop.f32.mrb[51].mxu1  ;;  %v2913_v9 = vpop.xlane.xlu1 %2912 }
 0x316   : > { %v3005_v22 = vsub.f32 %v8181_v48, %v2913_v9  ;;  %v3036_v38 = vmul.f32 1.442695, %v3004_v10 }
 0x317   : > { %v2373_v25 = vpop.f32.mrb[44].mxu0  ;;  %v2916_v31 = vpop.xlane.xlu0 %2915 }
 0x318   : > { %v6891_v53 = vpop.f32.mrb[45].mxu0  ;;  %v3038_v2 = vmul.f32 1.442695, %v3005_v22  ;;  %7222 = vpow2.f32 %v3036_v38  ;;  %v3006_v26 = vsub.f32 %v8186_v11, %v2916_v31  ;;  %v8357_v22 = vmul.f32 0.35355338, %v2125_v60 }
 0x319   : > { %v2376_v3 = vpop.f32.mrb[46].mxu0  ;;  %v8348_v53 = vmul.f32 0.35355338, %v1939_v7  ;;  %v2922_v5 = vpop.xlane.xlu1 %2921  ;;  %v2962_v7 = vsel %vm2907_vm4, %v8353_v51, -inf  ;;  %v8371_v31 = vmul.f32 0.35355338, %v2187_v49 }
 0x31a   : > { %v6892_v13 = vpop.f32.mrb[47].mxu0  ;;  %7224 = vpow2.f32 %v3038_v2  ;;  %v3040_v43 = vmul.f32 1.442695, %v3006_v26  ;;  %v2965_v35 = vsel %vm2907_vm4, %v8357_v22, -inf }
 0x31b   : > { %v2919_v28 = vpop.xlane.xlu0 %2918  ;;  %v8351_v13 = vmul.f32 0.35355338, %v2001_v44  ;;  %v2956_v9 = vsel %vm2907_vm4, %v8348_v53, -inf  ;;  %v2968_v2 = vsel %vm2907_vm4, %v8371_v31, -inf }
 0x31c   : > { %v3007_v3 = vsub.f32 %v8189_v36, %v2919_v28  ;;  %7226 = vpow2.f32 %v3040_v43  ;;  %v3008_v28 = vsub.f32 %v8200_v16, %v2922_v5  ;;  %v8391_v5 = vmul.f32 0.35355338, %v2373_v25 }
 0x31d   : > { %v2959_v11 = vsel %vm2907_vm4, %v8351_v13, -inf }
 0x31e   : > { %v3042_v23 = vmul.f32 1.442695, %v3007_v3  ;;  %v3044_v10 = vmul.f32 1.442695, %v3008_v28  ;;  %v2977_v28 = vsel %vm2907_vm4, %v8391_v5, -inf }
 0x31f   : > { %v2925_v48 = vpop.xlane.xlu0 %2924 }
 0x320   : > { %7228 = vpow2.f32 %v3042_v23  ;;  %v3009_v36 = vsub.f32 %v8205_v0, %v2925_v48  ;;  %v8375_v0 = vmul.f32 0.35355338, %v2249_v40  ;;  %v8387_v40 = vmul.f32 0.35355338, %v2311_v6 }
 0x321   : > { %7230 = vpow2.f32 %v3044_v10 }
 0x322   : > { %v8365_v44 = vpop.eup %7222  ;;  %v3046_v43 = vmul.f32 1.442695, %v3009_v36  ;;  %v2971_v49 = vsel %vm2907_vm4, %v8375_v0, -inf  ;;  %v2974_v48 = vsel %vm2907_vm4, %v8387_v40, -inf  ;;  %v2928_v36 = vpop.xlane.xlu1 %2927 }
 0x323   : > { %v3100_v16 = vsel %vm2907_vm4, %v8365_v44, 0.0  ;;  %v2931_v10 = vpop.xlane.xlu0 %2930 }
 0x324   : > { %v8369_v60 = vpop.eup %7224  ;;  %7232 = vpow2.f32 %v3046_v43 }
 0x325   : > { %v3103_v38 = vsel %vm2907_vm4, %v8369_v60, 0.0 }
 0x326   : > { %v8381_v26 = vpop.eup %7226 }
 0x327   : > { %v3106_v23 = vsel %vm2907_vm4, %v8381_v26, 0.0 }
 0x32a   : > { %v8385_v3 = vpop.eup %7228 }
 0x32f   : > { %2957 = vmax.xlane.f32.xlu1 %v2956_v9  ;;  %v3109_v9 = vsel %vm2907_vm4, %v8385_v3, 0.0 }
 0x330   : > { %2960 = vmax.xlane.f32.xlu0 %v2959_v11  ;;  %v8397_v11 = vpop.eup %7230 }
 0x331   : > { %v8401_v6 = vpop.eup %7232  ;;  %v3112_v25 = vsel %vm2907_vm4, %v8397_v11, 0.0 }
 0x333   : > { %2963 = vmax.xlane.f32.xlu1 %v2962_v7  ;;  %v3010_v7 = vsub.f32 %v8222_v17, %v2928_v36 }
 0x334   : > { %2966 = vmax.xlane.f32.xlu0 %v2965_v35  ;;  %v3115_v35 = vsel %vm2907_vm4, %v8401_v6, 0.0 }
 0x335   : > { %v3048_v43 = vmul.f32 1.442695, %v3010_v7 }
 0x337   : > { %3101 = vadd.xlane.f32.xlu1 %v3100_v16  ;;  %v3011_v16 = vsub.f32 %v8225_v39, %v2931_v10  ;;  %7234 = vpow2.f32 %v3048_v43 }
 0x338   : > { %3104 = vadd.xlane.f32.xlu0 %v3103_v38 }
 0x339   : > { %v3050_v38 = vmul.f32 1.442695, %v3011_v16 }
 0x33b   : > { %2969 = vmax.xlane.f32.xlu1 %v2968_v2  ;;  %7236 = vpow2.f32 %v3050_v38 }
 0x33c   : > { %2972 = vmax.xlane.f32.xlu0 %v2971_v49 }
 0x33f   : > { %3107 = vadd.xlane.f32.xlu1 %v3106_v23 }
 0x340   : > { %3110 = vadd.xlane.f32.xlu0 %v3109_v9 }
 0x343   : > { %2975 = vmax.xlane.f32.xlu1 %v2974_v48 }
 0x344   : > { %2978 = vmax.xlane.f32.xlu0 %v2977_v28  ;;  %v8413_v28 = vpop.eup %7234 }
 0x345   : > { %v3118_v43 = vsel %vm2907_vm4, %v8413_v28, 0.0  ;;  %v8421_v16 = vpop.eup %7236 }
 0x347   : > { %3113 = vadd.xlane.f32.xlu1 %v3112_v25 }
 0x348   : > { %3116 = vadd.xlane.f32.xlu0 %v3115_v35 }
 0x355   : > { %v2435_v2 = vpop.f32.mrb[52].mxu1 }
 0x356   : > { %v8409_v49 = vmul.f32 0.35355338, %v2435_v2  ;;  %v6897_v23 = vpop.f32.mrb[53].mxu1 }
 0x357   : > { %v2438_v9 = vpop.f32.mrb[54].mxu1 }
 0x358   : > { %v6898_v48 = vpop.f32.mrb[55].mxu1  ;;  %v2980_v17 = vsel %vm2907_vm4, %v8409_v49, -inf }
 0x359   : > { %v2497_v36 = vpop.f32.mrb[48].mxu0  ;;  %2981 = vmax.xlane.f32.xlu1 %v2980_v17  ;;  %v3121_v17 = vsel %vm2907_vm4, %v8421_v16, 0.0 }
 0x35a   : > { %v8415_v25 = vmul.f32 0.35355338, %v2497_v36  ;;  %v6903_v7 = vpop.f32.mrb[49].mxu0 }
 0x35b   : > { %v2500_v39 = vpop.f32.mrb[50].mxu0 }
 0x35c   : > { %v6904_v35 = vpop.f32.mrb[51].mxu0  ;;  %v2983_v10 = vsel %vm2907_vm4, %v8415_v25, -inf }
 0x35d   : > { %2984 = vmax.xlane.f32.xlu0 %v2983_v10  ;;  %3119 = vadd.xlane.f32.xlu1 %v3118_v43  ;;  %v2559_v38 = vpop.f32.mrb[56].mxu1 }
 0x35e   : > { %v8423_v2 = vmul.f32 0.35355338, %v2559_v38  ;;  %v6909_v23 = vpop.f32.mrb[57].mxu1 }
 0x35f   : > { %v2562_v9 = vpop.f32.mrb[58].mxu1 }
 0x360   : > { %v6910_v48 = vpop.f32.mrb[59].mxu1  ;;  %v2986_v36 = vsel %vm2907_vm4, %v8423_v2, -inf }
 0x361   : > { %v2621_v7 = vpop.f32.mrb[52].mxu0  ;;  %3122 = vadd.xlane.f32.xlu0 %v3121_v17  ;;  %2987 = vmax.xlane.f32.xlu1 %v2986_v36 }
 0x362   : > { %v8429_v39 = vmul.f32 0.35355338, %v2621_v7  ;;  %v6915_v35 = vpop.f32.mrb[53].mxu0 }
 0x363   : > { %v2624_v10 = vpop.f32.mrb[54].mxu0 }
 0x364   : > { %v6916_v43 = vpop.f32.mrb[55].mxu0  ;;  %v2989_v38 = vsel %vm2907_vm4, %v8429_v39, -inf }
 0x365   : > { %2990 = vmax.xlane.f32.xlu0 %v2989_v38  ;;  %v2683_v23 = vpop.f32.mrb[60].mxu1 }
 0x366   : > { %v8433_v9 = vmul.f32 0.35355338, %v2683_v23  ;;  %v6921_v48 = vpop.f32.mrb[61].mxu1 }
 0x367   : > { %v2686_v63 = vpop.f32.mrb[62].mxu1 }
 0x368   : > { %v6922_v42 = vpop.f32.mrb[63].mxu1  ;;  %v2992_v55 = vsel %vm2907_vm4, %v8433_v9, -inf }
 0x369   : > { %2993 = vmax.xlane.f32.xlu1 %v2992_v55 }
 0x36a   : > { %v2745_v17 = vpop.f32.mrb[56].mxu0 }
 0x36b   : > { %v8437_v36 = vmul.f32 0.35355338, %v2745_v17  ;;  %v6927_v7 = vpop.f32.mrb[57].mxu0  ;;  %v2934_v35 = vpop.xlane.xlu1 %2933 }
 0x36c   : > { %v2748_v10 = vpop.f32.mrb[58].mxu0  ;;  %v3012_v43 = vsub.f32 %v8263_v45, %v2934_v35 }
 0x36d   : > { %v6928_v27 = vpop.f32.mrb[59].mxu0  ;;  %v2995_v38 = vsel %vm2907_vm4, %v8437_v36, -inf  ;;  %v2807_v23 = vpop.f32.mrb[64].mxu1 }
 0x36e   : > { %v3052_v48 = vmul.f32 1.442695, %v3012_v43  ;;  %2996 = vmax.xlane.f32.xlu0 %v2995_v38  ;;  %v8442_v42 = vmul.f32 0.35355338, %v2807_v23  ;;  %v6933_v63 = vpop.f32.mrb[65].mxu1 }
 0x36f   : > { %v2937_v57 = vpop.xlane.xlu0 %2936  ;;  %v2810_v55 = vpop.f32.mrb[66].mxu1 }
 0x370   : > { %7238 = vpow2.f32 %v3052_v48  ;;  %v3013_v17 = vsub.f32 %v8271_v18, %v2937_v57  ;;  %v6934_v7 = vpop.f32.mrb[67].mxu1  ;;  %v2998_v10 = vsel %vm2907_vm4, %v8442_v42, -inf }
 0x371   : > { %2999 = vmax.xlane.f32.xlu1 %v2998_v10 }
 0x372   : > { %v3054_v45 = vmul.f32 1.442695, %v3013_v17  ;;  %v2869_v27 = vpop.f32.mrb[60].mxu0 }
 0x373   : > { %v8447_v35 = vmul.f32 0.35355338, %v2869_v27  ;;  %v6939_v47 = vpop.f32.mrb[61].mxu0  ;;  %v2940_v43 = vpop.xlane.xlu1 %2939 }
 0x374   : > { %7240 = vpow2.f32 %v3054_v45  ;;  %v2872_v38 = vpop.f32.mrb[62].mxu0  ;;  %v3014_v23 = vsub.f32 %v8277_v20, %v2940_v43 }
 0x375   : > { %v6940_v63 = vpop.f32.mrb[63].mxu0  ;;  %v3001_v48 = vsel %vm2907_vm4, %v8447_v35, -inf }
 0x376   : > { %v3056_v18 = vmul.f32 1.442695, %v3014_v23  ;;  %3002 = vmax.xlane.f32.xlu0 %v3001_v48 }
 0x377   : > { %v2943_v57 = vpop.xlane.xlu0 %2942 }
 0x378   : > { %7242 = vpow2.f32 %v3056_v18  ;;  %v3015_v55 = vsub.f32 %v8283_v1, %v2943_v57 }
 0x37a   : > { %v8453_v17 = vpop.eup %7238  ;;  %v3058_v7 = vmul.f32 1.442695, %v3015_v55 }
 0x37b   : > { %v2946_v10 = vpop.xlane.xlu1 %2945  ;;  %v3124_v47 = vsel %vm2907_vm4, %v8453_v17, 0.0 }
 0x37c   : > { %7244 = vpow2.f32 %v3058_v7  ;;  %v3016_v20 = vsub.f32 %v8291_v50, %v2946_v10  ;;  %3125 = vadd.xlane.f32.xlu1 %v3124_v47 }
 0x37e   : > { %v8458_v45 = vpop.eup %7240  ;;  %v3060_v27 = vmul.f32 1.442695, %v3016_v20 }
 0x37f   : > { %v3127_v43 = vsel %vm2907_vm4, %v8458_v45, 0.0 }
 0x380   : > { %7246 = vpow2.f32 %v3060_v27  ;;  %v2949_v38 = vpop.xlane.xlu0 %2948  ;;  %3128 = vadd.xlane.f32.xlu0 %v3127_v43 }
 0x381   : > { %v3017_v1 = vsub.f32 %v8297_v21, %v2949_v38 }
 0x382   : > { %v8463_v23 = vpop.eup %7242 }
 0x383   : > { %v3062_v63 = vmul.f32 1.442695, %v3017_v1  ;;  %v2952_v48 = vpop.xlane.xlu1 %2951  ;;  %v3130_v18 = vsel %vm2907_vm4, %v8463_v23, 0.0 }
 0x384   : > { %v3018_v50 = vsub.f32 %v8303_v46, %v2952_v48  ;;  %3131 = vadd.xlane.f32.xlu1 %v3130_v18 }
 0x385   : > { %7248 = vpow2.f32 %v3062_v63 }
 0x386   : > { %v8468_v57 = vpop.eup %7244  ;;  %v3064_v55 = vmul.f32 1.442695, %v3018_v50 }
 0x387   : > { %v3133_v7 = vsel %vm2907_vm4, %v8468_v57, 0.0  ;;  %v8489_v48 = vpop.permute.xlu1 %4542 }
 0x388   : > { %7250 = vpow2.f32 %v3064_v55  ;;  %v2955_v10 = vpop.xlane.xlu0 %2954  ;;  %3134 = vadd.xlane.f32.xlu0 %v3133_v7  ;;  %9142 = vst [vmem:[#allocation17_spill] sm:$0xff] %v8489_v48 }
 0x389   : > { %v3019_v21 = vsub.f32 %v8311_v62, %v2955_v10 }
 0x38a   : > { %v8473_v47 = vpop.eup %7246 }
 0x38b   : > { %v3066_v20 = vmul.f32 1.442695, %v3019_v21  ;;  %v3136_v27 = vsel %vm2907_vm4, %v8473_v47, 0.0  ;;  %v8491_v18 = vpop.permute.xlu1 %4590 }
 0x38c   : > { %3137 = vadd.xlane.f32.xlu1 %v3136_v27  ;;  %9143 = vst [vmem:[#allocation18_spill] sm:$0xff] %v8491_v18  ;;  %v8493_v50 = vpop.permute.xlu0 %4494 }
 0x38d   : > { %7252 = vpow2.f32 %v3066_v20  ;;  %9144 = vst [vmem:[#allocation19_spill] sm:$0xff] %v8493_v50 }
 0x38f   : > { %v8477_v46 = vpop.eup %7248 }
 0x390   : > { %v3139_v43 = vsel %vm2907_vm4, %v8477_v46, 0.0 }
 0x391   : > { %3140 = vadd.xlane.f32.xlu0 %v3139_v43 }
 0x392   : > { %v8481_v38 = vpop.eup %7250 }
 0x393   : > { %v3142_v1 = vsel %vm2907_vm4, %v8481_v38, 0.0 }
 0x394   : > { %3143 = vadd.xlane.f32.xlu1 %v3142_v1 }
 0x397   : > { %v8485_v62 = vpop.eup %7252 }
 0x398   : > { %v3145_v63 = vsel %vm2907_vm4, %v8485_v62, 0.0 }
 0x399   : > { %3146 = vadd.xlane.f32.xlu0 %v3145_v63 }
 0x3bc   : > { %v2958_v55 = vpop.xlane.xlu1 %2957 }
 0x3bd   : > { %v2961_v7 = vpop.xlane.xlu0 %2960  ;;  %v3020_v10 = vsub.f32 %v8348_v53, %v2958_v55 }
 0x3be   : > { %v3021_v21 = vsub.f32 %v8351_v13, %v2961_v7 }
 0x3bf   : > { %v3068_v20 = vmul.f32 1.442695, %v3020_v10 }
 0x3c0   : > { %v3070_v27 = vmul.f32 1.442695, %v3021_v21  ;;  %v2964_v43 = vpop.xlane.xlu1 %2963 }
 0x3c1   : > { %7254 = vpow2.f32 %v3068_v20  ;;  %v2967_v1 = vpop.xlane.xlu0 %2966  ;;  %v3022_v33 = vsub.f32 %v8353_v51, %v2964_v43 }
 0x3c2   : > { %7256 = vpow2.f32 %v3070_v27  ;;  %v3023_v63 = vsub.f32 %v8357_v22, %v2967_v1 }
 0x3c3   : > { %v3072_v48 = vmul.f32 1.442695, %v3022_v33 }
 0x3c4   : > { %v3074_v18 = vmul.f32 1.442695, %v3023_v63  ;;  %v3102_v52 = vpop.xlane.xlu1 %3101 }
 0x3c5   : > { %7258 = vpow2.f32 %v3072_v48  ;;  %v3105_v50 = vpop.xlane.xlu0 %3104 }
 0x3c6   : > { %7260 = vpow2.f32 %v3074_v18 }
 0x3c7   : > { %7262 = vrcp.f32 %v3105_v50 }
 0x3c8   : > { %7264 = vrcp.f32 %v3102_v52  ;;  %v2970_v53 = vpop.xlane.xlu1 %2969 }
 0x3c9   : > { %v2973_v13 = vpop.xlane.xlu0 %2972  ;;  %v3024_v55 = vsub.f32 %v8371_v31, %v2970_v53 }
 0x3ca   : > { %v3025_v7 = vsub.f32 %v8375_v0, %v2973_v13 }
 0x3cb   : > { %v8501_v10 = vpop.eup %7254  ;;  %v3076_v51 = vmul.f32 1.442695, %v3024_v55 }
 0x3cc   : > { %v8503_v21 = vpop.eup %7256  ;;  %v3078_v22 = vmul.f32 1.442695, %v3025_v7  ;;  %v3108_v33 = vpop.xlane.xlu1 %3107  ;;  %v3148_v48 = vsel %vm2907_vm4, %v8501_v10, 0.0 }
 0x3cd   : > { %7266 = vpow2.f32 %v3076_v51  ;;  %v3111_v18 = vpop.xlane.xlu0 %3110  ;;  %v3151_v52 = vsel %vm2907_vm4, %v8503_v21, 0.0  ;;  %3149 = vadd.xlane.f32.xlu1 %v3148_v48 }
 0x3ce   : > { %7268 = vpow2.f32 %v3078_v22  ;;  %3152 = vadd.xlane.f32.xlu0 %v3151_v52  ;;  %v3444_v52 = vsel %vm3298_vm5, %v8265_v24, 0  ;;  %v9145_v24 = vmov 0.0  }
 0x3cf   : > { %v8509_v31 = vpop.eup %7258  ;;  %7270 = vrcp.f32 %v3111_v18 }
 0x3d0   : > { %v8511_v0 = vpop.eup %7260  ;;  %7272 = vrcp.f32 %v3108_v33  ;;  %v2976_v50 = vpop.xlane.xlu1 %2975  ;;  %v3154_v20 = vsel %vm2907_vm4, %v8509_v31, 0.0 }
 0x3d1   : > { %v7263_v27 = vpop.eup %7262  ;;  %v2979_v43 = vpop.xlane.xlu0 %2978  ;;  %v3026_v1 = vsub.f32 %v8387_v40, %v2976_v50  ;;  %v3157_v63 = vsel %vm2907_vm4, %v8511_v0, 0.0  ;;  %3155 = vadd.xlane.f32.xlu1 %v3154_v20 }
 0x3d2   : > { %v7265_v53 = vpop.eup %7264  ;;  %v3229_v13 = vmul.f32 %v7263_v27, %v8369_v60  ;;  %v3027_v55 = vsub.f32 %v8391_v5, %v2979_v43  ;;  %3158 = vadd.xlane.f32.xlu0 %v3157_v63  ;;  %v3396_v5 = vsel %vm3298_vm5, %v8261_v54, 0 }
 0x3d3   : > { %v3228_v7 = vmul.f32 %v7265_v53, %v8365_v44  ;;  %v3080_v51 = vmul.f32 1.442695, %v3026_v1 }
 0x3d4   : > { %v3082_v22 = vmul.f32 1.442695, %v3027_v55  ;;  %v3261_v33 = vpack.c.bf16 %v3229_v13, %v3229_v13  ;;  %v3114_v40 = vpop.xlane.xlu1 %3113  ;;  %v3540_v13 = vsel %vm3298_vm5, %v8275_v30, 0 }
 0x3d5   : > { %7274 = vpow2.f32 %v3080_v51  ;;  %v3117_v48 = vpop.xlane.xlu0 %3116  ;;  %v3260_v18 = vpack.c.bf16 %v3228_v7, %v3228_v7  ;;  %v3492_v7 = vsel %vm3298_vm5, %v8269_v58, 0 }
 0x3d6   : > { %7276 = vpow2.f32 %v3082_v22  ;;  %6950 = vmatmul.mubr.msk.bf16.vlgmr.msra.gmra.mrb[64].mxu0 %vm3294_vm6, %v3261_v33 }
 0x3d7   : > { %v8524_v60 = vpop.eup %7266  ;;  %6960 = vmatpush3.bf16.msra.mxu0 %v3444_v52  ;;  %7278 = vrcp.f32 %v3117_v48  ;;  %6944 = vmatmul.mubr.msk.bf16.vlgmr.msra.gmra.mrb[68].mxu1 %vm3294_vm6, %v3260_v18 }
 0x3d8   : > { %v8529_v44 = vpop.eup %7268  ;;  %6954 = vmatpush3.bf16.msra.mxu1 %v3396_v5  ;;  %7280 = vrcp.f32 %v3114_v40  ;;  %v3160_v50 = vsel %vm2907_vm4, %v8524_v60, 0.0  ;;  %6955 = vmatprep.mubr.msk.bf16.mxu1 %vm7391_vm1, %v9145_v24  ;;  %v3636_v40 = vsel %vm3298_vm5, %v8285_v32, 0  ;;  %v3588_v5 = vsel %vm3298_vm5, %v8279_v4, 0 }
 0x3d9   : > { %v7271_v20 = vpop.eup %7270  ;;  %v3163_v27 = vsel %vm2907_vm4, %v8529_v44, 0.0  ;;  %3161 = vadd.xlane.f32.xlu1 %v3160_v50  ;;  %6961 = vmatprep.mubr.msk.bf16.mxu0 %vm7391_vm1, %v9145_v24 }
 0x3da   : > { %v7273_v54 = vpop.eup %7272  ;;  %v3231_v43 = vmul.f32 %v7271_v20, %v8385_v3  ;;  %3164 = vadd.xlane.f32.xlu0 %v3163_v27  ;;  %6965 = vmatprep.subr.bf16.mxu1 %v9145_v24 }
 0x3db   : > { %v3230_v1 = vmul.f32 %v7273_v54, %v8381_v26  ;;  %6971 = vmatprep.subr.bf16.mxu0 %v9145_v24 }
 0x3dc   : > { %v3263_v63 = vpack.c.bf16 %v3231_v43, %v3231_v43 }
 0x3dd   : > { %v3262_v53 = vpack.c.bf16 %v3230_v1, %v3230_v1 }
 0x3de   : > { %6962 = vmatmul.mubr.msk.bf16.vlgmr.msra.gmra.mrb[68].mxu0 %vm3294_vm6, %v3263_v63 }
 0x3df   : > { %v8546_v55 = vpop.eup %7274  ;;  %6956 = vmatmul.mubr.msk.bf16.vlgmr.msra.gmra.mrb[72].mxu1 %vm3294_vm6, %v3262_v53  ;;  %6972 = vmatpush3.bf16.msra.mxu0 %v3540_v13 }
 0x3e0   : > { %v8551_v3 = vpop.eup %7276  ;;  %6966 = vmatpush3.bf16.msra.mxu1 %v3492_v7  ;;  %v3166_v26 = vsel %vm2907_vm4, %v8546_v55, 0.0  ;;  %6967 = vmatprep.mubr.msk.bf16.mxu1 %vm7391_vm1, %v9145_v24 }
 0x3e1   : > { %v7279_v30 = vpop.eup %7278  ;;  %v3169_v51 = vsel %vm2907_vm4, %v8551_v3, 0.0  ;;  %3167 = vadd.xlane.f32.xlu1 %v3166_v26  ;;  %6973 = vmatprep.mubr.msk.bf16.mxu0 %vm7391_vm1, %v9145_v24 }
 0x3e2   : > { %v7281_v58 = vpop.eup %7280  ;;  %v3233_v22 = vmul.f32 %v7279_v30, %v8401_v6  ;;  %3170 = vadd.xlane.f32.xlu0 %v3169_v51  ;;  %6977 = vmatprep.subr.bf16.mxu1 %v9145_v24 }
 0x3e3   : > { %v3232_v33 = vmul.f32 %v7281_v58, %v8397_v11  ;;  %6983 = vmatprep.subr.bf16.mxu0 %v9145_v24 }
 0x3e4   : > { %v3265_v48 = vpack.c.bf16 %v3233_v22, %v3233_v22 }
 0x3e5   : > { %v3264_v18 = vpack.c.bf16 %v3232_v33, %v3232_v33 }
 0x3e6   : > { %6974 = vmatmul.mubr.msk.bf16.vlgmr.msra.gmra.mrb[72].mxu0 %vm3294_vm6, %v3265_v48  ;;  %v2982_v52 = vpop.xlane.xlu1 %2981 }
 0x3e7   : > { %6968 = vmatmul.mubr.msk.bf16.vlgmr.msra.gmra.mrb[76].mxu1 %vm3294_vm6, %v3264_v18  ;;  %6984 = vmatpush3.bf16.msra.mxu0 %v3636_v40  ;;  %v3028_v6 = vsub.f32 %v8409_v49, %v2982_v52 }
 0x3e8   : > { %6978 = vmatpush3.bf16.msra.mxu1 %v3588_v5  ;;  %6979 = vmatprep.mubr.msk.bf16.mxu1 %vm7391_vm1, %v9145_v24 }
 0x3e9   : > { %v3084_v11 = vmul.f32 1.442695, %v3028_v6  ;;  %6989 = vmatprep.subr.bf16.mxu1 %v9145_v24  ;;  %6985 = vmatprep.mubr.msk.bf16.mxu0 %vm7391_vm1, %v9145_v24 }
 0x3ea   : > { %v2985_v32 = vpop.xlane.xlu0 %2984  ;;  %v3120_v50 = vpop.xlane.xlu1 %3119  ;;  %6995 = vmatprep.subr.bf16.mxu0 %v9145_v24 }
 0x3eb   : > { %7282 = vpow2.f32 %v3084_v11  ;;  %v3029_v4 = vsub.f32 %v8415_v25, %v2985_v32 }
 0x3ec   : > { %7284 = vrcp.f32 %v3120_v50 }
 0x3ed   : > { %v3086_v20 = vmul.f32 1.442695, %v3029_v4 }
 0x3ee   : > { %v3123_v49 = vpop.xlane.xlu0 %3122  ;;  %v2988_v27 = vpop.xlane.xlu1 %2987 }
 0x3ef   : > { %7286 = vpow2.f32 %v3086_v20  ;;  %v3030_v54 = vsub.f32 %v8423_v2, %v2988_v27 }
 0x3f0   : > { %7288 = vrcp.f32 %v3123_v49 }
 0x3f1   : > { %v3088_v43 = vmul.f32 1.442695, %v3030_v54  ;;  %v3780_v54 = vsel %vm3298_vm5, %v8299_v59, 0  ;;  %v3828_v59 = vsel %vm3298_vm5, %v8323_v41, 0 }
 0x3f2   : > { %v2991_v1 = vpop.xlane.xlu0 %2990 }
 0x3f3   : > { %7290 = vpow2.f32 %v3088_v43  ;;  %v3031_v63 = vsub.f32 %v8429_v39, %v2991_v1  ;;  %v3684_v39 = vsel %vm3298_vm5, %v8289_v15, 0  ;;  %v3732_v15 = vsel %vm3298_vm5, %v8295_v56, 0 }
 0x3f5   : > { %v8581_v53 = vpop.eup %7282  ;;  %v3090_v13 = vmul.f32 1.442695, %v3031_v63 }
 0x3f6   : > { %v7285_v7 = vpop.eup %7284  ;;  %v3172_v25 = vsel %vm2907_vm4, %v8581_v53, 0.0  ;;  %v2994_v18 = vpop.xlane.xlu1 %2993 }
 0x3f7   : > { %v3234_v26 = vmul.f32 %v7285_v7, %v8413_v28  ;;  %7292 = vpow2.f32 %v3090_v13  ;;  %3173 = vadd.xlane.f32.xlu1 %v3172_v25  ;;  %v3876_v25 = vsel %vm3298_vm5, %v8309_v29, 0  ;;  %v3924_v29 = vsel %vm3298_vm5, %v8305_v14, 0 }
 0x3f9   : > { %v8586_v30 = vpop.eup %7286  ;;  %v3266_v2 = vpack.c.bf16 %v3234_v26, %v3234_v26 }
 0x3fa   : > { %v7289_v51 = vpop.eup %7288  ;;  %v3175_v58 = vsel %vm2907_vm4, %v8586_v30, 0.0 }
 0x3fb   : > { %v3235_v22 = vmul.f32 %v7289_v51, %v8421_v16  ;;  %6980 = vmatmul.mubr.msk.bf16.vlgmr.msra.gmra.mrb[80].mxu1 %vm3294_vm6, %v3266_v2  ;;  %3176 = vadd.xlane.f32.xlu0 %v3175_v58  ;;  %v2997_v52 = vpop.xlane.xlu0 %2996 }
 0x3fc   : > { %6990 = vmatpush3.bf16.msra.mxu1 %v3684_v39  ;;  %6991 = vmatprep.mubr.msk.bf16.mxu1 %vm7391_vm1, %v9145_v24  ;;  %v3033_v41 = vsub.f32 %v8437_v36, %v2997_v52 }
 0x3fd   : > { %v8596_v28 = vpop.eup %7290  ;;  %v3267_v33 = vpack.c.bf16 %v3235_v22, %v3235_v22  ;;  %7001 = vmatprep.subr.bf16.mxu1 %v9145_v24 }
 0x3fe   : > { %v3178_v48 = vsel %vm2907_vm4, %v8596_v28, 0.0  ;;  %v3000_v5 = vpop.xlane.xlu1 %2999  ;;  %v3094_v36 = vmul.f32 1.442695, %v3033_v41 }
 0x3ff   : > { %6986 = vmatmul.mubr.msk.bf16.vlgmr.msra.gmra.mrb[76].mxu0 %vm3294_vm6, %v3267_v33  ;;  %3179 = vadd.xlane.f32.xlu1 %v3178_v48  ;;  %v3034_v2 = vsub.f32 %v8442_v42, %v3000_v5 }
 0x400   : > { %6996 = vmatpush3.bf16.msra.mxu0 %v3732_v15  ;;  %6997 = vmatprep.mubr.msk.bf16.mxu0 %vm7391_vm1, %v9145_v24 }
 0x401   : > { %v8606_v16 = vpop.eup %7292  ;;  %7007 = vmatprep.subr.bf16.mxu0 %v9145_v24  ;;  %v3096_v39 = vmul.f32 1.442695, %v3034_v2 }
 0x402   : > { %v3181_v40 = vsel %vm2907_vm4, %v8606_v16, 0.0 }
 0x403   : > { %3182 = vadd.xlane.f32.xlu0 %v3181_v40  ;;  %v8611_v6 = vpop.xlane.xlu0 %3002 }
 0x404   : > { %v3035_v42 = vsub.f32 %v8447_v35, %v8611_v6  ;;  %v4068_v6 = vsel %vm3298_vm5, %v8321_v34, 0  ;;  %v4116_v34 = vsel %vm3298_vm5, %v8315_v12, 0 }
 0x406   : > { %v3098_v48 = vmul.f32 1.442695, %v3035_v42 }
 0x409   : > { %v3126_v56 = vpop.xlane.xlu1 %3125 }
 0x40a   : > { %7294 = vrcp.f32 %v3126_v56 }
 0x40d   : > { %v3129_v11 = vpop.xlane.xlu0 %3128 }
 0x40e   : > { %7296 = vrcp.f32 %v3129_v11 }
 0x410   : > { %4686 = vrot.lane.b32.xlu1 %v8045_v19, %s7398_s27 }
 0x411   : > { %v3132_v32 = vpop.xlane.xlu1 %3131 }
 0x412   : > { %7298 = vrcp.f32 %v3132_v32 }
 0x414   : > { %v7295_v50 = vpop.eup %7294 }
 0x415   : > { %v3236_v4 = vmul.f32 %v7295_v50, %v8453_v17  ;;  %v3135_v20 = vpop.xlane.xlu0 %3134 }
 0x416   : > { %7300 = vrcp.f32 %v3135_v20  ;;  %v9146_v20 = vld [vmem:[#allocation9_spill] sm:$0xff] }
 0x417   : > { %v3268_v49 = vpack.c.bf16 %v3236_v4, %v3236_v4 }
 0x418   : > { %v7297_v27 = vpop.eup %7296 }
 0x419   : > { %v3237_v43 = vmul.f32 %v7297_v27, %v8458_v45  ;;  %4638 = vrot.lane.b32.xlu0 %v8027_v61, %s7398_s27  ;;  %6992 = vmatmul.mubr.msk.bf16.vlgmr.msra.gmra.mrb[84].mxu1 %vm3294_vm6, %v3268_v49  ;;  %v3138_v19 = vpop.xlane.xlu1 %3137  ;;  %v3032_v61 = vsub.f32 %v8433_v9, %v2994_v18  ;;  %v9147_v49 = vld [vmem:[#allocation8_spill] sm:$0xff] }
 0x41a   : > { %7002 = vmatpush3.bf16.msra.mxu1 %v3780_v54  ;;  %7302 = vrcp.f32 %v3138_v19  ;;  %7003 = vmatprep.mubr.msk.bf16.mxu1 %vm7391_vm1, %v9145_v24 }
 0x41b   : > { %v3269_v17 = vpack.c.bf16 %v3237_v43, %v3237_v43  ;;  %7013 = vmatprep.subr.bf16.mxu1 %v9145_v24  ;;  %v3092_v26 = vmul.f32 1.442695, %v3032_v61 }
 0x41c   : > { %v7299_v1 = vpop.eup %7298 }
 0x41d   : > { %v3238_v45 = vmul.f32 %v7299_v1, %v8463_v23  ;;  %6998 = vmatmul.mubr.msk.bf16.vlgmr.msra.gmra.mrb[80].mxu0 %vm3294_vm6, %v3269_v17 }
 0x41e   : > { %7008 = vmatpush3.bf16.msra.mxu0 %v3828_v59  ;;  %v3141_v63 = vpop.xlane.xlu0 %3140  ;;  %7009 = vmatprep.mubr.msk.bf16.mxu0 %vm7391_vm1, %v9145_v24 }
 0x41f   : > { %7304 = vrcp.f32 %v3141_v63  ;;  %v3270_v13 = vpack.c.bf16 %v3238_v45, %v3238_v45  ;;  %7019 = vmatprep.subr.bf16.mxu0 %v9145_v24 }
 0x420   : > { %v7301_v7 = vpop.eup %7300 }
 0x421   : > { %v3239_v23 = vmul.f32 %v7301_v7, %v8468_v57  ;;  %7004 = vmatmul.mubr.msk.bf16.vlgmr.msra.gmra.mrb[88].mxu1 %vm3294_vm6, %v3270_v13  ;;  %v3144_v9 = vpop.xlane.xlu1 %3143 }
 0x422   : > { %7014 = vmatpush3.bf16.msra.mxu1 %v3876_v25  ;;  %7306 = vrcp.f32 %v3144_v9  ;;  %7015 = vmatprep.mubr.msk.bf16.mxu1 %vm7391_vm1, %v9145_v24 }
 0x423   : > { %v3271_v51 = vpack.c.bf16 %v3239_v23, %v3239_v23  ;;  %7025 = vmatprep.subr.bf16.mxu1 %v9145_v24  ;;  %7308 = vpow2.f32 %v3092_v26  ;;  %v9148_v23 = vld [vmem:[#allocation11_spill] sm:$0xff]  ;;  %v9149_v26 = vld [vmem:[#allocation13_spill] sm:$0xff] }
 0x424   : > { %v7303_v58 = vpop.eup %7302  ;;  %v4164_v9 = vsel %vm3298_vm5, %v9148_v23, 0  ;;  %v4212_v2 = vsel %vm3298_vm5, %v9149_v26, 0 }
 0x425   : > { %v3240_v57 = vmul.f32 %v7303_v58, %v8473_v47  ;;  %7010 = vmatmul.mubr.msk.bf16.vlgmr.msra.gmra.mrb[84].mxu0 %vm3294_vm6, %v3271_v51  ;;  %v3972_v47 = vsel %vm3298_vm5, %v8317_v37, 0  ;;  %v4020_v37 = vsel %vm3298_vm5, %v8331_v8, 0 }
 0x426   : > { %7020 = vmatpush3.bf16.msra.mxu0 %v3924_v29  ;;  %v3147_v22 = vpop.xlane.xlu0 %3146  ;;  %7021 = vmatprep.mubr.msk.bf16.mxu0 %vm7391_vm1, %v9145_v24 }
 0x427   : > { %7310 = vrcp.f32 %v3147_v22  ;;  %v3272_v33 = vpack.c.bf16 %v3240_v57, %v3240_v57  ;;  %7031 = vmatprep.subr.bf16.mxu0 %v9145_v24 }
 0x428   : > { %7312 = vpow2.f32 %v3094_v36 }
 0x429   : > { %v7305_v14 = vpop.eup %7304  ;;  %7016 = vmatmul.mubr.msk.bf16.vlgmr.msra.gmra.mrb[92].mxu1 %vm3294_vm6, %v3272_v33  ;;  %7314 = vpow2.f32 %v3096_v39  ;;  %v9150_v39 = vld [vmem:[#allocation12_spill] sm:$0xff] }
 0x42a   : > { %v3241_v35 = vmul.f32 %v7305_v14, %v8477_v46  ;;  %7026 = vmatpush3.bf16.msra.mxu1 %v3972_v47  ;;  %7027 = vmatprep.mubr.msk.bf16.mxu1 %vm7391_vm1, %v9145_v24  ;;  %7316 = vpow2.f32 %v3098_v48  ;;  %v4260_v42 = vsel %vm3298_vm5, %v9150_v39, 0 }
 0x42b   : > { %7037 = vmatprep.subr.bf16.mxu1 %v9145_v24 }
 0x42c   : > { %v7307_v15 = vpop.eup %7306  ;;  %v3273_v18 = vpack.c.bf16 %v3241_v35, %v3241_v35 }
 0x42d   : > { %v3242_v40 = vmul.f32 %v7307_v15, %v8481_v38  ;;  %v8664_v46 = vpop.eup %7308 }
 0x42e   : > { %7022 = vmatmul.mubr.msk.bf16.vlgmr.msra.gmra.mrb[88].mxu0 %vm3294_vm6, %v3273_v18  ;;  %v3184_v56 = vsel %vm2907_vm4, %v8664_v46, 0.0  ;;  %v9152_v18 = vld [vmem:[#allocation14_spill] sm:$0xff] }
 0x42f   : > { %7032 = vmatpush3.bf16.msra.mxu0 %v4020_v37  ;;  %v3274_v52 = vpack.c.bf16 %v3242_v40, %v3242_v40  ;;  %7033 = vmatprep.mubr.msk.bf16.mxu0 %vm7391_vm1, %v9145_v24  ;;  %v9153_v40 = vld [vmem:[#allocation15_spill] sm:$0xff] }
 0x430   : > { %7043 = vmatprep.subr.bf16.mxu0 %v9145_v24  ;;  %v4404_v37 = vsel %vm3298_vm5, %v9153_v40, 0 }
 0x431   : > { %v7311_v5 = vpop.eup %7310  ;;  %7028 = vmatmul.mubr.msk.bf16.vlgmr.msra.gmra.mrb[96].mxu1 %vm3294_vm6, %v3274_v52 }
 0x432   : > { %v3243_v8 = vmul.f32 %v7311_v5, %v8485_v62  ;;  %7038 = vmatpush3.bf16.msra.mxu1 %v4068_v6  ;;  %7039 = vmatprep.mubr.msk.bf16.mxu1 %vm7391_vm1, %v9145_v24  ;;  %v8673_v38 = vpop.eup %7312 }
 0x433   : > { %7049 = vmatprep.subr.bf16.mxu1 %v9145_v24  ;;  %v8678_v11 = vpop.eup %7314  ;;  %v3187_v62 = vsel %vm2907_vm4, %v8673_v38, 0.0 }
 0x434   : > { %3185 = vadd.xlane.f32.xlu1 %v3184_v56  ;;  %v3275_v32 = vpack.c.bf16 %v3243_v8, %v3243_v8  ;;  %v3190_v50 = vsel %vm2907_vm4, %v8678_v11, 0.0  ;;  %v8689_v4 = vpop.eup %7316  ;;  %v9154_v8 = vld [vmem:[#allocation16_spill] sm:$0xff] }
 0x435   : > { %v3193_v12 = vsel %vm2907_vm4, %v8689_v4, 0.0  ;;  %v4452_v56 = vsel %vm3298_vm5, %v9154_v8, 0 }
 0x436   : > { %7034 = vmatmul.mubr.msk.bf16.vlgmr.msra.gmra.mrb[92].mxu0 %vm3294_vm6, %v3275_v32 }
 0x437   : > { %7044 = vmatpush3.bf16.msra.mxu0 %v4116_v34  ;;  %7045 = vmatprep.mubr.msk.bf16.mxu0 %vm7391_vm1, %v9145_v24 }
 0x438   : > { %3188 = vadd.xlane.f32.xlu0 %v3187_v62  ;;  %3191 = vadd.xlane.f32.xlu1 %v3190_v50 }
 0x439   : > { %7055 = vmatprep.subr.bf16.mxu0 %v9145_v24 }
 0x43c   : > { %3194 = vadd.xlane.f32.xlu0 %v3193_v12 }
 0x449   : > { %4782 = vrot.lane.b32.xlu1 %v9146_v20, %s7398_s27 }
 0x452   : > { %4734 = vrot.lane.b32.xlu0 %v9147_v49, %s7398_s27 }
 0x45a   : > { %v3150_v27 = vpop.xlane.xlu1 %3149 }
 0x45b   : > { %v3153_v54 = vpop.xlane.xlu0 %3152  ;;  %7318 = vrcp.f32 %v3150_v27 }
 0x45c   : > { %7320 = vrcp.f32 %v3153_v54  ;;  %v9156_v54 = vld [vmem:[#allocation17_spill] sm:$0xff] }
 0x45e   : > { %v3156_v43 = vpop.xlane.xlu1 %3155 }
 0x45f   : > { %v3159_v19 = vpop.xlane.xlu0 %3158  ;;  %7322 = vrcp.f32 %v3156_v43  ;;  %v4548_v43 = vsel %vm3298_vm5, %v9156_v54, 0 }
 0x460   : > { %7324 = vrcp.f32 %v3159_v19 }
 0x465   : > { %v7319_v17 = vpop.eup %7318 }
 0x466   : > { %v7321_v1 = vpop.eup %7320  ;;  %v3244_v59 = vmul.f32 %v7319_v17, %v8501_v10  ;;  %v3162_v45 = vpop.xlane.xlu1 %3161 }
 0x467   : > { %v3245_v61 = vmul.f32 %v7321_v1, %v8503_v21  ;;  %v3165_v63 = vpop.xlane.xlu0 %3164  ;;  %7326 = vrcp.f32 %v3162_v45 }
 0x468   : > { %7328 = vrcp.f32 %v3165_v63  ;;  %v3276_v13 = vpack.c.bf16 %v3244_v59, %v3244_v59 }
 0x469   : > { %v7323_v7 = vpop.eup %7322  ;;  %v3277_v25 = vpack.c.bf16 %v3245_v61, %v3245_v61 }
 0x46a   : > { %v7325_v41 = vpop.eup %7324  ;;  %7040 = vmatmul.mubr.msk.bf16.vlgmr.msra.gmra.mrb[100].mxu1 %vm3294_vm6, %v3276_v13  ;;  %v3246_v10 = vmul.f32 %v7323_v7, %v8509_v31 }
 0x46b   : > { %7046 = vmatmul.mubr.msk.bf16.vlgmr.msra.gmra.mrb[96].mxu0 %vm3294_vm6, %v3277_v25  ;;  %7050 = vmatpush3.bf16.msra.mxu1 %v4164_v9  ;;  %v3247_v21 = vmul.f32 %v7325_v41, %v8511_v0  ;;  %v9151_v0 = vld [vmem:[#allocation10_spill] sm:$0xff] }
 0x46c   : > { %7056 = vmatpush3.bf16.msra.mxu0 %v4212_v2  ;;  %7051 = vmatprep.mubr.msk.bf16.mxu1 %vm7391_vm1, %v9145_v24  ;;  %v3278_v29 = vpack.c.bf16 %v3246_v10, %v3246_v10  ;;  %v4308_v22 = vsel %vm3298_vm5, %v9151_v0, 0 }
 0x46d   : > { %7057 = vmatprep.mubr.msk.bf16.mxu0 %vm7391_vm1, %v9145_v24  ;;  %7061 = vmatprep.subr.bf16.mxu1 %v9145_v24  ;;  %v3279_v31 = vpack.c.bf16 %v3247_v21, %v3247_v21 }
 0x46e   : > { %v3168_v51 = vpop.xlane.xlu1 %3167  ;;  %7067 = vmatprep.subr.bf16.mxu0 %v9145_v24 }
 0x46f   : > { %v3171_v58 = vpop.xlane.xlu0 %3170  ;;  %7330 = vrcp.f32 %v3168_v51 }
 0x470   : > { %7332 = vrcp.f32 %v3171_v58 }
 0x471   : > { %v7327_v36 = vpop.eup %7326 }
 0x472   : > { %v7329_v57 = vpop.eup %7328  ;;  %7052 = vmatmul.mubr.msk.bf16.vlgmr.msra.gmra.mrb[104].mxu1 %vm3294_vm6, %v3278_v29  ;;  %v3248_v33 = vmul.f32 %v7327_v36, %v8524_v60  ;;  %v4356_v60 = vsel %vm3298_vm5, %v9152_v18, 0 }
 0x473   : > { %7058 = vmatmul.mubr.msk.bf16.vlgmr.msra.gmra.mrb[100].mxu0 %vm3294_vm6, %v3279_v31  ;;  %7062 = vmatpush3.bf16.msra.mxu1 %v4260_v42  ;;  %v3249_v14 = vmul.f32 %v7329_v57, %v8529_v44 }
 0x474   : > { %7068 = vmatpush3.bf16.msra.mxu0 %v4308_v22  ;;  %7063 = vmatprep.mubr.msk.bf16.mxu1 %vm7391_vm1, %v9145_v24  ;;  %v3280_v47 = vpack.c.bf16 %v3248_v33, %v3248_v33  ;;  %v9158_v33 = vld [vmem:[#allocation7_spill] sm:$0xff] }
 0x475   : > { %7069 = vmatprep.mubr.msk.bf16.mxu0 %vm7391_vm1, %v9145_v24  ;;  %7073 = vmatprep.subr.bf16.mxu1 %v9145_v24  ;;  %v3281_v35 = vpack.c.bf16 %v3249_v14, %v3249_v14 }
 0x476   : > { %7079 = vmatprep.subr.bf16.mxu0 %v9145_v24 }
 0x479   : > { %v7331_v48 = vpop.eup %7330 }
 0x47a   : > { %v7333_v15 = vpop.eup %7332  ;;  %7064 = vmatmul.mubr.msk.bf16.vlgmr.msra.gmra.mrb[108].mxu1 %vm3294_vm6, %v3280_v47  ;;  %v3250_v44 = vmul.f32 %v7331_v48, %v8546_v55  ;;  %v9155_v55 = vld [vmem:[#allocation19_spill] sm:$0xff] }
 0x47b   : > { %7070 = vmatmul.mubr.msk.bf16.vlgmr.msra.gmra.mrb[104].mxu0 %vm3294_vm6, %v3281_v35  ;;  %7074 = vmatpush3.bf16.msra.mxu1 %v4356_v60  ;;  %v3251_v52 = vmul.f32 %v7333_v15, %v8551_v3  ;;  %v4500_v32 = vsel %vm3298_vm5, %v9155_v55, 0 }
 0x47c   : > { %7080 = vmatpush3.bf16.msra.mxu0 %v4404_v37  ;;  %7075 = vmatprep.mubr.msk.bf16.mxu1 %vm7391_vm1, %v9145_v24  ;;  %v3282_v5 = vpack.c.bf16 %v3250_v44, %v3250_v44 }
 0x47d   : > { %7081 = vmatprep.mubr.msk.bf16.mxu0 %vm7391_vm1, %v9145_v24  ;;  %7085 = vmatprep.subr.bf16.mxu1 %v9145_v24  ;;  %v3283_v6 = vpack.c.bf16 %v3251_v52, %v3251_v52 }
 0x47e   : > { %7091 = vmatprep.subr.bf16.mxu0 %v9145_v24 }
 0x482   : > { %7076 = vmatmul.mubr.msk.bf16.vlgmr.msra.gmra.mrb[112].mxu1 %vm3294_vm6, %v3282_v5 }
 0x483   : > { %7082 = vmatmul.mubr.msk.bf16.vlgmr.msra.gmra.mrb[108].mxu0 %vm3294_vm6, %v3283_v6  ;;  %7086 = vmatpush3.bf16.msra.mxu1 %v4452_v56 }
 0x484   : > { %7092 = vmatpush3.bf16.msra.mxu0 %v4500_v32  ;;  %v3174_v3 = vpop.xlane.xlu1 %3173  ;;  %7087 = vmatprep.mubr.msk.bf16.mxu1 %vm7391_vm1, %v9145_v24 }
 0x485   : > { %7334 = vrcp.f32 %v3174_v3  ;;  %7097 = vmatprep.subr.bf16.mxu1 %v9145_v24  ;;  %7093 = vmatprep.mubr.msk.bf16.mxu0 %vm7391_vm1, %v9145_v24 }
 0x486   : > { %7103 = vmatprep.subr.bf16.mxu0 %v9145_v24 }
 0x488   : > { %v3177_v34 = vpop.xlane.xlu0 %3176 }
 0x489   : > { %7336 = vrcp.f32 %v3177_v34 }
 0x48c   : > { %v3180_v62 = vpop.xlane.xlu1 %3179 }
 0x48d   : > { %7338 = vrcp.f32 %v3180_v62 }
 0x48f   : > { %v7335_v50 = vpop.eup %7334 }
 0x490   : > { %v3252_v12 = vmul.f32 %v7335_v50, %v8581_v53  ;;  %v3183_v20 = vpop.xlane.xlu0 %3182  ;;  %v9157_v53 = vld [vmem:[#allocation18_spill] sm:$0xff]  ;;  %v4687_v25 = vpop.permute.xlu1 %4686 }
 0x491   : > { %7340 = vrcp.f32 %v3183_v20  ;;  %v4596_v59 = vsel %vm3298_vm5, %v9157_v53, 0  ;;  %v4692_v41 = vsel %vm3298_vm5, %v4687_v25, 0 }
 0x492   : > { %v3284_v49 = vpack.c.bf16 %v3252_v12, %v3252_v12 }
 0x493   : > { %v7337_v27 = vpop.eup %7336 }
 0x494   : > { %v3253_v19 = vmul.f32 %v7337_v27, %v8586_v30  ;;  %7088 = vmatmul.mubr.msk.bf16.vlgmr.msra.gmra.mrb[116].mxu1 %vm3294_vm6, %v3284_v49  ;;  %v4639_v61 = vpop.permute.xlu0 %4638 }
 0x495   : > { %7098 = vmatpush3.bf16.msra.mxu1 %v4548_v43  ;;  %7099 = vmatprep.mubr.msk.bf16.mxu1 %vm7391_vm1, %v9145_v24  ;;  %v4644_v7 = vsel %vm3298_vm5, %v4639_v61, 0 }
 0x496   : > { %v3285_v17 = vpack.c.bf16 %v3253_v19, %v3253_v19  ;;  %7109 = vmatprep.subr.bf16.mxu1 %v9145_v24 }
 0x497   : > { %v7339_v1 = vpop.eup %7338 }
 0x498   : > { %v3254_v45 = vmul.f32 %v7339_v1, %v8596_v28  ;;  %7094 = vmatmul.mubr.msk.bf16.vlgmr.msra.gmra.mrb[112].mxu0 %vm3294_vm6, %v3285_v17 }
 0x499   : > { %7104 = vmatpush3.bf16.msra.mxu0 %v4596_v59  ;;  %7105 = vmatprep.mubr.msk.bf16.mxu0 %vm7391_vm1, %v9145_v24 }
 0x49a   : > { %v3286_v30 = vpack.c.bf16 %v3254_v45, %v3254_v45  ;;  %7115 = vmatprep.subr.bf16.mxu0 %v9145_v24 }
 0x49b   : > { %v7341_v63 = vpop.eup %7340 }
 0x49c   : > { %v3255_v13 = vmul.f32 %v7341_v63, %v8606_v16  ;;  %7100 = vmatmul.mubr.msk.bf16.vlgmr.msra.gmra.mrb[120].mxu1 %vm3294_vm6, %v3286_v30  ;;  %v6548_v63 = vld [vmem:[%s7506_s22 + $0x4] sm:$0xf] }
 0x49d   : > { %7110 = vmatpush3.bf16.msra.mxu1 %v4644_v7  ;;  %7111 = vmatprep.mubr.msk.bf16.mxu1 %vm7391_vm1, %v9145_v24 }
 0x49e   : > { %v3287_v28 = vpack.c.bf16 %v3255_v13, %v3255_v13  ;;  %7121 = vmatprep.subr.bf16.mxu1 %v9145_v24 }
 0x4a0   : > { %7106 = vmatmul.mubr.msk.bf16.vlgmr.msra.gmra.mrb[116].mxu0 %vm3294_vm6, %v3287_v28 }
 0x4a1   : > { %7116 = vmatpush3.bf16.msra.mxu0 %v4692_v41  ;;  %7117 = vmatprep.mubr.msk.bf16.mxu0 %vm7391_vm1, %v9145_v24 }
 0x4a2   : > { %7127 = vmatprep.subr.bf16.mxu0 %v9145_v24 }
 0x4a9   : > { %v3384_v16 = vpop.f32.mrb[64].mxu0 }
 0x4aa   : > { %v3336_v23 = vpop.f32.mrb[68].mxu1  ;;  %v6951_v9 = vpop.f32.mrb[65].mxu0 }
 0x4ab   : > { %v6554_v26 = vpack.c.bf16 %v3384_v16, %v3336_v23  ;;  %v6945_v2 = vpop.f32.mrb[69].mxu1  ;;  %v3387_v10 = vpop.f32.mrb[66].mxu0  ;;  %v4927_v23 = vsel %vm4925_vm7, %v6548_v63, 0  ;;  %v4862_v9 = vld [vmem:[%s7506_s22] sm:$0xf] }
 0x4ac   : > { %v3339_v21 = vpop.f32.mrb[70].mxu1  ;;  %v6952_v51 = vpop.f32.mrb[67].mxu0  ;;  %v6565_v63 = vld [vmem:[%s7506_s22 + $0xc] sm:$0xf] }
 0x4ad   : > { %v6946_v58 = vpop.f32.mrb[71].mxu1  ;;  %v4988_v14 = vrot.slane %v6554_v26, %v9158_v33 }
 0x4b1   : > { %v3480_v29 = vpop.f32.mrb[68].mxu0 }
 0x4b2   : > { %v3432_v36 = vpop.f32.mrb[72].mxu1  ;;  %v6963_v31 = vpop.f32.mrb[69].mxu0 }
 0x4b3   : > { %v6555_v57 = vpack.c.bf16 %v3480_v29, %v3432_v36  ;;  %v6957_v39 = vpop.f32.mrb[73].mxu1  ;;  %v3483_v42 = vpop.f32.mrb[70].mxu0 }
 0x4b4   : > { %v3435_v0 = vpop.f32.mrb[74].mxu1  ;;  %v6964_v22 = vpop.f32.mrb[71].mxu0 }
 0x4b5   : > { %v4995_v47 = vrot.slane %v6555_v57, %v9158_v33  ;;  %v6958_v48 = vpop.f32.mrb[75].mxu1 }
 0x4b7   : > { %v5010_v35 = vcombine.low %v4988_v14, %v4995_v47 }
 0x4b9   : > { %v3576_v15 = vpop.f32.mrb[72].mxu0  ;;  %v5018_v26 = vrot.slane %v5010_v35, %v9158_v33 }
 0x4ba   : > { %v3528_v18 = vpop.f32.mrb[76].mxu1  ;;  %v6975_v60 = vpop.f32.mrb[73].mxu0 }
 0x4bb   : > { %v6556_v40 = vpack.c.bf16 %v3576_v15, %v3528_v18  ;;  %v6969_v37 = vpop.f32.mrb[77].mxu1  ;;  %v3579_v44 = vpop.f32.mrb[74].mxu0 }
 0x4bc   : > { %v3531_v52 = vpop.f32.mrb[78].mxu1  ;;  %v6976_v5 = vpop.f32.mrb[75].mxu0 }
 0x4bd   : > { %v6970_v6 = vpop.f32.mrb[79].mxu1  ;;  %v5002_v13 = vrot.slane %v6556_v40, %v9158_v33 }
 0x4c1   : > { %v3186_v8 = vpop.xlane.xlu1 %3185 }
 0x4c2   : > { %7342 = vrcp.f32 %v3186_v8 }
 0x4c5   : > { %v3189_v56 = vpop.xlane.xlu0 %3188  ;;  %v3192_v55 = vpop.xlane.xlu1 %3191 }
 0x4c6   : > { %7344 = vrcp.f32 %v3189_v56 }
 0x4c7   : > { %7346 = vrcp.f32 %v3192_v55 }
 0x4c9   : > { %v3195_v32 = vpop.xlane.xlu0 %3194  ;;  %v4783_v1 = vpop.permute.xlu1 %4782 }
 0x4ca   : > { %7348 = vrcp.f32 %v3195_v32  ;;  %v4788_v7 = vsel %vm3298_vm5, %v4783_v1, 0 }
 0x4cc   : > { %v7343_v3 = vpop.eup %7342 }
 0x4cd   : > { %v3256_v34 = vmul.f32 %v7343_v3, %v8664_v46  ;;  %v4735_v62 = vpop.permute.xlu0 %4734 }
 0x4ce   : > { %v3624_v50 = vpop.f32.mrb[80].mxu1  ;;  %v4740_v19 = vsel %vm3298_vm5, %v4735_v62, 0 }
 0x4cf   : > { %v6981_v12 = vpop.f32.mrb[81].mxu1  ;;  %v3288_v20 = vpack.c.bf16 %v3256_v34, %v3256_v34 }
 0x4d0   : > { %v7345_v49 = vpop.eup %7344  ;;  %v3627_v27 = vpop.f32.mrb[82].mxu1 }
 0x4d1   : > { %v7347_v54 = vpop.eup %7346  ;;  %v3257_v43 = vmul.f32 %v7345_v49, %v8673_v38  ;;  %v6982_v17 = vpop.f32.mrb[83].mxu1  ;;  %7112 = vmatmul.mubr.msk.bf16.vlgmr.msra.gmra.mrb[124].mxu1 %vm3294_vm6, %v3288_v20 }
 0x4d2   : > { %v3672_v53 = vpop.f32.mrb[76].mxu0  ;;  %7122 = vmatpush3.bf16.msra.mxu1 %v4740_v19  ;;  %7123 = vmatprep.mubr.msk.bf16.mxu1 %vm7391_vm1, %v9145_v24  ;;  %v3258_v46 = vmul.f32 %v7347_v54, %v8678_v11 }
 0x4d3   : > { %v6557_v59 = vpack.c.bf16 %v3672_v53, %v3624_v50  ;;  %v6987_v45 = vpop.f32.mrb[77].mxu0  ;;  %v3289_v61 = vpack.c.bf16 %v3257_v43, %v3257_v43  ;;  %7133 = vmatprep.subr.bf16.mxu1 %v9145_v24 }
 0x4d4   : > { %v7349_v30 = vpop.eup %7348  ;;  %v3675_v38 = vpop.f32.mrb[78].mxu0  ;;  %v3290_v16 = vpack.c.bf16 %v3258_v46, %v3258_v46 }
 0x4d5   : > { %v5009_v25 = vrot.slane %v6557_v59, %v9158_v33  ;;  %v6988_v28 = vpop.f32.mrb[79].mxu0  ;;  %7118 = vmatmul.mubr.msk.bf16.vlgmr.msra.gmra.mrb[120].mxu0 %vm3294_vm6, %v3289_v61  ;;  %v3259_v11 = vmul.f32 %v7349_v30, %v8689_v4  ;;  %v5031_v4 = vsel %vm4925_vm7, %v4862_v9, 0  ;;  %v6559_v59 = vld [vmem:[%s7506_s22 + $0x8] sm:$0xf]  ;;  %s9164_s22 = scalar_lea.vmem %s9099_s12, %s7491_s29 }
 0x4d6   : > { %7128 = vmatpush3.bf16.msra.mxu0 %v4788_v7  ;;  %7129 = vmatprep.mubr.msk.bf16.mxu0 %vm7391_vm1, %v9145_v24  ;;  %v5137_v38 = vsel %vm4925_vm7, %v6559_v59, 0 }
 0x4d7   : > { %v5011_v41 = vcombine.low %v5002_v13, %v5009_v25  ;;  %7139 = vmatprep.subr.bf16.mxu0 %v9145_v24  ;;  %v3291_v21 = vpack.c.bf16 %v3259_v11, %v3259_v11  ;;  %v5245_v13 = vsel %vm4925_vm7, %v6565_v63, 0 }
 0x4d9   : > { %v5025_v2 = vrot.slane %v5011_v41, %v9158_v33  ;;  %7124 = vmatmul.mubr.msk.bf16.vlgmr.msra.gmra.mrb[128].mxu1 %vm3294_vm6, %v3290_v16 }
 0x4da   : > { %7134 = vmatpush3.bf16.msra.mxu1 %v4927_v23  ;;  %7135 = vmatprep.mubr.msk.bf16.mxu1 %vm7391_vm1, %v9145_v24 }
 0x4db   : > { %v5026_v10 = vcombine.low %v5018_v26, %v5025_v2  ;;  %7145 = vmatprep.subr.bf16.mxu1 %v9145_v24 }
 0x4dd   : > { %7130 = vmatmul.mubr.msk.bf16.vlgmr.msra.gmra.mrb[124].mxu0 %vm3294_vm6, %v3291_v21 }
 0x4de   : > { %7140 = vmatpush3.bf16.msra.mxu0 %v5031_v4  ;;  %7141 = vmatprep.mubr.msk.bf16.mxu0 %vm7391_vm1, %v9145_v24 }
 0x4df   : > { %7151 = vmatprep.subr.bf16.mxu0 %v9145_v24 }
 0x4e5   : > { %7142 = vmatmul.mubr.msk.bf16.vlgmr.msra.gmra.mrb[128].mxu0 %vm906_vm3, %v5026_v10 }
 0x4e6   : > { %7153 = vmatprep.mubr.msk.bf16.mxu0 %vm7391_vm1, %v9145_v24  ;;  %7152 = vmatpush3.bf16.msra.mxu0 %v5245_v13 }
 0x4e7   : > { %7165 = vmatprep.subr.bf16.mxu0 %v9145_v24 }
 0x4ec   : > { %v3720_v51 = vpop.f32.mrb[84].mxu1 }
 0x4ed   : > { %v6993_v58 = vpop.f32.mrb[85].mxu1 }
 0x4ee   : > { %v3723_v29 = vpop.f32.mrb[86].mxu1 }
 0x4ef   : > { %v6994_v36 = vpop.f32.mrb[87].mxu1 }
 0x4f0   : > { %v3768_v31 = vpop.f32.mrb[80].mxu0 }
 0x4f1   : > { %v6549_v57 = vpack.c.bf16 %v3768_v31, %v3720_v51  ;;  %v6999_v39 = vpop.f32.mrb[81].mxu0 }
 0x4f2   : > { %v3771_v42 = vpop.f32.mrb[82].mxu0 }
 0x4f3   : > { %v7000_v0 = vpop.f32.mrb[83].mxu0  ;;  %v4883_v40 = vrot.slane %v6549_v57, %v9158_v33 }
 0x4f4   : > { %v3816_v22 = vpop.f32.mrb[88].mxu1 }
 0x4f5   : > { %v7005_v14 = vpop.f32.mrb[89].mxu1 }
 0x4f6   : > { %v3819_v47 = vpop.f32.mrb[90].mxu1 }
 0x4f7   : > { %v7006_v48 = vpop.f32.mrb[91].mxu1 }
 0x4f8   : > { %v3864_v35 = vpop.f32.mrb[84].mxu0 }
 0x4f9   : > { %v6550_v15 = vpack.c.bf16 %v3864_v35, %v3816_v22  ;;  %v7011_v18 = vpop.f32.mrb[85].mxu0 }
 0x4fa   : > { %v3867_v60 = vpop.f32.mrb[86].mxu0 }
 0x4fb   : > { %v4890_v37 = vrot.slane %v6550_v15, %v9158_v33  ;;  %v7012_v44 = vpop.f32.mrb[87].mxu0 }
 0x4fc   : > { %v3912_v52 = vpop.f32.mrb[92].mxu1 }
 0x4fd   : > { %v4905_v5 = vcombine.low %v4883_v40, %v4890_v37  ;;  %v7017_v6 = vpop.f32.mrb[93].mxu1 }
 0x4fe   : > { %v3915_v8 = vpop.f32.mrb[94].mxu1 }
 0x4ff   : > { %v7018_v56 = vpop.f32.mrb[95].mxu1  ;;  %v4913_v45 = vrot.slane %v4905_v5, %v9158_v33 }
 0x501   : > { %v3960_v55 = vpop.f32.mrb[88].mxu0 }
 0x502   : > { %v6551_v32 = vpack.c.bf16 %v3960_v55, %v3912_v52  ;;  %v7023_v3 = vpop.f32.mrb[89].mxu0 }
 0x503   : > { %v3963_v34 = vpop.f32.mrb[90].mxu0 }
 0x504   : > { %v7024_v62 = vpop.f32.mrb[91].mxu0  ;;  %v4008_v50 = vpop.f32.mrb[96].mxu1  ;;  %v4897_v17 = vrot.slane %v6551_v32, %v9158_v33 }
 0x505   : > { %v7029_v12 = vpop.f32.mrb[97].mxu1 }
 0x506   : > { %v4011_v20 = vpop.f32.mrb[98].mxu1 }
 0x507   : > { %v7030_v49 = vpop.f32.mrb[99].mxu1 }
 0x509   : > { %v4056_v27 = vpop.f32.mrb[92].mxu0 }
 0x50a   : > { %v6552_v54 = vpack.c.bf16 %v4056_v27, %v4008_v50  ;;  %v7035_v43 = vpop.f32.mrb[93].mxu0 }
 0x50b   : > { %v4059_v19 = vpop.f32.mrb[94].mxu0 }
 0x50c   : > { %v4904_v1 = vrot.slane %v6552_v54, %v9158_v33  ;;  %v7036_v53 = vpop.f32.mrb[95].mxu0 }
 0x50e   : > { %v4906_v46 = vcombine.low %v4897_v17, %v4904_v1 }
 0x510   : > { %v4920_v61 = vrot.slane %v4906_v46, %v9158_v33 }
 0x512   : > { %v4921_v30 = vcombine.low %v4913_v45, %v4920_v61 }
 0x514   : > { %7136 = vmatmul.mubr.msk.bf16.vlgmr.msra.gmra.mrb[132].mxu1 %vm906_vm3, %v4921_v30 }
 0x515   : > { %7146 = vmatpush3.bf16.msra.mxu1 %v5137_v38  ;;  %7147 = vmatprep.mubr.msk.bf16.mxu1 %vm7391_vm1, %v9145_v24 }
 0x516   : > { %7157 = vmatprep.subr.bf16.mxu1 %v9145_v24 }
 0x53d   : > { %v4104_v7 = vpop.f32.mrb[100].mxu1 }
 0x53e   : > { %v4152_v25 = vpop.f32.mrb[96].mxu0  ;;  %v7041_v28 = vpop.f32.mrb[101].mxu1 }
 0x53f   : > { %v6560_v11 = vpack.c.bf16 %v4152_v25, %v4104_v7  ;;  %v7047_v41 = vpop.f32.mrb[97].mxu0  ;;  %v4107_v16 = vpop.f32.mrb[102].mxu1 }
 0x540   : > { %v4155_v23 = vpop.f32.mrb[98].mxu0  ;;  %v7042_v9 = vpop.f32.mrb[103].mxu1 }
 0x541   : > { %v7048_v26 = vpop.f32.mrb[99].mxu0  ;;  %v5094_v31 = vrot.slane %v6560_v11, %v9158_v33 }
 0x545   : > { %v4200_v2 = vpop.f32.mrb[104].mxu1 }
 0x546   : > { %v4248_v10 = vpop.f32.mrb[100].mxu0  ;;  %v7053_v21 = vpop.f32.mrb[105].mxu1 }
 0x547   : > { %v6561_v4 = vpack.c.bf16 %v4248_v10, %v4200_v2  ;;  %v7059_v51 = vpop.f32.mrb[101].mxu0  ;;  %v4203_v58 = vpop.f32.mrb[106].mxu1 }
 0x548   : > { %v4251_v29 = vpop.f32.mrb[102].mxu0  ;;  %v7054_v36 = vpop.f32.mrb[107].mxu1 }
 0x549   : > { %v5101_v57 = vrot.slane %v6561_v4, %v9158_v33  ;;  %v7060_v39 = vpop.f32.mrb[103].mxu0 }
 0x54b   : > { %v5116_v42 = vcombine.low %v5094_v31, %v5101_v57 }
 0x54d   : > { %v4296_v0 = vpop.f32.mrb[108].mxu1  ;;  %v5124_v62 = vrot.slane %v5116_v42, %v9158_v33 }
 0x54e   : > { %v4344_v22 = vpop.f32.mrb[104].mxu0  ;;  %v7065_v14 = vpop.f32.mrb[109].mxu1 }
 0x54f   : > { %v6562_v47 = vpack.c.bf16 %v4344_v22, %v4296_v0  ;;  %v7071_v48 = vpop.f32.mrb[105].mxu0  ;;  %v4299_v35 = vpop.f32.mrb[110].mxu1 }
 0x550   : > { %v4347_v15 = vpop.f32.mrb[106].mxu0  ;;  %v7066_v18 = vpop.f32.mrb[111].mxu1 }
 0x551   : > { %v7072_v60 = vpop.f32.mrb[107].mxu0  ;;  %v5108_v55 = vrot.slane %v6562_v47, %v9158_v33 }
 0x555   : > { %v4392_v40 = vpop.f32.mrb[112].mxu1 }
 0x556   : > { %v4440_v37 = vpop.f32.mrb[108].mxu0  ;;  %v7077_v44 = vpop.f32.mrb[113].mxu1 }
 0x557   : > { %v6563_v52 = vpack.c.bf16 %v4440_v37, %v4392_v40  ;;  %v7083_v5 = vpop.f32.mrb[109].mxu0  ;;  %v4395_v6 = vpop.f32.mrb[114].mxu1 }
 0x558   : > { %v4443_v8 = vpop.f32.mrb[110].mxu0  ;;  %v7078_v56 = vpop.f32.mrb[115].mxu1 }
 0x559   : > { %v5115_v32 = vrot.slane %v6563_v52, %v9158_v33  ;;  %v7084_v3 = vpop.f32.mrb[111].mxu0 }
 0x55b   : > { %v5117_v34 = vcombine.low %v5108_v55, %v5115_v32 }
 0x55d   : > { %v5131_v50 = vrot.slane %v5117_v34, %v9158_v33 }
 0x55f   : > { %v5132_v12 = vcombine.low %v5124_v62, %v5131_v50 }
 0x561   : > { %7148 = vmatmul.mubr.msk.bf16.vlgmr.msra.gmra.mrb[136].mxu1 %vm906_vm3, %v5132_v12  ;;  %v6571_v12 = vld [vmem:[%s9159_s15] ss:$0 sm:$0xff] }
 0x562   : > { %7161 = vmatprep.mubr.msk.bf16.mxu1 %vm7391_vm1, %v9145_v24 }
 0x567   : > { %v4488_v20 = vpop.f32.mrb[116].mxu1 }
 0x568   : > { %v7089_v49 = vpop.f32.mrb[117].mxu1 }
 0x569   : > { %v4491_v27 = vpop.f32.mrb[118].mxu1 }
 0x56a   : > { %v7090_v54 = vpop.f32.mrb[119].mxu1 }
 0x56b   : > { %v4536_v43 = vpop.f32.mrb[112].mxu0 }
 0x56c   : > { %v6566_v19 = vpack.c.bf16 %v4536_v43, %v4488_v20  ;;  %v7095_v17 = vpop.f32.mrb[113].mxu0 }
 0x56d   : > { %v4539_v1 = vpop.f32.mrb[114].mxu0 }
 0x56e   : > { %v7096_v53 = vpop.f32.mrb[115].mxu0  ;;  %v5202_v7 = vrot.slane %v6566_v19, %v9158_v33  ;;  %v9160_v1 = vld [vmem:[#allocation6_spill] sm:$0xff] }
 0x56f   : > { %v4584_v46 = vpop.f32.mrb[120].mxu1 }
 0x570   : > { %v7101_v59 = vpop.f32.mrb[121].mxu1 }
 0x571   : > { %v4587_v45 = vpop.f32.mrb[122].mxu1 }
 0x572   : > { %v7102_v61 = vpop.f32.mrb[123].mxu1 }
 0x573   : > { %v4632_v30 = vpop.f32.mrb[116].mxu0 }
 0x574   : > { %v6567_v38 = vpack.c.bf16 %v4632_v30, %v4584_v46  ;;  %v7107_v63 = vpop.f32.mrb[117].mxu0 }
 0x575   : > { %v4635_v13 = vpop.f32.mrb[118].mxu0  ;;  %v7358_v63 = vld [vmem:[%s9128_s1] sm:$0x3] }
 0x576   : > { %v5209_v25 = vrot.slane %v6567_v38, %v9158_v33  ;;  %v7108_v28 = vpop.f32.mrb[119].mxu0 }
 0x578   : > { %v5224_v11 = vcombine.low %v5202_v7, %v5209_v25  ;;  %v7359_v7 = vld [vmem:[%s9128_s1 + $0x2] sm:$0x3] }
 0x57a   : > { %v5232_v48 = vrot.slane %v5224_v11, %v9158_v33 }
 0x5a4   : > { %v4680_v41 = vpop.f32.mrb[124].mxu1 }
 0x5a5   : > { %v7113_v16 = vpop.f32.mrb[125].mxu1 }
 0x5a6   : > { %v4683_v23 = vpop.f32.mrb[126].mxu1 }
 0x5a7   : > { %v7114_v9 = vpop.f32.mrb[127].mxu1 }
 0x5a8   : > { %v4728_v26 = vpop.f32.mrb[120].mxu0  ;;  %v7361_v9 = vld [vmem:[%s9128_s1 + $0x6] sm:$0x3] }
 0x5a9   : > { %v6568_v2 = vpack.c.bf16 %v4728_v26, %v4680_v41  ;;  %v7119_v10 = vpop.f32.mrb[121].mxu0  ;;  %v7360_v41 = vld [vmem:[%s9128_s1 + $0x4] sm:$0x3] }
 0x5aa   : > { %v4731_v21 = vpop.f32.mrb[122].mxu0  ;;  %v7362_v10 = vld [vmem:[%s9128_s1 + $0x8] sm:$0x3] }
 0x5ab   : > { %v7120_v4 = vpop.f32.mrb[123].mxu0  ;;  %v5216_v0 = vrot.slane %v6568_v2, %v9158_v33 }
 0x5ac   : > { %v4776_v51 = vpop.f32.mrb[128].mxu1  ;;  %v7363_v4 = vld [vmem:[%s9128_s1 + $0xa] sm:$0x3] }
 0x5ad   : > { %v7125_v58 = vpop.f32.mrb[129].mxu1 }
 0x5ae   : > { %v4779_v29 = vpop.f32.mrb[130].mxu1  ;;  %v7364_v58 = vld [vmem:[%s9128_s1 + $0xc] sm:$0x3] }
 0x5af   : > { %v7126_v36 = vpop.f32.mrb[131].mxu1 }
 0x5b0   : > { %v4824_v31 = vpop.f32.mrb[124].mxu0 }
 0x5b1   : > { %v6569_v57 = vpack.c.bf16 %v4824_v31, %v4776_v51  ;;  %v7131_v39 = vpop.f32.mrb[125].mxu0  ;;  %v7365_v31 = vld [vmem:[%s9128_s1 + $0xe] sm:$0x3] }
 0x5b2   : > { %v4827_v42 = vpop.f32.mrb[126].mxu0 }
 0x5b3   : > { %v5223_v22 = vrot.slane %v6569_v57, %v9158_v33  ;;  %v7132_v14 = vpop.f32.mrb[127].mxu0 }
 0x5b5   : > { %v5225_v47 = vcombine.low %v5216_v0, %v5223_v22 }
 0x5b7   : > { %v5239_v35 = vrot.slane %v5225_v47, %v9158_v33 }
 0x5b8   : > { %v5067_v15 = vpop.f32.mrb[128].mxu0 }
 0x5b9   : > { %v5240_v18 = vcombine.low %v5232_v48, %v5239_v35  ;;  %v7143_v60 = vpop.f32.mrb[129].mxu0 }
 0x5ba   : > { %v5070_v40 = vpop.f32.mrb[130].mxu0  ;;  %v7399_v60 = vmov 269488144  }
 0x5bb   : > { %v7144_v37 = vpop.f32.mrb[131].mxu0  ;;  %7154 = vmatmul.mubr.msk.bf16.vlgmr.msra.gmra.mrb[132].mxu0 %vm906_vm3, %v5240_v18 }
 0x5bc   : > { %7173 = vmatprep.mubr.msk.bf16.mxu0 %vm7391_vm1, %v9145_v24  ;;  %v7400_v37 = vmov 842150450  }
 0x5e7   : > { %v4963_v44 = vpop.f32.mrb[132].mxu1 }
 0x5e8   : > { %v5068_v52 = vadd.f32 %v5067_v15, %v4963_v44  ;;  %v7137_v5 = vpop.f32.mrb[133].mxu1  ;;  %v5416_v44 = vunpack.c.l.s4 %v7400_v37 }
 0x5e9   : > { %v4966_v6 = vpop.f32.mrb[134].mxu1 }
 0x5ea   : > { %v5071_v8 = vadd.f32 %v5070_v40, %v4966_v6  ;;  %v7138_v56 = vpop.f32.mrb[135].mxu1  ;;  %v5409_v40 = vunpack.c.l.s4 %v7399_v60  ;;  %v7402_v6 = vmov 1987475062  }
 0x5ec   : > { %v5410_v56 = vunpack.c.0.s8 %v5409_v40 }
 0x634   : > { %v5173_v55 = vpop.f32.mrb[136].mxu1 }
 0x635   : > { %v5180_v32 = vadd.f32 %v5173_v55, %v5068_v52  ;;  %v7149_v33 = vpop.f32.mrb[137].mxu1  ;;  %v7401_v52 = vmov 1414812756   ;;  %v5417_v55 = vunpack.c.0.s8 %v5416_v44 }
 0x636   : > { %v5176_v3 = vpop.f32.mrb[138].mxu1  ;;  %v5423_v5 = vunpack.c.l.s4 %v7401_v52  ;;  %v6572_v52 = vld [vmem:[%s632_s26] ss:$0 sm:$0xff] }
 0x637   : > { %v5181_v34 = vadd.f32 %v5176_v3, %v5071_v8  ;;  %v7150_v62 = vpop.f32.mrb[139].mxu1  ;;  %v5430_v8 = vunpack.c.l.s4 %v7402_v6  ;;  %v9161_v3 = vld [vmem:[#allocation5_spill] sm:$0xff] }
 0x638   : > { %v8891_v62 = vsub.s32 %v5417_v55, %v9161_v3  ;;  %v6573_v6 = vld [vmem:[%s635_s5] ss:$0 sm:$0xff]  ;;  %v5630_v55 = vrot.slane %v6572_v52, %v9160_v1 }
 0x639   : > { %v5431_v33 = vunpack.c.0.s8 %v5430_v8  ;;  %v5623_v8 = vcombine.high %v6572_v52, %v6572_v52  ;;  %v7220_v52 = vld [vmem:[%s7525_s20 + $0x10] sm:$0xff]  }
 0x68e   : > { %v5281_v50 = vpop.f32.mrb[132].mxu0 }
 0x68f   : > { %v5288_v20 = vadd.f32 %v5281_v50, %v5180_v32  ;;  %v7155_v49 = vpop.f32.mrb[133].mxu0  ;;  %v5424_v32 = vunpack.c.0.s8 %v5423_v5 }
 0x690   : > { %v5284_v27 = vpop.f32.mrb[134].mxu0 }
 0x691   : > { %v5297_v54 = vadd.f32 %v6571_v12, %v5288_v20  ;;  %v5289_v43 = vadd.f32 %v5284_v27, %v5181_v34  ;;  %v7156_v19 = vpop.f32.mrb[135].mxu0  ;;  %v8888_v34 = vsub.s32 %v5410_v56, %v9161_v3  ;;  %v8894_v50 = vsub.s32 %v5424_v32, %v9161_v3 }
 0x692   : > { %v5657_v56 = vcombine.high %v6573_v6, %v6573_v6  ;;  %v5637_v32 = vrot.slane %v5623_v8, %v9160_v1 }
 0x693   : > { %v5301_v17 = vcombine.high %v5297_v54, %v5297_v54  ;;  %v5308_v53 = vrot.slane %v5297_v54, %v9160_v1  ;;  %v5298_v46 = vadd.f32 %v6571_v12, %v5289_v43  ;;  %v8897_v12 = vsub.s32 %v5431_v33, %v9161_v3 }
 0x694   : > { %v5664_v3 = vrot.slane %v6573_v6, %v9160_v1  ;;  %v6574_v6 = vld [vmem:[%s9163_s19] ss:$0 sm:$0xff] }
 0x695   : > { %v5315_v59 = vrot.slane %v5301_v17, %v9160_v1  ;;  %v5316_v45 = vcombine.high %v5308_v53, %v5308_v53  ;;  %v5318_v61 = vcombine.high %v5298_v46, %v5298_v46  ;;  %v5325_v30 = vrot.slane %v5298_v46, %v9160_v1 }
 0x696   : > { %v5343_v13 = vadd.f32 %v7358_v63, %v5308_v53 }
 0x697   : > { %v5317_v38 = vcombine.high %v5315_v59, %v5315_v59  ;;  %v5344_v25 = vadd.f32 %v7359_v7, %v5316_v45  ;;  %v5332_v28 = vrot.slane %v5318_v61, %v9160_v1  ;;  %v5333_v11 = vcombine.high %v5325_v30, %v5325_v30 }
 0x698   : > { %v5345_v16 = vadd.f32 %v7360_v41, %v5315_v59  ;;  %v5347_v21 = vadd.f32 %v7362_v10, %v5325_v30 }
 0x699   : > { %v5334_v23 = vcombine.high %v5332_v28, %v5332_v28  ;;  %v5346_v26 = vadd.f32 %v7361_v9, %v5317_v38  ;;  %v5361_v2 = vcombine.low %v5343_v13, %v5344_v25  ;;  %v5348_v51 = vadd.f32 %v7363_v4, %v5333_v11 }
 0x69a   : > { %v5349_v29 = vadd.f32 %v7364_v58, %v5332_v28 }
 0x69b   : > { %v5362_v36 = vcombine.low %v5345_v16, %v5346_v26  ;;  %v5350_v57 = vadd.f32 %v7365_v31, %v5334_v23  ;;  %v5378_v39 = vcombine.low %v5347_v21, %v5348_v51  ;;  %v5369_v42 = vrot.slane %v5361_v2, %v9160_v1 }
 0x69d   : > { %v5376_v0 = vrot.slane %v5362_v36, %v9160_v1  ;;  %v5379_v22 = vcombine.low %v5349_v29, %v5350_v57  ;;  %v5386_v47 = vrot.slane %v5378_v39, %v9160_v1 }
 0x69f   : > { %v5377_v14 = vcombine.low %v5369_v42, %v5376_v0  ;;  %v5393_v48 = vrot.slane %v5379_v22, %v9160_v1 }
 0x6a1   : > { %v5397_v35 = vsel %vm746_vm2, %v5377_v14, 0.0  ;;  %v5394_v15 = vcombine.low %v5386_v47, %v5393_v48  ;;  %v7216_v47 = vld [vmem:[%s7515_s13] sm:$0xff]   ;;  %v7217_v48 = vld [vmem:[%s7515_s13 + $0x8] sm:$0xff]  }
 0x6a2   : > { %5398 = vadd.xlane.f32.xlu0 %v5397_v35  ;;  %7158 = vmatpush3.bf16.msra.mxu1 %v7216_v47  ;;  %v7218_v35 = vld [vmem:[%s7525_s20] sm:$0xff]  }
 0x6a3   : > { %v5400_v18 = vsel %vm746_vm2, %v5394_v15, 0.0  ;;  %7159 = vmatprep.subr.bf16.mxu1 %v9145_v24  ;;  %7166 = vmatpush3.bf16.msra.mxu0 %v7218_v35  ;;  %v7219_v15 = vld [vmem:[%s7525_s20 + $0x8] sm:$0xff]  }
 0x6a4   : > { %5401 = vadd.xlane.f32.xlu1 %v5400_v18  ;;  %7167 = vmatprep.subr.bf16.mxu0 %v9145_v24 }
 0x6a6   : > { %7160 = vmatpush3.bf16.msra.mxu1 %v7217_v48 }
 0x6a7   : > { %7168 = vmatpush3.bf16.msra.mxu0 %v7219_v15 }
 0x6a8   : > { %7169 = vmatprep.subr.bf16.mxu0 %v9145_v24 }
 0x6ab   : > { %7170 = vmatpush3.bf16.msra.mxu0 %v7220_v52 }
 0x6ac   : > { %7171 = vmatprep.subr.bf16.mxu0 %v9145_v24  ;;  %v6578_v24 = vld [vmem:[%s629_s23] ss:$0 sm:$0xff] }
 0x72f   : > { %v5399_v20 = vpop.xlane.xlu0 %5398 }
 0x730   : > { %v5404_v49 = vmul.f32 0.03125, %v5399_v20  ;;  %v5671_v20 = vrot.slane %v5657_v56, %v9160_v1 }
 0x731   : > { %v5402_v27 = vpop.xlane.xlu1 %5401 }
 0x732   : > { %v5414_v54 = vrot.slane %v5404_v49, %v8888_v34  ;;  %v5421_v43 = vrot.slane %v5404_v49, %v8891_v62  ;;  %v5428_v19 = vrot.slane %v5404_v49, %v8894_v50  ;;  %v5435_v17 = vrot.slane %v5404_v49, %v8897_v12 }
 0x733   : > { %v5405_v53 = vmul.f32 0.03125, %v5402_v27 }
 0x734   : > { %v8903_v46 = vsub.f32 %v5343_v13, %v5414_v54  ;;  %v8905_v59 = vsub.f32 %v5344_v25, %v5421_v43  ;;  %v8907_v45 = vsub.f32 %v5345_v16, %v5428_v19  ;;  %v8909_v61 = vsub.f32 %v5346_v26, %v5435_v17 }
 0x735   : > { %v5442_v30 = vrot.slane %v5405_v53, %v8888_v34  ;;  %v5449_v38 = vrot.slane %v5405_v53, %v8891_v62  ;;  %v5456_v63 = vrot.slane %v5405_v53, %v8894_v50  ;;  %v5463_v7 = vrot.slane %v5405_v53, %v8897_v12 }
 0x736   : > { %v5480_v28 = vmul.f32 %v8903_v46, %v8903_v46  ;;  %v5481_v13 = vmul.f32 %v8905_v59, %v8905_v59  ;;  %v5482_v25 = vmul.f32 %v8907_v45, %v8907_v45  ;;  %v5483_v11 = vmul.f32 %v8909_v61, %v8909_v61 }
 0x737   : > { %v8923_v41 = vsub.f32 %v5347_v21, %v5442_v30  ;;  %v8925_v16 = vsub.f32 %v5348_v51, %v5449_v38  ;;  %v8927_v23 = vsub.f32 %v5349_v29, %v5456_v63  ;;  %v8929_v9 = vsub.f32 %v5350_v57, %v5463_v7 }
 0x738   : > { %v5496_v26 = vcombine.low %v5480_v28, %v5481_v13  ;;  %v5497_v2 = vcombine.low %v5482_v25, %v5483_v11  ;;  %v5638_v19 = vcombine.high %v5630_v55, %v5630_v55  ;;  %v5639_v17 = vcombine.high %v5637_v32, %v5637_v32 }
 0x739   : > { %v5484_v10 = vmul.f32 %v8923_v41, %v8923_v41  ;;  %v5485_v4 = vmul.f32 %v8925_v16, %v8925_v16  ;;  %v5486_v58 = vmul.f32 %v8927_v23, %v8927_v23  ;;  %v5487_v21 = vmul.f32 %v8929_v9, %v8929_v9 }
 0x73a   : > { %v5504_v51 = vrot.slane %v5496_v26, %v9160_v1  ;;  %v5511_v29 = vrot.slane %v5497_v2, %v9160_v1  ;;  %v5672_v28 = vcombine.high %v5664_v3, %v5664_v3  ;;  %v5673_v13 = vcombine.high %v5671_v20, %v5671_v20 }
 0x73b   : > { %v5513_v36 = vcombine.low %v5484_v10, %v5485_v4  ;;  %v5514_v31 = vcombine.low %v5486_v58, %v5487_v21 }
 0x73c   : > { %v5512_v57 = vcombine.low %v5504_v51, %v5511_v29 }
 0x73d   : > { %v5521_v39 = vrot.slane %v5513_v36, %v9160_v1  ;;  %v5528_v42 = vrot.slane %v5514_v31, %v9160_v1 }
 0x73e   : > { %v5532_v0 = vsel %vm746_vm2, %v5512_v57, 0.0 }
 0x73f   : > { %5533 = vadd.xlane.f32.xlu0 %v5532_v0  ;;  %v5529_v22 = vcombine.low %v5521_v39, %v5528_v42 }
 0x741   : > { %v5535_v14 = vsel %vm746_vm2, %v5529_v22, 0.0 }
 0x743   : > { %5536 = vadd.xlane.f32.xlu0 %v5535_v14 }
 0x7cc   : > { %v5534_v18 = vpop.xlane.xlu0 %5533 }
 0x7cd   : > { %v5538_v60 = vmul.f32 0.03125, %v5534_v18 }
 0x7cf   : > { %v5540_v40 = vadd.f32 1e-05, %v5538_v60 }
 0x7d0   : > { %v5537_v37 = vpop.xlane.xlu0 %5536 }
 0x7d1   : > { %7350 = vrsqrt.f32 %v5540_v40  ;;  %v5539_v44 = vmul.f32 0.03125, %v5537_v37 }
 0x7d3   : > { %v5541_v5 = vadd.f32 1e-05, %v5539_v44 }
 0x7d5   : > { %7352 = vrsqrt.f32 %v5541_v5  ;;  %v7221_v5 = vld [vmem:[%s7525_s20 + $0x18] sm:$0xff]  }
 0x7d6   : > { %7172 = vmatpush3.bf16.msra.mxu0 %v7221_v5 }
 0x7db   : > { %v7351_v33 = vpop.eup %7350 }
 0x7dc   : > { %v5552_v49 = vrot.slane %v7351_v33, %v8888_v34  ;;  %v5559_v27 = vrot.slane %v7351_v33, %v8891_v62  ;;  %v5566_v54 = vrot.slane %v7351_v33, %v8894_v50  ;;  %v5573_v43 = vrot.slane %v7351_v33, %v8897_v12 }
 0x7de   : > { %v5610_v53 = vmul.f32 %v5552_v49, %v8903_v46  ;;  %v5611_v30 = vmul.f32 %v5559_v27, %v8905_v59  ;;  %v5612_v38 = vmul.f32 %v5566_v54, %v8907_v45  ;;  %v5613_v63 = vmul.f32 %v5573_v43, %v8909_v61 }
 0x7df   : > { %v7353_v7 = vpop.eup %7352 }
 0x7e0   : > { %v5580_v25 = vrot.slane %v7353_v7, %v8888_v34  ;;  %v5587_v11 = vrot.slane %v7353_v7, %v8891_v62  ;;  %v5594_v26 = vrot.slane %v7353_v7, %v8894_v50  ;;  %v5601_v2 = vrot.slane %v7353_v7, %v8897_v12 }
 0x7e1   : > { %v5644_v10 = vmul.f32 %v5630_v55, %v5610_v53  ;;  %v5645_v4 = vmul.f32 %v5638_v19, %v5611_v30  ;;  %v5646_v46 = vmul.f32 %v5637_v32, %v5612_v38  ;;  %v5647_v58 = vmul.f32 %v5639_v17, %v5613_v63 }
 0x7e2   : > { %v5614_v59 = vmul.f32 %v5580_v25, %v8923_v41  ;;  %v5615_v45 = vmul.f32 %v5587_v11, %v8925_v16  ;;  %v5616_v61 = vmul.f32 %v5594_v26, %v8927_v23  ;;  %v5617_v21 = vmul.f32 %v5601_v2, %v8929_v9 }
 0x7e3   : > { %v5678_v51 = vadd.f32 %v5664_v3, %v5644_v10  ;;  %v5679_v29 = vadd.f32 %v5672_v28, %v5645_v4  ;;  %v5680_v36 = vadd.f32 %v5671_v20, %v5646_v46  ;;  %v5681_v31 = vadd.f32 %v5673_v13, %v5647_v58 }
 0x7e4   : > { %v5648_v57 = vmul.f32 %v5630_v55, %v5614_v59  ;;  %v5649_v39 = vmul.f32 %v5638_v19, %v5615_v45  ;;  %v5650_v42 = vmul.f32 %v5637_v32, %v5616_v61  ;;  %v5651_v0 = vmul.f32 %v5639_v17, %v5617_v21 }
 0x7e5   : > { %v5694_v22 = vcombine.low %v5678_v51, %v5679_v29  ;;  %v5695_v14 = vcombine.low %v5680_v36, %v5681_v31 }
 0x7e6   : > { %v5682_v47 = vadd.f32 %v5664_v3, %v5648_v57  ;;  %v5683_v48 = vadd.f32 %v5672_v28, %v5649_v39  ;;  %v5684_v41 = vadd.f32 %v5671_v20, %v5650_v42  ;;  %v5685_v16 = vadd.f32 %v5673_v13, %v5651_v0 }
 0x7e7   : > { %v5702_v23 = vrot.slane %v5694_v22, %v9160_v1  ;;  %v5709_v9 = vrot.slane %v5695_v14, %v9160_v1 }
 0x7e8   : > { %v5711_v35 = vcombine.low %v5682_v47, %v5683_v48  ;;  %v5712_v15 = vcombine.low %v5684_v41, %v5685_v16 }
 0x7e9   : > { %v5710_v40 = vcombine.low %v5702_v23, %v5709_v9 }
 0x7ea   : > { %v5719_v18 = vrot.slane %v5711_v35, %v9160_v1  ;;  %v5726_v60 = vrot.slane %v5712_v15, %v9160_v1 }
 0x7ec   : > { %v5727_v37 = vcombine.low %v5719_v18, %v5726_v60 }
 0x7ee   : > { %v5730_v44 = vpack.c.bf16 %v5727_v37, %v5710_v40 }
 0x7f0   : > { %7162 = vmatmul.mubr.msk.bf16.vlgmr.msra.gmra.mrb[140].mxu1 %vm746_vm2, %v5730_v44 }
 0x8c3   : > { %v5791_v8 = vpop.f32.mrb[140].mxu1 }
 0x8c4   : > { %v5792_v56 = vadd.f32 %v6574_v6, %v5791_v8  ;;  %v7163_v55 = vpop.f32.mrb[141].mxu1 }
 0x8c5   : > { %v5794_v32 = vpop.f32.mrb[142].mxu1 }
 0x8c6   : > { %v5795_v33 = vadd.f32 %v6574_v6, %v5794_v32  ;;  %v7164_v3 = vpop.f32.mrb[143].mxu1  ;;  %v5798_v20 = vmax.f32 %v5792_v56, 0.0 }
 0x8c8   : > { %v5799_v49 = vmax.f32 %v5795_v33, 0.0 }
 0x8ca   : > { %v5800_v27 = vpack.c.bf16 %v5799_v49, %v5798_v20 }
 0x8cc   : > { %7174 = vmatmul.mubr.msk.bf16.vlgmr.msra.gmra.mrb[136].mxu0 %vm5840_vm8, %v5800_v27 }
 0x99f   : > { %v5878_v54 = vpop.f32.mrb[136].mxu0 }
 0x9a0   : > { %v5879_v43 = vadd.f32 %v6578_v24, %v5878_v54  ;;  %v7175_v19 = vpop.f32.mrb[137].mxu0 }
 0x9a1   : > { %v5881_v17 = vpop.f32.mrb[138].mxu0 }
 0x9a2   : > { %v5887_v53 = vcombine.high %v5879_v43, %v5879_v43  ;;  %v5894_v30 = vrot.slane %v5879_v43, %v9160_v1  ;;  %v5882_v38 = vadd.f32 %v6578_v24, %v5881_v17  ;;  %v7176_v63 = vpop.f32.mrb[139].mxu0 }
 0x9a4   : > { %v5901_v7 = vrot.slane %v5887_v53, %v9160_v1  ;;  %v5902_v28 = vcombine.high %v5894_v30, %v5894_v30  ;;  %v5904_v13 = vcombine.high %v5882_v38, %v5882_v38  ;;  %v5911_v25 = vrot.slane %v5882_v38, %v9160_v1 }
 0x9a5   : > { %v5929_v26 = vadd.f32 %v5894_v30, %v5678_v51 }
 0x9a6   : > { %v5903_v11 = vcombine.high %v5901_v7, %v5901_v7  ;;  %v5930_v2 = vadd.f32 %v5902_v28, %v5679_v29  ;;  %v5918_v10 = vrot.slane %v5904_v13, %v9160_v1  ;;  %v5919_v4 = vcombine.high %v5911_v25, %v5911_v25 }
 0x9a7   : > { %v5931_v46 = vadd.f32 %v5901_v7, %v5680_v36  ;;  %v5933_v61 = vadd.f32 %v5911_v25, %v5682_v47 }
 0x9a8   : > { %v5932_v58 = vadd.f32 %v5903_v11, %v5681_v31  ;;  %v5947_v59 = vcombine.low %v5929_v26, %v5930_v2  ;;  %v5920_v45 = vcombine.high %v5918_v10, %v5918_v10  ;;  %v5934_v21 = vadd.f32 %v5919_v4, %v5683_v48 }
 0x9a9   : > { %v5935_v57 = vadd.f32 %v5918_v10, %v5684_v41 }
 0x9aa   : > { %v5936_v39 = vadd.f32 %v5920_v45, %v5685_v16  ;;  %v5948_v42 = vcombine.low %v5931_v46, %v5932_v58  ;;  %v5964_v0 = vcombine.low %v5933_v61, %v5934_v21  ;;  %v5955_v22 = vrot.slane %v5947_v59, %v9160_v1 }
 0x9ac   : > { %v5962_v14 = vrot.slane %v5948_v42, %v9160_v1  ;;  %v5965_v23 = vcombine.low %v5935_v57, %v5936_v39  ;;  %v5972_v29 = vrot.slane %v5964_v0, %v9160_v1 }
 0x9ae   : > { %v5963_v51 = vcombine.low %v5955_v22, %v5962_v14  ;;  %v5979_v9 = vrot.slane %v5965_v23, %v9160_v1 }
 0x9b0   : > { %v5983_v36 = vsel %vm746_vm2, %v5963_v51, 0.0  ;;  %v5980_v31 = vcombine.low %v5972_v29, %v5979_v9 }
 0x9b1   : > { %5984 = vadd.xlane.f32.xlu1 %v5983_v36 }
 0x9b2   : > { %v5986_v47 = vsel %vm746_vm2, %v5980_v31, 0.0 }
 0x9b3   : > { %5987 = vadd.xlane.f32.xlu0 %v5986_v47 }
 0xa3e   : > { %v5985_v48 = vpop.xlane.xlu1 %5984 }
 0xa3f   : > { %v5989_v41 = vmul.f32 0.03125, %v5985_v48 }
 0xa40   : > { %v5988_v16 = vpop.xlane.xlu0 %5987 }
 0xa41   : > { %v5999_v35 = vrot.slane %v5989_v41, %v8888_v34  ;;  %v6006_v15 = vrot.slane %v5989_v41, %v8891_v62  ;;  %v6013_v18 = vrot.slane %v5989_v41, %v8894_v50  ;;  %v6020_v60 = vrot.slane %v5989_v41, %v8897_v12 }
 0xa42   : > { %v5990_v40 = vmul.f32 0.03125, %v5988_v16 }
 0xa43   : > { %v6057_v37 = vsub.f32 %v5929_v26, %v5999_v35  ;;  %v6058_v44 = vsub.f32 %v5930_v2, %v6006_v15  ;;  %v6059_v52 = vsub.f32 %v5931_v46, %v6013_v18  ;;  %v6060_v5 = vsub.f32 %v5932_v58, %v6020_v60 }
 0xa44   : > { %v6027_v6 = vrot.slane %v5990_v40, %v8888_v34  ;;  %v6034_v8 = vrot.slane %v5990_v40, %v8891_v62  ;;  %v6041_v56 = vrot.slane %v5990_v40, %v8894_v50  ;;  %v6048_v55 = vrot.slane %v5990_v40, %v8897_v12 }
 0xa45   : > { %v6065_v32 = vmul.f32 %v6057_v37, %v6057_v37  ;;  %v6066_v33 = vmul.f32 %v6058_v44, %v6058_v44  ;;  %v6067_v3 = vmul.f32 %v6059_v52, %v6059_v52  ;;  %v6068_v20 = vmul.f32 %v6060_v5, %v6060_v5 }
 0xa46   : > { %v6061_v49 = vsub.f32 %v5933_v61, %v6027_v6  ;;  %v6062_v27 = vsub.f32 %v5934_v21, %v6034_v8  ;;  %v6063_v24 = vsub.f32 %v5935_v57, %v6041_v56  ;;  %v6064_v54 = vsub.f32 %v5936_v39, %v6048_v55  ;;  %v6584_v61 = vld [vmem:[%s638_s17] ss:$0 sm:$0xff] }
 0xa47   : > { %v6081_v43 = vcombine.low %v6065_v32, %v6066_v33  ;;  %v6082_v19 = vcombine.low %v6067_v3, %v6068_v20  ;;  %v6585_v57 = vld [vmem:[%s9164_s22] ss:$0 sm:$0xff]  ;;  %v6208_v42 = vcombine.high %v6584_v61, %v6584_v61  ;;  %v6215_v22 = vrot.slane %v6584_v61, %v9160_v1 }
 0xa48   : > { %v6069_v17 = vmul.f32 %v6061_v49, %v6061_v49  ;;  %v6070_v53 = vmul.f32 %v6062_v27, %v6062_v27  ;;  %v6071_v30 = vmul.f32 %v6063_v24, %v6063_v24  ;;  %v6072_v38 = vmul.f32 %v6064_v54, %v6064_v54 }
 0xa49   : > { %v6089_v63 = vrot.slane %v6081_v43, %v9160_v1  ;;  %v6096_v7 = vrot.slane %v6082_v19, %v9160_v1  ;;  %v6242_v0 = vcombine.high %v6585_v57, %v6585_v57  ;;  %v6222_v14 = vrot.slane %v6208_v42, %v9160_v1 }
 0xa4a   : > { %v6098_v28 = vcombine.low %v6069_v17, %v6070_v53  ;;  %v6099_v13 = vcombine.low %v6071_v30, %v6072_v38  ;;  %v6249_v23 = vrot.slane %v6585_v57, %v9160_v1  ;;  %v6223_v9 = vcombine.high %v6215_v22, %v6215_v22 }
 0xa4b   : > { %v6097_v25 = vcombine.low %v6089_v63, %v6096_v7  ;;  %v6256_v51 = vrot.slane %v6242_v0, %v9160_v1  ;;  %v6224_v36 = vcombine.high %v6222_v14, %v6222_v14 }
 0xa4c   : > { %v6106_v11 = vrot.slane %v6098_v28, %v9160_v1  ;;  %v6113_v26 = vrot.slane %v6099_v13, %v9160_v1  ;;  %v6257_v16 = vcombine.high %v6249_v23, %v6249_v23 }
 0xa4d   : > { %v6117_v2 = vsel %vm746_vm2, %v6097_v25, 0.0  ;;  %v6258_v35 = vcombine.high %v6256_v51, %v6256_v51 }
 0xa4e   : > { %6118 = vadd.xlane.f32.xlu1 %v6117_v2  ;;  %v6114_v10 = vcombine.low %v6106_v11, %v6113_v26 }
 0xa50   : > { %v6120_v4 = vsel %vm746_vm2, %v6114_v10, 0.0 }
 0xa51   : > { %6121 = vadd.xlane.f32.xlu0 %v6120_v4 }
 0xadb   : > { %v6119_v46 = vpop.xlane.xlu1 %6118 }
 0xadc   : > { %v6123_v58 = vmul.f32 0.03125, %v6119_v46 }
 0xade   : > { %v6125_v59 = vadd.f32 1e-05, %v6123_v58  ;;  %v6122_v45 = vpop.xlane.xlu0 %6121 }
 0xadf   : > { %v6124_v21 = vmul.f32 0.03125, %v6122_v45 }
 0xae0   : > { %7354 = vrsqrt.f32 %v6125_v59 }
 0xae1   : > { %v6126_v39 = vadd.f32 1e-05, %v6124_v21 }
 0xae3   : > { %7356 = vrsqrt.f32 %v6126_v39 }
 0xaea   : > { %v7355_v29 = vpop.eup %7354 }
 0xaeb   : > { %v6137_v31 = vrot.slane %v7355_v29, %v8888_v34  ;;  %v6144_v47 = vrot.slane %v7355_v29, %v8891_v62  ;;  %v6151_v48 = vrot.slane %v7355_v29, %v8894_v50  ;;  %v6158_v41 = vrot.slane %v7355_v29, %v8897_v12 }
 0xaed   : > { %v7357_v15 = vpop.eup %7356  ;;  %v6195_v18 = vmul.f32 %v6137_v31, %v6057_v37  ;;  %v6196_v60 = vmul.f32 %v6144_v47, %v6058_v44  ;;  %v6197_v40 = vmul.f32 %v6151_v48, %v6059_v52  ;;  %v6198_v6 = vmul.f32 %v6158_v41, %v6060_v5 }
 0xaee   : > { %v6165_v1 = vrot.slane %v7357_v15, %v8888_v34  ;;  %v6172_v8 = vrot.slane %v7357_v15, %v8891_v62  ;;  %v6179_v56 = vrot.slane %v7357_v15, %v8894_v50  ;;  %v6186_v55 = vrot.slane %v7357_v15, %v8897_v12 }
 0xaef   : > { %v6229_v32 = vmul.f32 %v6215_v22, %v6195_v18  ;;  %v6230_v33 = vmul.f32 %v6223_v9, %v6196_v60  ;;  %v6231_v3 = vmul.f32 %v6222_v14, %v6197_v40  ;;  %v6232_v20 = vmul.f32 %v6224_v36, %v6198_v6 }
 0xaf0   : > { %v6199_v43 = vmul.f32 %v6165_v1, %v6061_v49  ;;  %v6200_v19 = vmul.f32 %v6172_v8, %v6062_v27  ;;  %v6201_v17 = vmul.f32 %v6179_v56, %v6063_v24  ;;  %v6202_v53 = vmul.f32 %v6186_v55, %v6064_v54 }
 0xaf1   : > { %v6263_v37 = vadd.f32 %v6249_v23, %v6229_v32  ;;  %v6264_v44 = vadd.f32 %v6257_v16, %v6230_v33  ;;  %v6265_v52 = vadd.f32 %v6256_v51, %v6231_v3  ;;  %v6266_v5 = vadd.f32 %v6258_v35, %v6232_v20 }
 0xaf2   : > { %v6233_v30 = vmul.f32 %v6215_v22, %v6199_v43  ;;  %v6234_v34 = vmul.f32 %v6223_v9, %v6200_v19  ;;  %v6235_v38 = vmul.f32 %v6222_v14, %v6201_v17  ;;  %v6236_v62 = vmul.f32 %v6224_v36, %v6202_v53 }
 0xaf3   : > { %6272 = vst.msk [vmem:[%s9128_s1] sm:$0x3] %vm6271_vm9, %v6263_v37  ;;  %6273 = vst.msk [vmem:[%s9128_s1 + $0x2] sm:$0x3] %vm6271_vm9, %v6264_v44 }
 0xaf4   : > { %6274 = vst.msk [vmem:[%s9128_s1 + $0x4] sm:$0x3] %vm6271_vm9, %v6265_v52  ;;  %6275 = vst.msk [vmem:[%s9128_s1 + $0x6] sm:$0x3] %vm6271_vm9, %v6266_v5  ;;  %v6267_v50 = vadd.f32 %v6249_v23, %v6233_v30  ;;  %v6268_v12 = vadd.f32 %v6257_v16, %v6234_v34  ;;  %v6269_v49 = vadd.f32 %v6256_v51, %v6235_v38 }
 0xaf5   : > { %v6270_v27 = vadd.f32 %v6258_v35, %v6236_v62 }
 0xaf6   : > { %6276 = vst.msk [vmem:[%s9128_s1 + $0x8] sm:$0x3] %vm6271_vm9, %v6267_v50  ;;  %6277 = vst.msk [vmem:[%s9128_s1 + $0xa] sm:$0x3] %vm6271_vm9, %v6268_v12 }
 0xaf7   : > { %6278 = vst.msk [vmem:[%s9128_s1 + $0xc] sm:$0x3] %vm6271_vm9, %v6269_v49  ;;  %6279 = vst.msk [vmem:[%s9128_s1 + $0xe] sm:$0x3] %vm6271_vm9, %v6270_v27 }
 0xaf8 PF: > { %s9165_s20 = sld [smem:[#allocation3_spill]]  ;;  %s9166_s25 = sld [smem:[#allocation2_spill]] }
 0xaf9   : > { %s9167_s26 = sld [smem:[#allocation4_spill]] }
 0xafe   : > { %s23_s27 = sadd.s32 1, %s9165_s20  }
 0xaff   : > { %p20_p6 = scmp.ge.s32.totalorder %s23_s27, 4  }
 0xb01   :  { %22 = sbr.rel (!%p20_p6) target bundleno = 6 (0x6), region = 145 }

</bundles_post_ra>
